<compile_context>
chip_gen: v7x
topology: tpu7x:2x2x1
jax: 0.10.0
libtpu: 0.0.40
codegen_flags: <defaults>
</compile_context>

<pallas_src>
import functools

import jax
import jax.numpy as jnp
from jax.experimental import pallas as pl
from jax.experimental.pallas import tpu as pltpu

NEG_SLOPE = 0.01      # PyTorch LeakyReLU default
BN_EPS = 1e-5         # PyTorch BatchNorm2d default
FEATURE_SIZE = 64


def _encoder_kernel(x1_ref, w1_ref, w_ref, sc_ref, bi_ref, fcw_ref, fcb_ref,
                    out_ref, p2_ref, p3_ref, p4_ref, *, bt, s0, cout):
    """Fused 4x(conv+BN+LeakyReLU+pool) + FC for a batch tile of `bt` images.

    x1_ref : (bt, s0*s0, Kpad) bf16    layer-1 im2col (built in the wrapper, K padded)
    w1_ref : (Kpad, cout)      bf16    layer-1 weight, (dy,dx,cin) row order, zero-padded K
    w_ref  : (3, 9, cout, cout) bf16   layers 2-4 weights, tap index = dy*3+dx
    sc_ref : (4, cout) f32             folded BN scale  (gamma / sqrt(var+eps))
    bi_ref : (4, cout) f32             folded BN bias   (beta + (b-mean)*scale)
    fcw_ref: (cout, cout) bf16         FC weight, pre-transposed to (in, out)
    fcb_ref: (1, cout) f32             FC bias
    out_ref: (bt, 1, cout) f32
    p*_ref : bf16 VMEM scratch, zero-padded activations for layers 2-4
    """
    f32 = jnp.float32
    bf16 = jnp.bfloat16

    def affine_lrelu(acc, li):
        # eval-mode BatchNorm (+ conv bias) folded into a per-channel affine, then LeakyReLU
        y = acc * sc_ref[li:li + 1, :] + bi_ref[li:li + 1, :]
        return jnp.where(y > 0, y, NEG_SLOPE * y)

    def maxpool2(y_flat, h):
        # y_flat: (bt*h*h, cout) f32, rows ordered (b, y, x); h even.
        y = jnp.max(y_flat.reshape(bt * h // 2, 2, h, cout), axis=1)      # pool rows
        y = jnp.max(y.reshape(bt * h // 2, h // 2, 2, cout), axis=2)      # pool cols
        return y.reshape(bt, h // 2, h // 2, cout)

    # ---- layer 1: single MXU matmul on the wrapper-built im2col ----
    x1 = x1_ref[...].reshape(bt * s0 * s0, x1_ref.shape[-1])              # bf16
    acc = jnp.dot(x1, w1_ref[...], preferred_element_type=f32)            # (M, cout) f32
    pooled = maxpool2(affine_lrelu(acc, 0), s0)                           # (bt, s0/2, s0/2, cout)

    # ---- layers 2..4: write into bf16 padded scratch, 9 shifted-slab matmuls ----
    pads = (p2_ref, p3_ref, p4_ref)
    h = s0 // 2
    for li in range(1, 4):
        p_ref = pads[li - 1]
        # zero only the 1-px conv-padding border; the interior is fully overwritten below
        zero_row = jnp.zeros((bt, 1, h + 2, cout), dtype=bf16)
        zero_col = jnp.zeros((bt, h, 1, cout), dtype=bf16)
        p_ref[:, 0:1, :, :] = zero_row
        p_ref[:, h + 1:h + 2, :, :] = zero_row
        p_ref[:, 1:h + 1, 0:1, :] = zero_col
        p_ref[:, 1:h + 1, h + 1:h + 2, :] = zero_col
        p_ref[:, 1:h + 1, 1:h + 1, :] = pooled.astype(bf16)   # single f32->bf16 cast
        m = bt * h * h
        acc = None
        for dy in range(3):
            for dx in range(3):
                slab = p_ref[:, dy:dy + h, dx:dx + h, :].reshape(m, cout)   # bf16
                part = jnp.dot(slab, w_ref[li - 1, dy * 3 + dx],
                               preferred_element_type=f32)
                acc = part if acc is None else acc + part
        pooled = maxpool2(affine_lrelu(acc, li), h)
        h //= 2

    # ---- fused FC (final spatial is 1x1 -> flatten == PyTorch view(B, -1)) ----
    feat = pooled.reshape(bt, cout).astype(bf16)
    out = jnp.dot(feat, fcw_ref[...], preferred_element_type=f32) + fcb_ref[...]
    out_ref[...] = out.reshape(bt, 1, cout).astype(out_ref.dtype)


def _pick_batch_tile(B):
    """Largest divisor of B up to 64, keeping the grid >= 2 when B >= 2.

    Large tiles fold the batch into the matmul M dimension (amortizing per-step
    overhead); a grid of >= 2 lets dual-TensorCore chips (v7x) shard the batch
    with dimension_semantics=("parallel",).  On single-TC chips the one extra
    grid step costs ~0.35 us, which is negligible.
    """
    cap = min(64, B)
    if B >= 2:
        cap = min(cap, max(1, B // 2))
    for bt in range(cap, 0, -1):
        if B % bt == 0:
            return bt
    return 1


def omniglot_encoder(x_nchw, params, *, batch_tile=None):
    """x_nchw: (B, 3, 16, 16) float32 -> (B, feature_size) float32."""
    w1, w234, scales, biases, fcw_t, fcb = params
    B, C, H, W = x_nchw.shape
    if H != 16 or W != 16:
        raise ValueError("OmniglotEncoder kernel expects 16x16 inputs "
                         "(4 maxpools -> 1x1 spatial before the FC).")
    cout = scales.shape[-1]
    bt = _pick_batch_tile(B) if batch_tile is None else batch_tile
    assert B % bt == 0, (B, bt)
    k1 = w1.shape[0]                                   # 9 * in_channels, padded to mult. of 8

    # Layer-1 im2col in the wrapper (lane-friendly layout, single K-wide matmul).
    x = jnp.transpose(x_nchw, (0, 2, 3, 1))            # NCHW -> NHWC
    xp = jnp.pad(x, ((0, 0), (1, 1), (1, 1), (0, 0)))
    taps = [xp[:, dy:dy + H, dx:dx + W, :] for dy in range(3) for dx in range(3)]
    xcol = jnp.concatenate(taps, axis=-1).reshape(B, H * W, 9 * C)
    if k1 > 9 * C:                                     # pad K (27 -> 32) for clean lane packing
        xcol = jnp.pad(xcol, ((0, 0), (0, 0), (0, k1 - 9 * C)))
    xcol = xcol.astype(jnp.bfloat16)

    # Advisory cost estimate so XLA overlaps the im2col prep with the kernel.
    flops = 2 * B * (H * W * (9 * C) * cout
                     + (64 + 16 + 4) * 9 * cout * cout
                     + cout * cout)
    bytes_accessed = (xcol.size * 2 + w1.size * 2 + w234.size * 2
                      + scales.size * 4 + biases.size * 4
                      + fcw_t.size * 2 + fcb.size * 4 + B * cout * 4)

    kernel = functools.partial(_encoder_kernel, bt=bt, s0=H, cout=cout)
    out = pl.pallas_call(
        kernel,
        out_shape=jax.ShapeDtypeStruct((B, 1, cout), jnp.float32),
        grid_spec=pltpu.PrefetchScalarGridSpec(
            num_scalar_prefetch=0,
            grid=(B // bt,),
            in_specs=[
                pl.BlockSpec((bt, H * W, k1), lambda b: (b, 0, 0)),        # layer-1 im2col
                pl.BlockSpec((k1, cout), lambda b: (0, 0)),                # w1 (resident)
                pl.BlockSpec((3, 9, cout, cout), lambda b: (0, 0, 0, 0)),  # w2..w4 (resident)
                pl.BlockSpec((4, cout), lambda b: (0, 0)),                 # BN scales
                pl.BlockSpec((4, cout), lambda b: (0, 0)),                 # BN biases
                pl.BlockSpec((cout, cout), lambda b: (0, 0)),              # fc weight (in,out)
                pl.BlockSpec((1, cout), lambda b: (0, 0)),                 # fc bias
            ],
            out_specs=pl.BlockSpec((bt, 1, cout), lambda b: (b, 0, 0)),
            scratch_shapes=[
                pltpu.VMEM((bt, 10, 10, cout), jnp.bfloat16),   # padded act -> layer 2
                pltpu.VMEM((bt, 6, 6, cout), jnp.bfloat16),     # padded act -> layer 3
                pltpu.VMEM((bt, 4, 4, cout), jnp.bfloat16),     # padded act -> layer 4
            ],
        ),
        compiler_params=pltpu.CompilerParams(
            dimension_semantics=("parallel",),
            vmem_limit_bytes=48 * 1024 * 1024,   # headroom for large batch tiles; < v7x physical
        ),
        cost_estimate=pl.CostEstimate(flops=flops, transcendentals=0,
                                      bytes_accessed=bytes_accessed),
    )(xcol, w1, w234, scales, biases, fcw_t, fcb)
    return out.reshape(B, cout)


def init_params(key, feature_size=FEATURE_SIZE, in_channels=3):
    """Deterministic synthetic parameters, packed for the fused kernel."""
    conv_w, conv_scale, conv_bias = [], [], []
    cin = in_channels
    for _ in range(4):
        key, k1, k2, k3, k4, k5, k6 = jax.random.split(key, 7)
        w = 0.05 * jax.random.normal(k1, (3, 3, cin, feature_size), jnp.float32)
        cb = 0.05 * jax.random.normal(k2, (feature_size,), jnp.float32)
        gamma = 1.0 + 0.1 * jax.random.normal(k3, (feature_size,), jnp.float32)
        beta = 0.1 * jax.random.normal(k4, (feature_size,), jnp.float32)
        mean = 0.1 * jax.random.normal(k5, (feature_size,), jnp.float32)
        var = 1.0 + 0.1 * jax.random.uniform(k6, (feature_size,), jnp.float32)
        # fold eval-mode BatchNorm + conv bias into a per-channel scale / bias
        scale = gamma / jnp.sqrt(var + BN_EPS)
        bias = beta + (cb - mean) * scale
        conv_w.append(w)
        conv_scale.append(scale)
        conv_bias.append(bias)
        cin = feature_size
    key, kf1, kf2 = jax.random.split(key, 3)
    fc_w = 0.05 * jax.random.normal(kf1, (feature_size, feature_size), jnp.float32)  # (out, in)
    fc_b = 0.05 * jax.random.normal(kf2, (feature_size,), jnp.float32)

    k1_raw = 9 * in_channels
    k1_pad = ((k1_raw + 7) // 8) * 8                                     # 27 -> 32
    w1 = conv_w[0].reshape(k1_raw, feature_size)
    w1 = jnp.pad(w1, ((0, k1_pad - k1_raw), (0, 0))).astype(jnp.bfloat16)
    w234 = jnp.stack([w.reshape(9, feature_size, feature_size)
                      for w in conv_w[1:]]).astype(jnp.bfloat16)         # (3, 9, 64, 64)
    scales = jnp.stack(conv_scale)                                       # (4, 64) f32
    biases = jnp.stack(conv_bias)                                        # (4, 64) f32
    fcw_t = fc_w.T.astype(jnp.bfloat16)                                  # (in, out)
    fcb = fc_b.reshape(1, feature_size)                                  # f32
    return (w1, w234, scales, biases, fcw_t, fcb)


if __name__ == "__main__":
    key = jax.random.PRNGKey(0)
    key, kp, kx = jax.random.split(key, 3)
    params = init_params(kp)
    # (batch, channels, height, width) per the PyTorch docstring; 16x16 -> 1x1 after 4 pools
    x = jax.random.normal(kx, (2, 3, 16, 16), jnp.float32)
    fwd = jax.jit(omniglot_encoder)
    out = jax.block_until_ready(fwd(x, params))
    assert out.shape == (2, FEATURE_SIZE), out.shape
    print("KERNEL_OK")
</pallas_src>

<mosaic_0001>
module attributes {stable_mosaic.version = 11 : i64} {
  func.func @_encoder_kernel(%arg0: i32, %arg1: memref<1x256x32xbf16, #tpu.memory_space<vmem>>, %arg2: memref<32x64xbf16, #tpu.memory_space<vmem>>, %arg3: memref<3x9x64x64xbf16, #tpu.memory_space<vmem>>, %arg4: memref<4x64xf32, #tpu.memory_space<vmem>>, %arg5: memref<4x64xf32, #tpu.memory_space<vmem>>, %arg6: memref<64x64xbf16, #tpu.memory_space<vmem>>, %arg7: memref<1x64xf32, #tpu.memory_space<vmem>>, %arg8: memref<1x1x64xf32, #tpu.memory_space<vmem>>, %arg9: memref<1x10x10x64xbf16, #tpu.memory_space<vmem>>, %arg10: memref<1x6x6x64xbf16, #tpu.memory_space<vmem>>, %arg11: memref<1x4x4x64xbf16, #tpu.memory_space<vmem>>) attributes {dimension_semantics = [#tpu.dimension_semantics<parallel>], iteration_bounds = array<i64: 2>, scalar_prefetch = 0 : i64, scratch_operands = 3 : i64, tpu.core_type = #tpu.core_type<tc>, window_params = [{transform_indices = @transform_0, window_bounds = array<i64: 1, 256, 32>}, {pipeline_mode = #tpu.pipeline_mode<synchronous>, transform_indices = @transform_1, window_bounds = array<i64: 32, 64>}, {pipeline_mode = #tpu.pipeline_mode<synchronous>, transform_indices = @transform_2, window_bounds = array<i64: 3, 9, 64, 64>}, {pipeline_mode = #tpu.pipeline_mode<synchronous>, transform_indices = @transform_3, window_bounds = array<i64: 4, 64>}, {pipeline_mode = #tpu.pipeline_mode<synchronous>, transform_indices = @transform_4, window_bounds = array<i64: 4, 64>}, {pipeline_mode = #tpu.pipeline_mode<synchronous>, transform_indices = @transform_5, window_bounds = array<i64: 64, 64>}, {pipeline_mode = #tpu.pipeline_mode<synchronous>, transform_indices = @transform_6, window_bounds = array<i64: 1, 64>}, {transform_indices = @transform_7, window_bounds = array<i64: 1, 1, 64>}]} {
    %c0 = arith.constant 0 : index
    %c0_0 = arith.constant 0 : index
    %c0_1 = arith.constant 0 : index
    %0 = vector.load %arg1[%c0, %c0_0, %c0_1] : memref<1x256x32xbf16, #tpu.memory_space<vmem>>, vector<1x256x32xbf16>
    %1 = vector.shape_cast %0 : vector<1x256x32xbf16> to vector<256x32xbf16>
    %c0_2 = arith.constant 0 : index
    %c0_3 = arith.constant 0 : index
    %2 = vector.load %arg2[%c0_2, %c0_3] : memref<32x64xbf16, #tpu.memory_space<vmem>>, vector<32x64xbf16>
    %cst = arith.constant dense<0.000000e+00> : vector<256x64xf32>
    %3 = tpu.matmul %1, %2, %cst {dimension_numbers = #tpu.dot_dimension_numbers<[1], [0], [0], [1], [0, 0, 1, 1], [], []>} : vector<256x32xbf16>, vector<32x64xbf16>, vector<256x64xf32> -> vector<256x64xf32>
    %c0_4 = arith.constant 0 : index
    %c0_5 = arith.constant 0 : index
    %4 = vector.load %arg4[%c0_4, %c0_5] : memref<4x64xf32, #tpu.memory_space<vmem>>, vector<1x64xf32>
    %5 = vector.broadcast %4 : vector<1x64xf32> to vector<256x64xf32>
    %6 = arith.mulf %3, %5 : vector<256x64xf32>
    %c0_6 = arith.constant 0 : index
    %c0_7 = arith.constant 0 : index
    %7 = vector.load %arg5[%c0_6, %c0_7] : memref<4x64xf32, #tpu.memory_space<vmem>>, vector<1x64xf32>
    %8 = vector.broadcast %7 : vector<1x64xf32> to vector<256x64xf32>
    %9 = arith.addf %6, %8 : vector<256x64xf32>
    %cst_8 = arith.constant 0.000000e+00 : f32
    %10 = vector.broadcast %cst_8 : f32 to vector<256x64xf32>
    %11 = arith.cmpf ogt, %9, %10 : vector<256x64xf32>
    %cst_9 = arith.constant 0.00999999977 : f32
    %12 = vector.broadcast %cst_9 : f32 to vector<256x64xf32>
    %13 = arith.mulf %12, %9 : vector<256x64xf32>
    %14 = arith.select %11, %9, %13 : vector<256x64xi1>, vector<256x64xf32>
    %15 = vector.shape_cast %14 : vector<256x64xf32> to vector<8x2x16x64xf32>
    %cst_10 = arith.constant dense<0xFF800000> : vector<8x16x64xf32>
    %16 = vector.multi_reduction <maximumf>, %15, %cst_10 [1] : vector<8x2x16x64xf32> to vector<8x16x64xf32>
    %17 = vector.shape_cast %16 : vector<8x16x64xf32> to vector<8x8x2x64xf32>
    %cst_11 = arith.constant dense<0xFF800000> : vector<8x8x64xf32>
    %18 = vector.multi_reduction <maximumf>, %17, %cst_11 [2] : vector<8x8x2x64xf32> to vector<8x8x64xf32>
    %19 = vector.shape_cast %18 : vector<8x8x64xf32> to vector<1x8x8x64xf32>
    %cst_12 = arith.constant 0.000000e+00 : bf16
    %20 = vector.broadcast %cst_12 : bf16 to vector<1x1x10x64xbf16>
    %cst_13 = arith.constant 0.000000e+00 : bf16
    %21 = vector.broadcast %cst_13 : bf16 to vector<1x8x1x64xbf16>
    %c0_14 = arith.constant 0 : index
    %c0_15 = arith.constant 0 : index
    %c0_16 = arith.constant 0 : index
    %c0_17 = arith.constant 0 : index
    %22 = vector.load %arg9[%c0_14, %c0_15, %c0_16, %c0_17] : memref<1x10x10x64xbf16, #tpu.memory_space<vmem>>, vector<1x1x10x64xbf16>
    tpu.vector_store %arg9[%c0_14, %c0_15, %c0_16, %c0_17], %20 {strides = array<i32>} : memref<1x10x10x64xbf16, #tpu.memory_space<vmem>>, vector<1x1x10x64xbf16>,
    %c0_18 = arith.constant 0 : index
    %c9 = arith.constant 9 : index
    %c0_19 = arith.constant 0 : index
    %c0_20 = arith.constant 0 : index
    %23 = vector.load %arg9[%c0_18, %c9, %c0_19, %c0_20] : memref<1x10x10x64xbf16, #tpu.memory_space<vmem>>, vector<1x1x10x64xbf16>
    tpu.vector_store %arg9[%c0_18, %c9, %c0_19, %c0_20], %20 {strides = array<i32>} : memref<1x10x10x64xbf16, #tpu.memory_space<vmem>>, vector<1x1x10x64xbf16>,
    %c0_21 = arith.constant 0 : index
    %c1 = arith.constant 1 : index
    %c0_22 = arith.constant 0 : index
    %c0_23 = arith.constant 0 : index
    %24 = vector.load %arg9[%c0_21, %c1, %c0_22, %c0_23] : memref<1x10x10x64xbf16, #tpu.memory_space<vmem>>, vector<1x8x1x64xbf16>
    tpu.vector_store %arg9[%c0_21, %c1, %c0_22, %c0_23], %21 {strides = array<i32>} : memref<1x10x10x64xbf16, #tpu.memory_space<vmem>>, vector<1x8x1x64xbf16>,
    %c0_24 = arith.constant 0 : index
    %c1_25 = arith.constant 1 : index
    %c9_26 = arith.constant 9 : index
    %c0_27 = arith.constant 0 : index
    %25 = vector.load %arg9[%c0_24, %c1_25, %c9_26, %c0_27] : memref<1x10x10x64xbf16, #tpu.memory_space<vmem>>, vector<1x8x1x64xbf16>
    tpu.vector_store %arg9[%c0_24, %c1_25, %c9_26, %c0_27], %21 {strides = array<i32>} : memref<1x10x10x64xbf16, #tpu.memory_space<vmem>>, vector<1x8x1x64xbf16>,
    %26 = arith.truncf %19 : vector<1x8x8x64xf32> to vector<1x8x8x64xbf16>
    %c0_28 = arith.constant 0 : index
    %c1_29 = arith.constant 1 : index
    %c1_30 = arith.constant 1 : index
    %c0_31 = arith.constant 0 : index
    %27 = vector.load %arg9[%c0_28, %c1_29, %c1_30, %c0_31] : memref<1x10x10x64xbf16, #tpu.memory_space<vmem>>, vector<1x8x8x64xbf16>
    tpu.vector_store %arg9[%c0_28, %c1_29, %c1_30, %c0_31], %26 {strides = array<i32>} : memref<1x10x10x64xbf16, #tpu.memory_space<vmem>>, vector<1x8x8x64xbf16>,
    %c0_32 = arith.constant 0 : index
    %c0_33 = arith.constant 0 : index
    %c0_34 = arith.constant 0 : index
    %c0_35 = arith.constant 0 : index
    %28 = vector.load %arg9[%c0_32, %c0_33, %c0_34, %c0_35] : memref<1x10x10x64xbf16, #tpu.memory_space<vmem>>, vector<1x8x8x64xbf16>
    %29 = vector.shape_cast %28 : vector<1x8x8x64xbf16> to vector<64x64xbf16>
    %c0_36 = arith.constant 0 : index
    %c0_37 = arith.constant 0 : index
    %c0_38 = arith.constant 0 : index
    %c0_39 = arith.constant 0 : index
    %30 = vector.load %arg3[%c0_36, %c0_37, %c0_38, %c0_39] : memref<3x9x64x64xbf16, #tpu.memory_space<vmem>>, vector<1x1x64x64xbf16>
    %31 = vector.shape_cast %30 : vector<1x1x64x64xbf16> to vector<64x64xbf16>
    %cst_40 = arith.constant dense<0.000000e+00> : vector<64x64xf32>
    %32 = tpu.matmul %29, %31, %cst_40 {dimension_numbers = #tpu.dot_dimension_numbers<[1], [0], [0], [1], [0, 0, 1, 1], [], []>} : vector<64x64xbf16>, vector<64x64xbf16>, vector<64x64xf32> -> vector<64x64xf32>
    %c0_41 = arith.constant 0 : index
    %c0_42 = arith.constant 0 : index
    %c1_43 = arith.constant 1 : index
    %c0_44 = arith.constant 0 : index
    %33 = vector.load %arg9[%c0_41, %c0_42, %c1_43, %c0_44] : memref<1x10x10x64xbf16, #tpu.memory_space<vmem>>, vector<1x8x8x64xbf16>
    %34 = vector.shape_cast %33 : vector<1x8x8x64xbf16> to vector<64x64xbf16>
    %c0_45 = arith.constant 0 : index
    %c1_46 = arith.constant 1 : index
    %c0_47 = arith.constant 0 : index
    %c0_48 = arith.constant 0 : index
    %35 = vector.load %arg3[%c0_45, %c1_46, %c0_47, %c0_48] : memref<3x9x64x64xbf16, #tpu.memory_space<vmem>>, vector<1x1x64x64xbf16>
    %36 = vector.shape_cast %35 : vector<1x1x64x64xbf16> to vector<64x64xbf16>
    %cst_49 = arith.constant dense<0.000000e+00> : vector<64x64xf32>
    %37 = tpu.matmul %34, %36, %cst_49 {dimension_numbers = #tpu.dot_dimension_numbers<[1], [0], [0], [1], [0, 0, 1, 1], [], []>} : vector<64x64xbf16>, vector<64x64xbf16>, vector<64x64xf32> -> vector<64x64xf32>
    %38 = arith.addf %32, %37 : vector<64x64xf32>
    %c0_50 = arith.constant 0 : index
    %c0_51 = arith.constant 0 : index
    %c2 = arith.constant 2 : index
    %c0_52 = arith.constant 0 : index
    %39 = vector.load %arg9[%c0_50, %c0_51, %c2, %c0_52] : memref<1x10x10x64xbf16, #tpu.memory_space<vmem>>, vector<1x8x8x64xbf16>
    %40 = vector.shape_cast %39 : vector<1x8x8x64xbf16> to vector<64x64xbf16>
    %c0_53 = arith.constant 0 : index
    %c2_54 = arith.constant 2 : index
    %c0_55 = arith.constant 0 : index
    %c0_56 = arith.constant 0 : index
    %41 = vector.load %arg3[%c0_53, %c2_54, %c0_55, %c0_56] : memref<3x9x64x64xbf16, #tpu.memory_space<vmem>>, vector<1x1x64x64xbf16>
    %42 = vector.shape_cast %41 : vector<1x1x64x64xbf16> to vector<64x64xbf16>
    %cst_57 = arith.constant dense<0.000000e+00> : vector<64x64xf32>
    %43 = tpu.matmul %40, %42, %cst_57 {dimension_numbers = #tpu.dot_dimension_numbers<[1], [0], [0], [1], [0, 0, 1, 1], [], []>} : vector<64x64xbf16>, vector<64x64xbf16>, vector<64x64xf32> -> vector<64x64xf32>
    %44 = arith.addf %38, %43 : vector<64x64xf32>
    %c0_58 = arith.constant 0 : index
    %c1_59 = arith.constant 1 : index
    %c0_60 = arith.constant 0 : index
    %c0_61 = arith.constant 0 : index
    %45 = vector.load %arg9[%c0_58, %c1_59, %c0_60, %c0_61] : memref<1x10x10x64xbf16, #tpu.memory_space<vmem>>, vector<1x8x8x64xbf16>
    %46 = vector.shape_cast %45 : vector<1x8x8x64xbf16> to vector<64x64xbf16>
    %c0_62 = arith.constant 0 : index
    %c3 = arith.constant 3 : index
    %c0_63 = arith.constant 0 : index
    %c0_64 = arith.constant 0 : index
    %47 = vector.load %arg3[%c0_62, %c3, %c0_63, %c0_64] : memref<3x9x64x64xbf16, #tpu.memory_space<vmem>>, vector<1x1x64x64xbf16>
    %48 = vector.shape_cast %47 : vector<1x1x64x64xbf16> to vector<64x64xbf16>
    %cst_65 = arith.constant dense<0.000000e+00> : vector<64x64xf32>
    %49 = tpu.matmul %46, %48, %cst_65 {dimension_numbers = #tpu.dot_dimension_numbers<[1], [0], [0], [1], [0, 0, 1, 1], [], []>} : vector<64x64xbf16>, vector<64x64xbf16>, vector<64x64xf32> -> vector<64x64xf32>
    %50 = arith.addf %44, %49 : vector<64x64xf32>
    %c0_66 = arith.constant 0 : index
    %c1_67 = arith.constant 1 : index
    %c1_68 = arith.constant 1 : index
    %c0_69 = arith.constant 0 : index
    %51 = vector.load %arg9[%c0_66, %c1_67, %c1_68, %c0_69] : memref<1x10x10x64xbf16, #tpu.memory_space<vmem>>, vector<1x8x8x64xbf16>
    %52 = vector.shape_cast %51 : vector<1x8x8x64xbf16> to vector<64x64xbf16>
    %c0_70 = arith.constant 0 : index
    %c4 = arith.constant 4 : index
    %c0_71 = arith.constant 0 : index
    %c0_72 = arith.constant 0 : index
    %53 = vector.load %arg3[%c0_70, %c4, %c0_71, %c0_72] : memref<3x9x64x64xbf16, #tpu.memory_space<vmem>>, vector<1x1x64x64xbf16>
    %54 = vector.shape_cast %53 : vector<1x1x64x64xbf16> to vector<64x64xbf16>
    %cst_73 = arith.constant dense<0.000000e+00> : vector<64x64xf32>
    %55 = tpu.matmul %52, %54, %cst_73 {dimension_numbers = #tpu.dot_dimension_numbers<[1], [0], [0], [1], [0, 0, 1, 1], [], []>} : vector<64x64xbf16>, vector<64x64xbf16>, vector<64x64xf32> -> vector<64x64xf32>
    %56 = arith.addf %50, %55 : vector<64x64xf32>
    %c0_74 = arith.constant 0 : index
    %c1_75 = arith.constant 1 : index
    %c2_76 = arith.constant 2 : index
    %c0_77 = arith.constant 0 : index
    %57 = vector.load %arg9[%c0_74, %c1_75, %c2_76, %c0_77] : memref<1x10x10x64xbf16, #tpu.memory_space<vmem>>, vector<1x8x8x64xbf16>
    %58 = vector.shape_cast %57 : vector<1x8x8x64xbf16> to vector<64x64xbf16>
    %c0_78 = arith.constant 0 : index
    %c5 = arith.constant 5 : index
    %c0_79 = arith.constant 0 : index
    %c0_80 = arith.constant 0 : index
    %59 = vector.load %arg3[%c0_78, %c5, %c0_79, %c0_80] : memref<3x9x64x64xbf16, #tpu.memory_space<vmem>>, vector<1x1x64x64xbf16>
    %60 = vector.shape_cast %59 : vector<1x1x64x64xbf16> to vector<64x64xbf16>
    %cst_81 = arith.constant dense<0.000000e+00> : vector<64x64xf32>
    %61 = tpu.matmul %58, %60, %cst_81 {dimension_numbers = #tpu.dot_dimension_numbers<[1], [0], [0], [1], [0, 0, 1, 1], [], []>} : vector<64x64xbf16>, vector<64x64xbf16>, vector<64x64xf32> -> vector<64x64xf32>
    %62 = arith.addf %56, %61 : vector<64x64xf32>
    %c0_82 = arith.constant 0 : index
    %c2_83 = arith.constant 2 : index
    %c0_84 = arith.constant 0 : index
    %c0_85 = arith.constant 0 : index
    %63 = vector.load %arg9[%c0_82, %c2_83, %c0_84, %c0_85] : memref<1x10x10x64xbf16, #tpu.memory_space<vmem>>, vector<1x8x8x64xbf16>
    %64 = vector.shape_cast %63 : vector<1x8x8x64xbf16> to vector<64x64xbf16>
    %c0_86 = arith.constant 0 : index
    %c6 = arith.constant 6 : index
    %c0_87 = arith.constant 0 : index
    %c0_88 = arith.constant 0 : index
    %65 = vector.load %arg3[%c0_86, %c6, %c0_87, %c0_88] : memref<3x9x64x64xbf16, #tpu.memory_space<vmem>>, vector<1x1x64x64xbf16>
    %66 = vector.shape_cast %65 : vector<1x1x64x64xbf16> to vector<64x64xbf16>
    %cst_89 = arith.constant dense<0.000000e+00> : vector<64x64xf32>
    %67 = tpu.matmul %64, %66, %cst_89 {dimension_numbers = #tpu.dot_dimension_numbers<[1], [0], [0], [1], [0, 0, 1, 1], [], []>} : vector<64x64xbf16>, vector<64x64xbf16>, vector<64x64xf32> -> vector<64x64xf32>
    %68 = arith.addf %62, %67 : vector<64x64xf32>
    %c0_90 = arith.constant 0 : index
    %c2_91 = arith.constant 2 : index
    %c1_92 = arith.constant 1 : index
    %c0_93 = arith.constant 0 : index
    %69 = vector.load %arg9[%c0_90, %c2_91, %c1_92, %c0_93] : memref<1x10x10x64xbf16, #tpu.memory_space<vmem>>, vector<1x8x8x64xbf16>
    %70 = vector.shape_cast %69 : vector<1x8x8x64xbf16> to vector<64x64xbf16>
    %c0_94 = arith.constant 0 : index
    %c7 = arith.constant 7 : index
    %c0_95 = arith.constant 0 : index
    %c0_96 = arith.constant 0 : index
    %71 = vector.load %arg3[%c0_94, %c7, %c0_95, %c0_96] : memref<3x9x64x64xbf16, #tpu.memory_space<vmem>>, vector<1x1x64x64xbf16>
    %72 = vector.shape_cast %71 : vector<1x1x64x64xbf16> to vector<64x64xbf16>
    %cst_97 = arith.constant dense<0.000000e+00> : vector<64x64xf32>
    %73 = tpu.matmul %70, %72, %cst_97 {dimension_numbers = #tpu.dot_dimension_numbers<[1], [0], [0], [1], [0, 0, 1, 1], [], []>} : vector<64x64xbf16>, vector<64x64xbf16>, vector<64x64xf32> -> vector<64x64xf32>
    %74 = arith.addf %68, %73 : vector<64x64xf32>
    %c0_98 = arith.constant 0 : index
    %c2_99 = arith.constant 2 : index
    %c2_100 = arith.constant 2 : index
    %c0_101 = arith.constant 0 : index
    %75 = vector.load %arg9[%c0_98, %c2_99, %c2_100, %c0_101] : memref<1x10x10x64xbf16, #tpu.memory_space<vmem>>, vector<1x8x8x64xbf16>
    %76 = vector.shape_cast %75 : vector<1x8x8x64xbf16> to vector<64x64xbf16>
    %c0_102 = arith.constant 0 : index
    %c8 = arith.constant 8 : index
    %c0_103 = arith.constant 0 : index
    %c0_104 = arith.constant 0 : index
    %77 = vector.load %arg3[%c0_102, %c8, %c0_103, %c0_104] : memref<3x9x64x64xbf16, #tpu.memory_space<vmem>>, vector<1x1x64x64xbf16>
    %78 = vector.shape_cast %77 : vector<1x1x64x64xbf16> to vector<64x64xbf16>
    %cst_105 = arith.constant dense<0.000000e+00> : vector<64x64xf32>
    %79 = tpu.matmul %76, %78, %cst_105 {dimension_numbers = #tpu.dot_dimension_numbers<[1], [0], [0], [1], [0, 0, 1, 1], [], []>} : vector<64x64xbf16>, vector<64x64xbf16>, vector<64x64xf32> -> vector<64x64xf32>
    %80 = arith.addf %74, %79 : vector<64x64xf32>
    %c1_106 = arith.constant 1 : index
    %c0_107 = arith.constant 0 : index
    %81 = vector.load %arg4[%c1_106, %c0_107] : memref<4x64xf32, #tpu.memory_space<vmem>>, vector<1x64xf32>
    %82 = vector.broadcast %81 : vector<1x64xf32> to vector<64x64xf32>
    %83 = arith.mulf %80, %82 : vector<64x64xf32>
    %c1_108 = arith.constant 1 : index
    %c0_109 = arith.constant 0 : index
    %84 = vector.load %arg5[%c1_108, %c0_109] : memref<4x64xf32, #tpu.memory_space<vmem>>, vector<1x64xf32>
    %85 = vector.broadcast %84 : vector<1x64xf32> to vector<64x64xf32>
    %86 = arith.addf %83, %85 : vector<64x64xf32>
    %cst_110 = arith.constant 0.000000e+00 : f32
    %87 = vector.broadcast %cst_110 : f32 to vector<64x64xf32>
    %88 = arith.cmpf ogt, %86, %87 : vector<64x64xf32>
    %cst_111 = arith.constant 0.00999999977 : f32
    %89 = vector.broadcast %cst_111 : f32 to vector<64x64xf32>
    %90 = arith.mulf %89, %86 : vector<64x64xf32>
    %91 = arith.select %88, %86, %90 : vector<64x64xi1>, vector<64x64xf32>
    %92 = vector.shape_cast %91 : vector<64x64xf32> to vector<4x2x8x64xf32>
    %cst_112 = arith.constant dense<0xFF800000> : vector<4x8x64xf32>
    %93 = vector.multi_reduction <maximumf>, %92, %cst_112 [1] : vector<4x2x8x64xf32> to vector<4x8x64xf32>
    %94 = vector.shape_cast %93 : vector<4x8x64xf32> to vector<4x4x2x64xf32>
    %cst_113 = arith.constant dense<0xFF800000> : vector<4x4x64xf32>
    %95 = vector.multi_reduction <maximumf>, %94, %cst_113 [2] : vector<4x4x2x64xf32> to vector<4x4x64xf32>
    %96 = vector.shape_cast %95 : vector<4x4x64xf32> to vector<1x4x4x64xf32>
    %cst_114 = arith.constant 0.000000e+00 : bf16
    %97 = vector.broadcast %cst_114 : bf16 to vector<1x1x6x64xbf16>
    %cst_115 = arith.constant 0.000000e+00 : bf16
    %98 = vector.broadcast %cst_115 : bf16 to vector<1x4x1x64xbf16>
    %c0_116 = arith.constant 0 : index
    %c0_117 = arith.constant 0 : index
    %c0_118 = arith.constant 0 : index
    %c0_119 = arith.constant 0 : index
    %99 = vector.load %arg10[%c0_116, %c0_117, %c0_118, %c0_119] : memref<1x6x6x64xbf16, #tpu.memory_space<vmem>>, vector<1x1x6x64xbf16>
    tpu.vector_store %arg10[%c0_116, %c0_117, %c0_118, %c0_119], %97 {strides = array<i32>} : memref<1x6x6x64xbf16, #tpu.memory_space<vmem>>, vector<1x1x6x64xbf16>,
    %c0_120 = arith.constant 0 : index
    %c5_121 = arith.constant 5 : index
    %c0_122 = arith.constant 0 : index
    %c0_123 = arith.constant 0 : index
    %100 = vector.load %arg10[%c0_120, %c5_121, %c0_122, %c0_123] : memref<1x6x6x64xbf16, #tpu.memory_space<vmem>>, vector<1x1x6x64xbf16>
    tpu.vector_store %arg10[%c0_120, %c5_121, %c0_122, %c0_123], %97 {strides = array<i32>} : memref<1x6x6x64xbf16, #tpu.memory_space<vmem>>, vector<1x1x6x64xbf16>,
    %c0_124 = arith.constant 0 : index
    %c1_125 = arith.constant 1 : index
    %c0_126 = arith.constant 0 : index
    %c0_127 = arith.constant 0 : index
    %101 = vector.load %arg10[%c0_124, %c1_125, %c0_126, %c0_127] : memref<1x6x6x64xbf16, #tpu.memory_space<vmem>>, vector<1x4x1x64xbf16>
    tpu.vector_store %arg10[%c0_124, %c1_125, %c0_126, %c0_127], %98 {strides = array<i32>} : memref<1x6x6x64xbf16, #tpu.memory_space<vmem>>, vector<1x4x1x64xbf16>,
    %c0_128 = arith.constant 0 : index
    %c1_129 = arith.constant 1 : index
    %c5_130 = arith.constant 5 : index
    %c0_131 = arith.constant 0 : index
    %102 = vector.load %arg10[%c0_128, %c1_129, %c5_130, %c0_131] : memref<1x6x6x64xbf16, #tpu.memory_space<vmem>>, vector<1x4x1x64xbf16>
    tpu.vector_store %arg10[%c0_128, %c1_129, %c5_130, %c0_131], %98 {strides = array<i32>} : memref<1x6x6x64xbf16, #tpu.memory_space<vmem>>, vector<1x4x1x64xbf16>,
    %103 = arith.truncf %96 : vector<1x4x4x64xf32> to vector<1x4x4x64xbf16>
    %c0_132 = arith.constant 0 : index
    %c1_133 = arith.constant 1 : index
    %c1_134 = arith.constant 1 : index
    %c0_135 = arith.constant 0 : index
    %104 = vector.load %arg10[%c0_132, %c1_133, %c1_134, %c0_135] : memref<1x6x6x64xbf16, #tpu.memory_space<vmem>>, vector<1x4x4x64xbf16>
    tpu.vector_store %arg10[%c0_132, %c1_133, %c1_134, %c0_135], %103 {strides = array<i32>} : memref<1x6x6x64xbf16, #tpu.memory_space<vmem>>, vector<1x4x4x64xbf16>,
    %c0_136 = arith.constant 0 : index
    %c0_137 = arith.constant 0 : index
    %c0_138 = arith.constant 0 : index
    %c0_139 = arith.constant 0 : index
    %105 = vector.load %arg10[%c0_136, %c0_137, %c0_138, %c0_139] : memref<1x6x6x64xbf16, #tpu.memory_space<vmem>>, vector<1x4x4x64xbf16>
    %106 = vector.shape_cast %105 : vector<1x4x4x64xbf16> to vector<16x64xbf16>
    %c1_140 = arith.constant 1 : index
    %c0_141 = arith.constant 0 : index
    %c0_142 = arith.constant 0 : index
    %c0_143 = arith.constant 0 : index
    %107 = vector.load %arg3[%c1_140, %c0_141, %c0_142, %c0_143] : memref<3x9x64x64xbf16, #tpu.memory_space<vmem>>, vector<1x1x64x64xbf16>
    %108 = vector.shape_cast %107 : vector<1x1x64x64xbf16> to vector<64x64xbf16>
    %cst_144 = arith.constant dense<0.000000e+00> : vector<16x64xf32>
    %109 = tpu.matmul %106, %108, %cst_144 {dimension_numbers = #tpu.dot_dimension_numbers<[1], [0], [0], [1], [0, 0, 1, 1], [], []>} : vector<16x64xbf16>, vector<64x64xbf16>, vector<16x64xf32> -> vector<16x64xf32>
    %c0_145 = arith.constant 0 : index
    %c0_146 = arith.constant 0 : index
    %c1_147 = arith.constant 1 : index
    %c0_148 = arith.constant 0 : index
    %110 = vector.load %arg10[%c0_145, %c0_146, %c1_147, %c0_148] : memref<1x6x6x64xbf16, #tpu.memory_space<vmem>>, vector<1x4x4x64xbf16>
    %111 = vector.shape_cast %110 : vector<1x4x4x64xbf16> to vector<16x64xbf16>
    %c1_149 = arith.constant 1 : index
    %c1_150 = arith.constant 1 : index
    %c0_151 = arith.constant 0 : index
    %c0_152 = arith.constant 0 : index
    %112 = vector.load %arg3[%c1_149, %c1_150, %c0_151, %c0_152] : memref<3x9x64x64xbf16, #tpu.memory_space<vmem>>, vector<1x1x64x64xbf16>
    %113 = vector.shape_cast %112 : vector<1x1x64x64xbf16> to vector<64x64xbf16>
    %cst_153 = arith.constant dense<0.000000e+00> : vector<16x64xf32>
    %114 = tpu.matmul %111, %113, %cst_153 {dimension_numbers = #tpu.dot_dimension_numbers<[1], [0], [0], [1], [0, 0, 1, 1], [], []>} : vector<16x64xbf16>, vector<64x64xbf16>, vector<16x64xf32> -> vector<16x64xf32>
    %115 = arith.addf %109, %114 : vector<16x64xf32>
    %c0_154 = arith.constant 0 : index
    %c0_155 = arith.constant 0 : index
    %c2_156 = arith.constant 2 : index
    %c0_157 = arith.constant 0 : index
    %116 = vector.load %arg10[%c0_154, %c0_155, %c2_156, %c0_157] : memref<1x6x6x64xbf16, #tpu.memory_space<vmem>>, vector<1x4x4x64xbf16>
    %117 = vector.shape_cast %116 : vector<1x4x4x64xbf16> to vector<16x64xbf16>
    %c1_158 = arith.constant 1 : index
    %c2_159 = arith.constant 2 : index
    %c0_160 = arith.constant 0 : index
    %c0_161 = arith.constant 0 : index
    %118 = vector.load %arg3[%c1_158, %c2_159, %c0_160, %c0_161] : memref<3x9x64x64xbf16, #tpu.memory_space<vmem>>, vector<1x1x64x64xbf16>
    %119 = vector.shape_cast %118 : vector<1x1x64x64xbf16> to vector<64x64xbf16>
    %cst_162 = arith.constant dense<0.000000e+00> : vector<16x64xf32>
    %120 = tpu.matmul %117, %119, %cst_162 {dimension_numbers = #tpu.dot_dimension_numbers<[1], [0], [0], [1], [0, 0, 1, 1], [], []>} : vector<16x64xbf16>, vector<64x64xbf16>, vector<16x64xf32> -> vector<16x64xf32>
    %121 = arith.addf %115, %120 : vector<16x64xf32>
    %c0_163 = arith.constant 0 : index
    %c1_164 = arith.constant 1 : index
    %c0_165 = arith.constant 0 : index
    %c0_166 = arith.constant 0 : index
    %122 = vector.load %arg10[%c0_163, %c1_164, %c0_165, %c0_166] : memref<1x6x6x64xbf16, #tpu.memory_space<vmem>>, vector<1x4x4x64xbf16>
    %123 = vector.shape_cast %122 : vector<1x4x4x64xbf16> to vector<16x64xbf16>
    %c1_167 = arith.constant 1 : index
    %c3_168 = arith.constant 3 : index
    %c0_169 = arith.constant 0 : index
    %c0_170 = arith.constant 0 : index
    %124 = vector.load %arg3[%c1_167, %c3_168, %c0_169, %c0_170] : memref<3x9x64x64xbf16, #tpu.memory_space<vmem>>, vector<1x1x64x64xbf16>
    %125 = vector.shape_cast %124 : vector<1x1x64x64xbf16> to vector<64x64xbf16>
    %cst_171 = arith.constant dense<0.000000e+00> : vector<16x64xf32>
    %126 = tpu.matmul %123, %125, %cst_171 {dimension_numbers = #tpu.dot_dimension_numbers<[1], [0], [0], [1], [0, 0, 1, 1], [], []>} : vector<16x64xbf16>, vector<64x64xbf16>, vector<16x64xf32> -> vector<16x64xf32>
    %127 = arith.addf %121, %126 : vector<16x64xf32>
    %c0_172 = arith.constant 0 : index
    %c1_173 = arith.constant 1 : index
    %c1_174 = arith.constant 1 : index
    %c0_175 = arith.constant 0 : index
    %128 = vector.load %arg10[%c0_172, %c1_173, %c1_174, %c0_175] : memref<1x6x6x64xbf16, #tpu.memory_space<vmem>>, vector<1x4x4x64xbf16>
    %129 = vector.shape_cast %128 : vector<1x4x4x64xbf16> to vector<16x64xbf16>
    %c1_176 = arith.constant 1 : index
    %c4_177 = arith.constant 4 : index
    %c0_178 = arith.constant 0 : index
    %c0_179 = arith.constant 0 : index
    %130 = vector.load %arg3[%c1_176, %c4_177, %c0_178, %c0_179] : memref<3x9x64x64xbf16, #tpu.memory_space<vmem>>, vector<1x1x64x64xbf16>
    %131 = vector.shape_cast %130 : vector<1x1x64x64xbf16> to vector<64x64xbf16>
    %cst_180 = arith.constant dense<0.000000e+00> : vector<16x64xf32>
    %132 = tpu.matmul %129, %131, %cst_180 {dimension_numbers = #tpu.dot_dimension_numbers<[1], [0], [0], [1], [0, 0, 1, 1], [], []>} : vector<16x64xbf16>, vector<64x64xbf16>, vector<16x64xf32> -> vector<16x64xf32>
    %133 = arith.addf %127, %132 : vector<16x64xf32>
    %c0_181 = arith.constant 0 : index
    %c1_182 = arith.constant 1 : index
    %c2_183 = arith.constant 2 : index
    %c0_184 = arith.constant 0 : index
    %134 = vector.load %arg10[%c0_181, %c1_182, %c2_183, %c0_184] : memref<1x6x6x64xbf16, #tpu.memory_space<vmem>>, vector<1x4x4x64xbf16>
    %135 = vector.shape_cast %134 : vector<1x4x4x64xbf16> to vector<16x64xbf16>
    %c1_185 = arith.constant 1 : index
    %c5_186 = arith.constant 5 : index
    %c0_187 = arith.constant 0 : index
    %c0_188 = arith.constant 0 : index
    %136 = vector.load %arg3[%c1_185, %c5_186, %c0_187, %c0_188] : memref<3x9x64x64xbf16, #tpu.memory_space<vmem>>, vector<1x1x64x64xbf16>
    %137 = vector.shape_cast %136 : vector<1x1x64x64xbf16> to vector<64x64xbf16>
    %cst_189 = arith.constant dense<0.000000e+00> : vector<16x64xf32>
    %138 = tpu.matmul %135, %137, %cst_189 {dimension_numbers = #tpu.dot_dimension_numbers<[1], [0], [0], [1], [0, 0, 1, 1], [], []>} : vector<16x64xbf16>, vector<64x64xbf16>, vector<16x64xf32> -> vector<16x64xf32>
    %139 = arith.addf %133, %138 : vector<16x64xf32>
    %c0_190 = arith.constant 0 : index
    %c2_191 = arith.constant 2 : index
    %c0_192 = arith.constant 0 : index
    %c0_193 = arith.constant 0 : index
    %140 = vector.load %arg10[%c0_190, %c2_191, %c0_192, %c0_193] : memref<1x6x6x64xbf16, #tpu.memory_space<vmem>>, vector<1x4x4x64xbf16>
    %141 = vector.shape_cast %140 : vector<1x4x4x64xbf16> to vector<16x64xbf16>
    %c1_194 = arith.constant 1 : index
    %c6_195 = arith.constant 6 : index
    %c0_196 = arith.constant 0 : index
    %c0_197 = arith.constant 0 : index
    %142 = vector.load %arg3[%c1_194, %c6_195, %c0_196, %c0_197] : memref<3x9x64x64xbf16, #tpu.memory_space<vmem>>, vector<1x1x64x64xbf16>
    %143 = vector.shape_cast %142 : vector<1x1x64x64xbf16> to vector<64x64xbf16>
    %cst_198 = arith.constant dense<0.000000e+00> : vector<16x64xf32>
    %144 = tpu.matmul %141, %143, %cst_198 {dimension_numbers = #tpu.dot_dimension_numbers<[1], [0], [0], [1], [0, 0, 1, 1], [], []>} : vector<16x64xbf16>, vector<64x64xbf16>, vector<16x64xf32> -> vector<16x64xf32>
    %145 = arith.addf %139, %144 : vector<16x64xf32>
    %c0_199 = arith.constant 0 : index
    %c2_200 = arith.constant 2 : index
    %c1_201 = arith.constant 1 : index
    %c0_202 = arith.constant 0 : index
    %146 = vector.load %arg10[%c0_199, %c2_200, %c1_201, %c0_202] : memref<1x6x6x64xbf16, #tpu.memory_space<vmem>>, vector<1x4x4x64xbf16>
    %147 = vector.shape_cast %146 : vector<1x4x4x64xbf16> to vector<16x64xbf16>
    %c1_203 = arith.constant 1 : index
    %c7_204 = arith.constant 7 : index
    %c0_205 = arith.constant 0 : index
    %c0_206 = arith.constant 0 : index
    %148 = vector.load %arg3[%c1_203, %c7_204, %c0_205, %c0_206] : memref<3x9x64x64xbf16, #tpu.memory_space<vmem>>, vector<1x1x64x64xbf16>
    %149 = vector.shape_cast %148 : vector<1x1x64x64xbf16> to vector<64x64xbf16>
    %cst_207 = arith.constant dense<0.000000e+00> : vector<16x64xf32>
    %150 = tpu.matmul %147, %149, %cst_207 {dimension_numbers = #tpu.dot_dimension_numbers<[1], [0], [0], [1], [0, 0, 1, 1], [], []>} : vector<16x64xbf16>, vector<64x64xbf16>, vector<16x64xf32> -> vector<16x64xf32>
    %151 = arith.addf %145, %150 : vector<16x64xf32>
    %c0_208 = arith.constant 0 : index
    %c2_209 = arith.constant 2 : index
    %c2_210 = arith.constant 2 : index
    %c0_211 = arith.constant 0 : index
    %152 = vector.load %arg10[%c0_208, %c2_209, %c2_210, %c0_211] : memref<1x6x6x64xbf16, #tpu.memory_space<vmem>>, vector<1x4x4x64xbf16>
    %153 = vector.shape_cast %152 : vector<1x4x4x64xbf16> to vector<16x64xbf16>
    %c1_212 = arith.constant 1 : index
    %c8_213 = arith.constant 8 : index
    %c0_214 = arith.constant 0 : index
    %c0_215 = arith.constant 0 : index
    %154 = vector.load %arg3[%c1_212, %c8_213, %c0_214, %c0_215] : memref<3x9x64x64xbf16, #tpu.memory_space<vmem>>, vector<1x1x64x64xbf16>
    %155 = vector.shape_cast %154 : vector<1x1x64x64xbf16> to vector<64x64xbf16>
    %cst_216 = arith.constant dense<0.000000e+00> : vector<16x64xf32>
    %156 = tpu.matmul %153, %155, %cst_216 {dimension_numbers = #tpu.dot_dimension_numbers<[1], [0], [0], [1], [0, 0, 1, 1], [], []>} : vector<16x64xbf16>, vector<64x64xbf16>, vector<16x64xf32> -> vector<16x64xf32>
    %157 = arith.addf %151, %156 : vector<16x64xf32>
    %c2_217 = arith.constant 2 : index
    %c0_218 = arith.constant 0 : index
    %158 = vector.load %arg4[%c2_217, %c0_218] : memref<4x64xf32, #tpu.memory_space<vmem>>, vector<1x64xf32>
    %159 = vector.broadcast %158 : vector<1x64xf32> to vector<16x64xf32>
    %160 = arith.mulf %157, %159 : vector<16x64xf32>
    %c2_219 = arith.constant 2 : index
    %c0_220 = arith.constant 0 : index
    %161 = vector.load %arg5[%c2_219, %c0_220] : memref<4x64xf32, #tpu.memory_space<vmem>>, vector<1x64xf32>
    %162 = vector.broadcast %161 : vector<1x64xf32> to vector<16x64xf32>
    %163 = arith.addf %160, %162 : vector<16x64xf32>
    %cst_221 = arith.constant 0.000000e+00 : f32
    %164 = vector.broadcast %cst_221 : f32 to vector<16x64xf32>
    %165 = arith.cmpf ogt, %163, %164 : vector<16x64xf32>
    %cst_222 = arith.constant 0.00999999977 : f32
    %166 = vector.broadcast %cst_222 : f32 to vector<16x64xf32>
    %167 = arith.mulf %166, %163 : vector<16x64xf32>
    %168 = arith.select %165, %163, %167 : vector<16x64xi1>, vector<16x64xf32>
    %169 = vector.shape_cast %168 : vector<16x64xf32> to vector<2x2x4x64xf32>
    %cst_223 = arith.constant dense<0xFF800000> : vector<2x4x64xf32>
    %170 = vector.multi_reduction <maximumf>, %169, %cst_223 [1] : vector<2x2x4x64xf32> to vector<2x4x64xf32>
    %171 = vector.shape_cast %170 : vector<2x4x64xf32> to vector<2x2x2x64xf32>
    %cst_224 = arith.constant dense<0xFF800000> : vector<2x2x64xf32>
    %172 = vector.multi_reduction <maximumf>, %171, %cst_224 [2] : vector<2x2x2x64xf32> to vector<2x2x64xf32>
    %173 = vector.shape_cast %172 : vector<2x2x64xf32> to vector<1x2x2x64xf32>
    %cst_225 = arith.constant 0.000000e+00 : bf16
    %174 = vector.broadcast %cst_225 : bf16 to vector<1x1x4x64xbf16>
    %cst_226 = arith.constant 0.000000e+00 : bf16
    %175 = vector.broadcast %cst_226 : bf16 to vector<1x2x1x64xbf16>
    %c0_227 = arith.constant 0 : index
    %c0_228 = arith.constant 0 : index
    %c0_229 = arith.constant 0 : index
    %c0_230 = arith.constant 0 : index
    %176 = vector.load %arg11[%c0_227, %c0_228, %c0_229, %c0_230] : memref<1x4x4x64xbf16, #tpu.memory_space<vmem>>, vector<1x1x4x64xbf16>
    tpu.vector_store %arg11[%c0_227, %c0_228, %c0_229, %c0_230], %174 {strides = array<i32>} : memref<1x4x4x64xbf16, #tpu.memory_space<vmem>>, vector<1x1x4x64xbf16>,
    %c0_231 = arith.constant 0 : index
    %c3_232 = arith.constant 3 : index
    %c0_233 = arith.constant 0 : index
    %c0_234 = arith.constant 0 : index
    %177 = vector.load %arg11[%c0_231, %c3_232, %c0_233, %c0_234] : memref<1x4x4x64xbf16, #tpu.memory_space<vmem>>, vector<1x1x4x64xbf16>
    tpu.vector_store %arg11[%c0_231, %c3_232, %c0_233, %c0_234], %174 {strides = array<i32>} : memref<1x4x4x64xbf16, #tpu.memory_space<vmem>>, vector<1x1x4x64xbf16>,
    %c0_235 = arith.constant 0 : index
    %c1_236 = arith.constant 1 : index
    %c0_237 = arith.constant 0 : index
    %c0_238 = arith.constant 0 : index
    %178 = vector.load %arg11[%c0_235, %c1_236, %c0_237, %c0_238] : memref<1x4x4x64xbf16, #tpu.memory_space<vmem>>, vector<1x2x1x64xbf16>
    tpu.vector_store %arg11[%c0_235, %c1_236, %c0_237, %c0_238], %175 {strides = array<i32>} : memref<1x4x4x64xbf16, #tpu.memory_space<vmem>>, vector<1x2x1x64xbf16>,
    %c0_239 = arith.constant 0 : index
    %c1_240 = arith.constant 1 : index
    %c3_241 = arith.constant 3 : index
    %c0_242 = arith.constant 0 : index
    %179 = vector.load %arg11[%c0_239, %c1_240, %c3_241, %c0_242] : memref<1x4x4x64xbf16, #tpu.memory_space<vmem>>, vector<1x2x1x64xbf16>
    tpu.vector_store %arg11[%c0_239, %c1_240, %c3_241, %c0_242], %175 {strides = array<i32>} : memref<1x4x4x64xbf16, #tpu.memory_space<vmem>>, vector<1x2x1x64xbf16>,
    %180 = arith.truncf %173 : vector<1x2x2x64xf32> to vector<1x2x2x64xbf16>
    %c0_243 = arith.constant 0 : index
    %c1_244 = arith.constant 1 : index
    %c1_245 = arith.constant 1 : index
    %c0_246 = arith.constant 0 : index
    %181 = vector.load %arg11[%c0_243, %c1_244, %c1_245, %c0_246] : memref<1x4x4x64xbf16, #tpu.memory_space<vmem>>, vector<1x2x2x64xbf16>
    tpu.vector_store %arg11[%c0_243, %c1_244, %c1_245, %c0_246], %180 {strides = array<i32>} : memref<1x4x4x64xbf16, #tpu.memory_space<vmem>>, vector<1x2x2x64xbf16>,
    %c0_247 = arith.constant 0 : index
    %c0_248 = arith.constant 0 : index
    %c0_249 = arith.constant 0 : index
    %c0_250 = arith.constant 0 : index
    %182 = vector.load %arg11[%c0_247, %c0_248, %c0_249, %c0_250] : memref<1x4x4x64xbf16, #tpu.memory_space<vmem>>, vector<1x2x2x64xbf16>
    %183 = vector.shape_cast %182 : vector<1x2x2x64xbf16> to vector<4x64xbf16>
    %c2_251 = arith.constant 2 : index
    %c0_252 = arith.constant 0 : index
    %c0_253 = arith.constant 0 : index
    %c0_254 = arith.constant 0 : index
    %184 = vector.load %arg3[%c2_251, %c0_252, %c0_253, %c0_254] : memref<3x9x64x64xbf16, #tpu.memory_space<vmem>>, vector<1x1x64x64xbf16>
    %185 = vector.shape_cast %184 : vector<1x1x64x64xbf16> to vector<64x64xbf16>
    %cst_255 = arith.constant dense<0.000000e+00> : vector<4x64xf32>
    %186 = tpu.matmul %183, %185, %cst_255 {dimension_numbers = #tpu.dot_dimension_numbers<[1], [0], [0], [1], [0, 0, 1, 1], [], []>} : vector<4x64xbf16>, vector<64x64xbf16>, vector<4x64xf32> -> vector<4x64xf32>
    %c0_256 = arith.constant 0 : index
    %c0_257 = arith.constant 0 : index
    %c1_258 = arith.constant 1 : index
    %c0_259 = arith.constant 0 : index
    %187 = vector.load %arg11[%c0_256, %c0_257, %c1_258, %c0_259] : memref<1x4x4x64xbf16, #tpu.memory_space<vmem>>, vector<1x2x2x64xbf16>
    %188 = vector.shape_cast %187 : vector<1x2x2x64xbf16> to vector<4x64xbf16>
    %c2_260 = arith.constant 2 : index
    %c1_261 = arith.constant 1 : index
    %c0_262 = arith.constant 0 : index
    %c0_263 = arith.constant 0 : index
    %189 = vector.load %arg3[%c2_260, %c1_261, %c0_262, %c0_263] : memref<3x9x64x64xbf16, #tpu.memory_space<vmem>>, vector<1x1x64x64xbf16>
    %190 = vector.shape_cast %189 : vector<1x1x64x64xbf16> to vector<64x64xbf16>
    %cst_264 = arith.constant dense<0.000000e+00> : vector<4x64xf32>
    %191 = tpu.matmul %188, %190, %cst_264 {dimension_numbers = #tpu.dot_dimension_numbers<[1], [0], [0], [1], [0, 0, 1, 1], [], []>} : vector<4x64xbf16>, vector<64x64xbf16>, vector<4x64xf32> -> vector<4x64xf32>
    %192 = arith.addf %186, %191 : vector<4x64xf32>
    %c0_265 = arith.constant 0 : index
    %c0_266 = arith.constant 0 : index
    %c2_267 = arith.constant 2 : index
    %c0_268 = arith.constant 0 : index
    %193 = vector.load %arg11[%c0_265, %c0_266, %c2_267, %c0_268] : memref<1x4x4x64xbf16, #tpu.memory_space<vmem>>, vector<1x2x2x64xbf16>
    %194 = vector.shape_cast %193 : vector<1x2x2x64xbf16> to vector<4x64xbf16>
    %c2_269 = arith.constant 2 : index
    %c2_270 = arith.constant 2 : index
    %c0_271 = arith.constant 0 : index
    %c0_272 = arith.constant 0 : index
    %195 = vector.load %arg3[%c2_269, %c2_270, %c0_271, %c0_272] : memref<3x9x64x64xbf16, #tpu.memory_space<vmem>>, vector<1x1x64x64xbf16>
    %196 = vector.shape_cast %195 : vector<1x1x64x64xbf16> to vector<64x64xbf16>
    %cst_273 = arith.constant dense<0.000000e+00> : vector<4x64xf32>
    %197 = tpu.matmul %194, %196, %cst_273 {dimension_numbers = #tpu.dot_dimension_numbers<[1], [0], [0], [1], [0, 0, 1, 1], [], []>} : vector<4x64xbf16>, vector<64x64xbf16>, vector<4x64xf32> -> vector<4x64xf32>
    %198 = arith.addf %192, %197 : vector<4x64xf32>
    %c0_274 = arith.constant 0 : index
    %c1_275 = arith.constant 1 : index
    %c0_276 = arith.constant 0 : index
    %c0_277 = arith.constant 0 : index
    %199 = vector.load %arg11[%c0_274, %c1_275, %c0_276, %c0_277] : memref<1x4x4x64xbf16, #tpu.memory_space<vmem>>, vector<1x2x2x64xbf16>
    %200 = vector.shape_cast %199 : vector<1x2x2x64xbf16> to vector<4x64xbf16>
    %c2_278 = arith.constant 2 : index
    %c3_279 = arith.constant 3 : index
    %c0_280 = arith.constant 0 : index
    %c0_281 = arith.constant 0 : index
    %201 = vector.load %arg3[%c2_278, %c3_279, %c0_280, %c0_281] : memref<3x9x64x64xbf16, #tpu.memory_space<vmem>>, vector<1x1x64x64xbf16>
    %202 = vector.shape_cast %201 : vector<1x1x64x64xbf16> to vector<64x64xbf16>
    %cst_282 = arith.constant dense<0.000000e+00> : vector<4x64xf32>
    %203 = tpu.matmul %200, %202, %cst_282 {dimension_numbers = #tpu.dot_dimension_numbers<[1], [0], [0], [1], [0, 0, 1, 1], [], []>} : vector<4x64xbf16>, vector<64x64xbf16>, vector<4x64xf32> -> vector<4x64xf32>
    %204 = arith.addf %198, %203 : vector<4x64xf32>
    %c0_283 = arith.constant 0 : index
    %c1_284 = arith.constant 1 : index
    %c1_285 = arith.constant 1 : index
    %c0_286 = arith.constant 0 : index
    %205 = vector.load %arg11[%c0_283, %c1_284, %c1_285, %c0_286] : memref<1x4x4x64xbf16, #tpu.memory_space<vmem>>, vector<1x2x2x64xbf16>
    %206 = vector.shape_cast %205 : vector<1x2x2x64xbf16> to vector<4x64xbf16>
    %c2_287 = arith.constant 2 : index
    %c4_288 = arith.constant 4 : index
    %c0_289 = arith.constant 0 : index
    %c0_290 = arith.constant 0 : index
    %207 = vector.load %arg3[%c2_287, %c4_288, %c0_289, %c0_290] : memref<3x9x64x64xbf16, #tpu.memory_space<vmem>>, vector<1x1x64x64xbf16>
    %208 = vector.shape_cast %207 : vector<1x1x64x64xbf16> to vector<64x64xbf16>
    %cst_291 = arith.constant dense<0.000000e+00> : vector<4x64xf32>
    %209 = tpu.matmul %206, %208, %cst_291 {dimension_numbers = #tpu.dot_dimension_numbers<[1], [0], [0], [1], [0, 0, 1, 1], [], []>} : vector<4x64xbf16>, vector<64x64xbf16>, vector<4x64xf32> -> vector<4x64xf32>
    %210 = arith.addf %204, %209 : vector<4x64xf32>
    %c0_292 = arith.constant 0 : index
    %c1_293 = arith.constant 1 : index
    %c2_294 = arith.constant 2 : index
    %c0_295 = arith.constant 0 : index
    %211 = vector.load %arg11[%c0_292, %c1_293, %c2_294, %c0_295] : memref<1x4x4x64xbf16, #tpu.memory_space<vmem>>, vector<1x2x2x64xbf16>
    %212 = vector.shape_cast %211 : vector<1x2x2x64xbf16> to vector<4x64xbf16>
    %c2_296 = arith.constant 2 : index
    %c5_297 = arith.constant 5 : index
    %c0_298 = arith.constant 0 : index
    %c0_299 = arith.constant 0 : index
    %213 = vector.load %arg3[%c2_296, %c5_297, %c0_298, %c0_299] : memref<3x9x64x64xbf16, #tpu.memory_space<vmem>>, vector<1x1x64x64xbf16>
    %214 = vector.shape_cast %213 : vector<1x1x64x64xbf16> to vector<64x64xbf16>
    %cst_300 = arith.constant dense<0.000000e+00> : vector<4x64xf32>
    %215 = tpu.matmul %212, %214, %cst_300 {dimension_numbers = #tpu.dot_dimension_numbers<[1], [0], [0], [1], [0, 0, 1, 1], [], []>} : vector<4x64xbf16>, vector<64x64xbf16>, vector<4x64xf32> -> vector<4x64xf32>
    %216 = arith.addf %210, %215 : vector<4x64xf32>
    %c0_301 = arith.constant 0 : index
    %c2_302 = arith.constant 2 : index
    %c0_303 = arith.constant 0 : index
    %c0_304 = arith.constant 0 : index
    %217 = vector.load %arg11[%c0_301, %c2_302, %c0_303, %c0_304] : memref<1x4x4x64xbf16, #tpu.memory_space<vmem>>, vector<1x2x2x64xbf16>
    %218 = vector.shape_cast %217 : vector<1x2x2x64xbf16> to vector<4x64xbf16>
    %c2_305 = arith.constant 2 : index
    %c6_306 = arith.constant 6 : index
    %c0_307 = arith.constant 0 : index
    %c0_308 = arith.constant 0 : index
    %219 = vector.load %arg3[%c2_305, %c6_306, %c0_307, %c0_308] : memref<3x9x64x64xbf16, #tpu.memory_space<vmem>>, vector<1x1x64x64xbf16>
    %220 = vector.shape_cast %219 : vector<1x1x64x64xbf16> to vector<64x64xbf16>
    %cst_309 = arith.constant dense<0.000000e+00> : vector<4x64xf32>
    %221 = tpu.matmul %218, %220, %cst_309 {dimension_numbers = #tpu.dot_dimension_numbers<[1], [0], [0], [1], [0, 0, 1, 1], [], []>} : vector<4x64xbf16>, vector<64x64xbf16>, vector<4x64xf32> -> vector<4x64xf32>
    %222 = arith.addf %216, %221 : vector<4x64xf32>
    %c0_310 = arith.constant 0 : index
    %c2_311 = arith.constant 2 : index
    %c1_312 = arith.constant 1 : index
    %c0_313 = arith.constant 0 : index
    %223 = vector.load %arg11[%c0_310, %c2_311, %c1_312, %c0_313] : memref<1x4x4x64xbf16, #tpu.memory_space<vmem>>, vector<1x2x2x64xbf16>
    %224 = vector.shape_cast %223 : vector<1x2x2x64xbf16> to vector<4x64xbf16>
    %c2_314 = arith.constant 2 : index
    %c7_315 = arith.constant 7 : index
    %c0_316 = arith.constant 0 : index
    %c0_317 = arith.constant 0 : index
    %225 = vector.load %arg3[%c2_314, %c7_315, %c0_316, %c0_317] : memref<3x9x64x64xbf16, #tpu.memory_space<vmem>>, vector<1x1x64x64xbf16>
    %226 = vector.shape_cast %225 : vector<1x1x64x64xbf16> to vector<64x64xbf16>
    %cst_318 = arith.constant dense<0.000000e+00> : vector<4x64xf32>
    %227 = tpu.matmul %224, %226, %cst_318 {dimension_numbers = #tpu.dot_dimension_numbers<[1], [0], [0], [1], [0, 0, 1, 1], [], []>} : vector<4x64xbf16>, vector<64x64xbf16>, vector<4x64xf32> -> vector<4x64xf32>
    %228 = arith.addf %222, %227 : vector<4x64xf32>
    %c0_319 = arith.constant 0 : index
    %c2_320 = arith.constant 2 : index
    %c2_321 = arith.constant 2 : index
    %c0_322 = arith.constant 0 : index
    %229 = vector.load %arg11[%c0_319, %c2_320, %c2_321, %c0_322] : memref<1x4x4x64xbf16, #tpu.memory_space<vmem>>, vector<1x2x2x64xbf16>
    %230 = vector.shape_cast %229 : vector<1x2x2x64xbf16> to vector<4x64xbf16>
    %c2_323 = arith.constant 2 : index
    %c8_324 = arith.constant 8 : index
    %c0_325 = arith.constant 0 : index
    %c0_326 = arith.constant 0 : index
    %231 = vector.load %arg3[%c2_323, %c8_324, %c0_325, %c0_326] : memref<3x9x64x64xbf16, #tpu.memory_space<vmem>>, vector<1x1x64x64xbf16>
    %232 = vector.shape_cast %231 : vector<1x1x64x64xbf16> to vector<64x64xbf16>
    %cst_327 = arith.constant dense<0.000000e+00> : vector<4x64xf32>
    %233 = tpu.matmul %230, %232, %cst_327 {dimension_numbers = #tpu.dot_dimension_numbers<[1], [0], [0], [1], [0, 0, 1, 1], [], []>} : vector<4x64xbf16>, vector<64x64xbf16>, vector<4x64xf32> -> vector<4x64xf32>
    %234 = arith.addf %228, %233 : vector<4x64xf32>
    %c3_328 = arith.constant 3 : index
    %c0_329 = arith.constant 0 : index
    %235 = vector.load %arg4[%c3_328, %c0_329] : memref<4x64xf32, #tpu.memory_space<vmem>>, vector<1x64xf32>
    %236 = vector.broadcast %235 : vector<1x64xf32> to vector<4x64xf32>
    %237 = arith.mulf %234, %236 : vector<4x64xf32>
    %c3_330 = arith.constant 3 : index
    %c0_331 = arith.constant 0 : index
    %238 = vector.load %arg5[%c3_330, %c0_331] : memref<4x64xf32, #tpu.memory_space<vmem>>, vector<1x64xf32>
    %239 = vector.broadcast %238 : vector<1x64xf32> to vector<4x64xf32>
    %240 = arith.addf %237, %239 : vector<4x64xf32>
    %cst_332 = arith.constant 0.000000e+00 : f32
    %241 = vector.broadcast %cst_332 : f32 to vector<4x64xf32>
    %242 = arith.cmpf ogt, %240, %241 : vector<4x64xf32>
    %cst_333 = arith.constant 0.00999999977 : f32
    %243 = vector.broadcast %cst_333 : f32 to vector<4x64xf32>
    %244 = arith.mulf %243, %240 : vector<4x64xf32>
    %245 = arith.select %242, %240, %244 : vector<4x64xi1>, vector<4x64xf32>
    %246 = vector.shape_cast %245 : vector<4x64xf32> to vector<1x2x2x64xf32>
    %cst_334 = arith.constant dense<0xFF800000> : vector<1x2x64xf32>
    %247 = vector.multi_reduction <maximumf>, %246, %cst_334 [1] : vector<1x2x2x64xf32> to vector<1x2x64xf32>
    %248 = vector.shape_cast %247 : vector<1x2x64xf32> to vector<1x1x2x64xf32>
    %cst_335 = arith.constant dense<0xFF800000> : vector<1x1x64xf32>
    %249 = vector.multi_reduction <maximumf>, %248, %cst_335 [2] : vector<1x1x2x64xf32> to vector<1x1x64xf32>
    %250 = vector.shape_cast %249 : vector<1x1x64xf32> to vector<1x1x1x64xf32>
    %251 = vector.shape_cast %250 : vector<1x1x1x64xf32> to vector<1x64xf32>
    %252 = arith.truncf %251 : vector<1x64xf32> to vector<1x64xbf16>
    %c0_336 = arith.constant 0 : index
    %c0_337 = arith.constant 0 : index
    %253 = vector.load %arg6[%c0_336, %c0_337] : memref<64x64xbf16, #tpu.memory_space<vmem>>, vector<64x64xbf16>
    %cst_338 = arith.constant dense<0.000000e+00> : vector<1x64xf32>
    %254 = tpu.matmul %252, %253, %cst_338 {dimension_numbers = #tpu.dot_dimension_numbers<[1], [0], [0], [1], [0, 0, 1, 1], [], []>} : vector<1x64xbf16>, vector<64x64xbf16>, vector<1x64xf32> -> vector<1x64xf32>
    %c0_339 = arith.constant 0 : index
    %c0_340 = arith.constant 0 : index
    %255 = vector.load %arg7[%c0_339, %c0_340] : memref<1x64xf32, #tpu.memory_space<vmem>>, vector<1x64xf32>
    %256 = arith.addf %254, %255 : vector<1x64xf32>
    %257 = vector.shape_cast %256 : vector<1x64xf32> to vector<1x1x64xf32>
    %c0_341 = arith.constant 0 : index
    %c0_342 = arith.constant 0 : index
    %c0_343 = arith.constant 0 : index
    %258 = vector.load %arg8[%c0_341, %c0_342, %c0_343] : memref<1x1x64xf32, #tpu.memory_space<vmem>>, vector<1x1x64xf32>
    tpu.vector_store %arg8[%c0_341, %c0_342, %c0_343], %257 {strides = array<i32>} : memref<1x1x64xf32, #tpu.memory_space<vmem>>, vector<1x1x64xf32>,
    return
  }
  func.func @transform_0(%arg0: i32) -> (i32, i32, i32) {
    %c0_i32 = arith.constant 0 : i32
    %c0_i32_0 = arith.constant 0 : i32
    %c0_i32_1 = arith.constant 0 : i32
    return %arg0, %c0_i32, %c0_i32_0 : i32, i32, i32
  }
  func.func @transform_1(%arg0: i32) -> (i32, i32) {
    %c0_i32 = arith.constant 0 : i32
    %c0_i32_0 = arith.constant 0 : i32
    %c0_i32_1 = arith.constant 0 : i32
    return %c0_i32, %c0_i32_0 : i32, i32
  }
  func.func @transform_2(%arg0: i32) -> (i32, i32, i32, i32) {
    %c0_i32 = arith.constant 0 : i32
    %c0_i32_0 = arith.constant 0 : i32
    %c0_i32_1 = arith.constant 0 : i32
    %c0_i32_2 = arith.constant 0 : i32
    %c0_i32_3 = arith.constant 0 : i32
    return %c0_i32, %c0_i32_0, %c0_i32_1, %c0_i32_2 : i32, i32, i32, i32
  }
  func.func @transform_3(%arg0: i32) -> (i32, i32) {
    %c0_i32 = arith.constant 0 : i32
    %c0_i32_0 = arith.constant 0 : i32
    %c0_i32_1 = arith.constant 0 : i32
    return %c0_i32, %c0_i32_0 : i32, i32
  }
  func.func @transform_4(%arg0: i32) -> (i32, i32) {
    %c0_i32 = arith.constant 0 : i32
    %c0_i32_0 = arith.constant 0 : i32
    %c0_i32_1 = arith.constant 0 : i32
    return %c0_i32, %c0_i32_0 : i32, i32
  }
  func.func @transform_5(%arg0: i32) -> (i32, i32) {
    %c0_i32 = arith.constant 0 : i32
    %c0_i32_0 = arith.constant 0 : i32
    %c0_i32_1 = arith.constant 0 : i32
    return %c0_i32, %c0_i32_0 : i32, i32
  }
  func.func @transform_6(%arg0: i32) -> (i32, i32) {
    %c0_i32 = arith.constant 0 : i32
    %c0_i32_0 = arith.constant 0 : i32
    %c0_i32_1 = arith.constant 0 : i32
    return %c0_i32, %c0_i32_0 : i32, i32
  }
  func.func @transform_7(%arg0: i32) -> (i32, i32, i32) {
    %c0_i32 = arith.constant 0 : i32
    %c0_i32_0 = arith.constant 0 : i32
    %c0_i32_1 = arith.constant 0 : i32
    return %arg0, %c0_i32, %c0_i32_0 : i32, i32, i32
  }
}

</mosaic_0001>

<bundles_post_ra>
// kernel: omniglot_encoder.1
= control target key start
LH: loop header
LB: loop body
LE: loop exit
PB: predicated region body
PF: predicated region fallthrough
CT: control target
= control target key end

     0   :  { %12 = vsyncpa [#allocation6], 0  ;;  %s10558_s0 = inlined_call_operand.vmem [shape: bf16[2,256,32], index: 0, kind: input, shape index: {}]   ;;  %s10559_s1 = inlined_call_operand.vmem [shape: bf16[32,64], index: 1, kind: input, shape index: {}]   ;;  %s10560_s2 = inlined_call_operand.vmem [shape: bf16[3,9,64,64], index: 2, kind: input, shape index: {}]   ;;  %s10561_s3 = inlined_call_operand.vmem [shape: f32[4,64], index: 3, kind: input, shape index: {}]   ;;  %s10562_s4 = inlined_call_operand.vmem [shape: f32[4,64], index: 4, kind: input, shape index: {}]   ;;  %s10563_s5 = inlined_call_operand.vmem [shape: bf16[64,64], index: 5, kind: input, shape index: {}]   ;;  %s10564_s6 = inlined_call_operand.vmem [shape: f32[1,64], index: 6, kind: input, shape index: {}]   ;;  %s10565_s7 = inlined_call_operand.hbm [shape: f32[2,1,64], index: 7, kind: output, shape index: {}]  }
   0x1   :  { %14 = vsyncpa [#allocation6 + $0x1], 0  ;;  %s8832_s24 = smov 0   ;;  %s8834_s25 = smov 0  }
   0x2   :  { %s8836_s26 = smov 0   ;;  %s8838_s27 = smov 0  }
   0x3 LB: > { %s8853_s28 = sadd.s32 4294967295, %s8784_s27   ;;  %s7079_s29 = sadd.s32 4294967294, %s8784_s27   ;;  %s8784_s27 = sphi %s8838_s27, %s10602_s27   ;;  %s8780_s26 = sphi %s8836_s26, %s10601_s26   ;;  %s8776_s25 = sphi %s8834_s25, %s10600_s25   ;;  %s8772_s24 = sphi %s8832_s24, %s10599_s24  }
   0x4   : > { %s8857_s30 = sadd.s32 1, %s8784_s27   ;;  %s179_s8 = sadd.s32 1, %s8780_s26 }
   0x5   : > { %s176_s9 = ssub.s32 %s8784_s27, %s8857_s30  ;;  %p189_p0 = scmp.ne.s32.totalorder %s8780_s26, %s8776_s25 }
   0x6   : > { %p177_p1 = scmp.eq.s32.totalorder %s176_s9, 0  ;;  %p190_p2 = scmp.eq.s32.totalorder %s8853_s28, 1 }
   0x7   : > { %p195_p3 = scmp.ne.s32.totalorder %s8776_s25, %s8772_s24  ;;  %p196_p4 = scmp.eq.s32.totalorder %s7079_s29, 1 }
   0x8   : > { %s8868_s10 = scalar_select %p177_p1, %s8780_s26, %s179_s8  }
   0x9   : > { %p8870_p5 = por %p190_p2, %p189_p0  ;;  %p8874_p6 = por %p196_p4, %p195_p3 }
   0xa   : > { %p7082_p7 = scmp.ge.s32.totalorder %s8784_s27, 1  ;;  %p240_p8 = scmp.lt.s32.totalorder %s8784_s27, 3 }
   0xc   : > { %p241_p9 = pnand %p7082_p7, %p240_p8 }
   0xd   : > { %v8564_v0 = vld [vmem:[%s10559_s1] sm:$0xff] (!%p241_p9)   ;;  %p271_p10 = scmp.lt.s32.totalorder (!%p241_p9), %s8853_s28, 1  ;;  %v8565_v1 = vld [vmem:[%s10559_s1 + $0x8] sm:$0xff] (!%p241_p9)   ;;  %vm405_vm0 = vcmask (!%p241_p9), 261120   ;;  %vm10567_vm1 = vcmask (!%p241_p9), 516096   ;;  %v854_v37 = vlaneseq (!%p241_p9)  ;;  %vm785_vm7 = vcmask (!%p241_p9), 523264  }
   0xe   : > { %244 = sbr.rel (%p241_p9) target bundleno = 1902 (0x76e), region = 48  ;;  %7984 = vmatprep.subr.bf16.mxu0 (!%p241_p9), %v8564_v0  ;;  %vm1670_vm2 = vsmask.f32 (!%p241_p9), 7938  ;;  %v1672_v19 = vld [vmem:[#allocation2 + $0xc] sm:$0x1] (!%p241_p9)  ;;  %vm1186_vm11 = vcmask (!%p241_p9), 517120  }
   0xf   : > { %7985 = vmatpush3.bf16.msra.mxu0 (!%p241_p9), %v8564_v0  ;;  %vm8927_vm3 = vmand (!%p241_p9), %vm10567_vm1, %vm1670_vm2  ;;  %vm10566_vm4 = vsmask.f32 (!%p241_p9), 256  ;;  %v1646_v22 = vld [vmem:[#allocation2 + $0x8] sm:$0x1] (!%p241_p9)  ;;  %v1675_v24 = vld [vmem:[#allocation2 + $0x14] sm:$0x1] (!%p241_p9) }
  0x10   : > { %7986 = vmatprep.subr.bf16.mxu0 (!%p241_p9), %v8565_v1  ;;  %v1673_v20 = vsel (!%p241_p9), %vm8927_vm3, 0, %v1672_v19  ;;  %vm8935_vm5 = vmand (!%p241_p9), %vm10567_vm1, %vm10566_vm4  ;;  %v1676_v25 = vsel (!%p241_p9), %vm8927_vm3, 0, %v1675_v24  ;;  %v1649_v26 = vld [vmem:[#allocation2 + $0x10] sm:$0x1] (!%p241_p9)  ;;  %v1678_v28 = vld [vmem:[#allocation2 + $0x1c] sm:$0x1] (!%p241_p9) }
  0x11   : > { %1674 = vst [vmem:[#allocation2 + $0xc] sm:$0x1] (!%p241_p9), %v1673_v20  ;;  %v1647_v23 = vsel (!%p241_p9), %vm8935_vm5, 0, %v1646_v22  ;;  %1677 = vst [vmem:[#allocation2 + $0x14] sm:$0x1] (!%p241_p9), %v1676_v25  ;;  %v1650_v27 = vsel (!%p241_p9), %vm8935_vm5, 0, %v1649_v26 }
  0x12   : > { %1648 = vst [vmem:[#allocation2 + $0x8] sm:$0x1] (!%p241_p9), %v1647_v23  ;;  %1651 = vst [vmem:[#allocation2 + $0x10] sm:$0x1] (!%p241_p9), %v1650_v27  ;;  %v1679_v29 = vsel (!%p241_p9), %vm8927_vm3, 0, %v1678_v28  ;;  %v8966_v48 = vshrl.u32 (!%p241_p9), %v854_v37, 7 }
  0x13   : > { %7987 = vmatpush3.bf16.msra.mxu0 (!%p241_p9), %v8565_v1  ;;  %1680 = vst [vmem:[#allocation2 + $0x1c] sm:$0x1] (!%p241_p9), %v1679_v29  ;;  %v1652_v30 = vld [vmem:[#allocation2 + $0x18] sm:$0x1] (!%p241_p9)  ;;  %v1681_v32 = vld [vmem:[#allocation2 + $0x24] sm:$0x1] (!%p241_p9) }
  0x14   : > { %v1653_v31 = vsel (!%p241_p9), %vm8935_vm5, 0, %v1652_v30  ;;  %v1682_v33 = vsel (!%p241_p9), %vm8927_vm3, 0, %v1681_v32  ;;  %v8954_v34 = vld [vmem:[%s10561_s3] ss:$0 sm:$0xff] (!%p241_p9)  ;;  %v8786_v35 = vmov (!%p241_p9), 1983009808  }
  0x15   : > { %s272_s17 = scalar_select %p271_p10, %s8853_s28, 1  ;;  %1654 = vst [vmem:[#allocation2 + $0x18] sm:$0x1] %v1653_v31  ;;  %1683 = vst [vmem:[#allocation2 + $0x24] sm:$0x1] %v1682_v33  ;;  %v852_v36 = vunpack.c.l.s4 %v8786_v35  ;;  %vm2016_vm13 = vcmask 1042434  }
  0x16   : > { %v1655_v38 = vld [vmem:[#allocation2 + $0x20] sm:$0x1]  ;;  %vm2018_vm14 = vcmask 1043459   ;;  %vm2020_vm15 = vcmask 1044484   ;;  %v8674_v21 = vld [vmem:[%s10560_s2 + $0x270] sm:$0xff]   ;;  %s8791_s14 = smov [#allocation5]  }
  0x17   : > { %s7710_s18 = sshll.u32 %s272_s17, 7  ;;  %v8959_v40 = vld [vmem:[%s10562_s4] ss:$0 sm:$0xff]  ;;  %v1656_v41 = vsel %vm8935_vm5, 0, %v1655_v38  ;;  %v853_v47 = vunpack.c.0.s8 %v852_v36  ;;  %s8726_s15 = sshll.u32 %s8791_s14, 4  ;;  %s8727_s15 = int_to_ptr.vmem [resolvable:$false] %s8726_s15 }
  0x18   : > { %s8891_s21 = scalar_lea.vmem %s10558_s0, %s7710_s18  ;;  %1657 = vst [vmem:[#allocation2 + $0x20] sm:$0x1] %v1656_v41  ;;  %s269_s18 = sand.u32 1, %s8776_s25  }
  0x19   : > { %v8566_v2 = vld [vmem:[%s8891_s21] sm:$0xff]   ;;  %v8567_v3 = vld [vmem:[%s8891_s21 + $0x8] sm:$0xff]   ;;  %v8568_v4 = vld [vmem:[%s8891_s21 + $0x10] sm:$0xff]   ;;  %v8974_v58 = vsub.s32 %v853_v47, %v8966_v48  ;;  %s270_s22 = scalar_lea.vmem [#allocation5], %s269_s18  ;;  %s8728_s16 = scalar_lea.vmem %s8727_s15, 32 }
  0x1a   : > { %7988 = vmatprep.mubr.msk.bf16.mxu0 %vm405_vm0, %v8566_v2  ;;  %v8569_v5 = vld [vmem:[%s8891_s21 + $0x18] sm:$0xff]   ;;  %v8570_v6 = vld [vmem:[%s8891_s21 + $0x20] sm:$0xff]   ;;  %v8571_v7 = vld [vmem:[%s8891_s21 + $0x28] sm:$0xff]   ;;  %s7024_s23 = sshll.u32 %s270_s22, 4  ;;  %s10517_s23 = int_to_ptr.vmem [resolvable:$true] %s7024_s23 }
  0x1b   : > { %7989 = vmatmul.mubr.msk.bf16.vlgmr.msra.gmra.mrb[0].mxu0 %vm405_vm0, %v8567_v3  ;;  %v8572_v8 = vld [vmem:[%s8891_s21 + $0x30] sm:$0xff]   ;;  %v8573_v9 = vld [vmem:[%s8891_s21 + $0x38] sm:$0xff]   ;;  %v8574_v10 = vld [vmem:[%s8891_s21 + $0x40] sm:$0xff]   ;;  %s8722_s13 = scalar_lea.vmem %s10517_s23, 16  ;;  %p8729_p0 = scmp.lt.s32.totalorder %s10517_s23, %s8727_s15 }
  0x1c   : > { %7992 = vmatprep.mubr.msk.bf16.mxu0 %vm405_vm0, %v8568_v4  ;;  %v8575_v11 = vld [vmem:[%s8891_s21 + $0x48] sm:$0xff]   ;;  %v8576_v12 = vld [vmem:[%s8891_s21 + $0x50] sm:$0xff]   ;;  %v8577_v13 = vld [vmem:[%s8891_s21 + $0x58] sm:$0xff]   ;;  %p8723_p11 = scmp.ne.s32.totalorder %s10517_s23, %s8722_s13  ;;  %p8730_p1 = scmp.lt.s32.totalorder %s8728_s16, %s8722_s13 }
  0x1d   : > { %v8578_v14 = vld [vmem:[%s8891_s21 + $0x60] sm:$0xff]   ;;  %v8579_v15 = vld [vmem:[%s8891_s21 + $0x68] sm:$0xff]   ;;  %v8580_v16 = vld [vmem:[%s8891_s21 + $0x70] sm:$0xff]  }
  0x1e   : > { %v8581_v17 = vld [vmem:[%s8891_s21 + $0x78] sm:$0xff]   ;;  %s7707_s21 = sshll.u32 %s8853_s28, 4  ;;  %s7012_s28 = scalar_lea.sflag [#allocation6], %s269_s18 }
  0x1f   : > { %s10515_s9 = scalar_lea.hbm %s10565_s7, %s7707_s21  ;;  %p8724_p12 = pnand %p8723_p11, %p8870_p5 }
  0x20   : > { %p8731_p2 = por %p8730_p1, %p8729_p0 }
  0x21   : > { %p8725_p13 = pneg %p8724_p12 }
  0x23   : > { %7993 = vmatmul.mubr.msk.bf16.gmra.mrb[4].mxu0 %vm405_vm0, %v8569_v5  ;;  %p8732_p3 = pnand %p8731_p2, %p8725_p13 }
  0x24   : > { %7996 = vmatprep.mubr.msk.bf16.mxu0 %vm405_vm0, %v8570_v6 }
  0x2b   : > { %7997 = vmatmul.mubr.msk.bf16.gmra.mrb[8].mxu0 %vm405_vm0, %v8571_v7 }
  0x2c   : > { %8000 = vmatprep.mubr.msk.bf16.mxu0 %vm405_vm0, %v8572_v8 }
  0x33   : > { %8001 = vmatmul.mubr.msk.bf16.gmra.mrb[12].mxu0 %vm405_vm0, %v8573_v9 }
  0x34   : > { %8004 = vmatprep.mubr.msk.bf16.mxu0 %vm405_vm0, %v8574_v10 }
  0x3b   : > { %8005 = vmatmul.mubr.msk.bf16.gmra.mrb[16].mxu0 %vm405_vm0, %v8575_v11 }
  0x3c   : > { %8008 = vmatprep.mubr.msk.bf16.mxu0 %vm405_vm0, %v8576_v12 }
  0x43   : > { %8009 = vmatmul.mubr.msk.bf16.gmra.mrb[20].mxu0 %vm405_vm0, %v8577_v13 }
  0x44   : > { %8012 = vmatprep.mubr.msk.bf16.mxu0 %vm405_vm0, %v8578_v14 }
  0x4b   : > { %8013 = vmatmul.mubr.msk.bf16.gmra.mrb[24].mxu0 %vm405_vm0, %v8579_v15 }
  0x4c   : > { %8016 = vmatprep.mubr.msk.bf16.mxu0 %vm405_vm0, %v8580_v16 }
  0x53   : > { %8017 = vmatmul.mubr.msk.bf16.gmra.mrb[28].mxu0 %vm405_vm0, %v8581_v17 }
  0xee   : > { %v7990_v39 = vpop.f32.mrb[0].mxu0 }
  0xef   : > { %v622_v42 = vmul.f32 %v7990_v39, %v8954_v34  ;;  %v488_v43 = vpop.f32.mrb[1].mxu0 }
  0xf0   : > { %v620_v44 = vmul.f32 %v8954_v34, %v488_v43  ;;  %v7991_v45 = vpop.f32.mrb[2].mxu0 }
  0xf1   : > { %v659_v46 = vadd.f32 %v8959_v40, %v622_v42  ;;  %v623_v49 = vmul.f32 %v7991_v45, %v8954_v34  ;;  %v491_v50 = vpop.f32.mrb[3].mxu0 }
  0xf2   : > { %v657_v51 = vadd.f32 %v8959_v40, %v620_v44  ;;  %v621_v52 = vmul.f32 %v8954_v34, %v491_v50 }
  0xf3   : > { %vm691_vm6 = vcmp.gt.f32.partialorder %v659_v46, 0.0  ;;  %v723_v53 = vmul.f32 0.01, %v659_v46  ;;  %v660_v54 = vadd.f32 %v8959_v40, %v623_v49 }
  0xf4   : > { %vm689_vm8 = vcmp.gt.f32.partialorder %v657_v51, 0.0  ;;  %v721_v55 = vmul.f32 0.01, %v657_v51  ;;  %v658_v56 = vadd.f32 %v8959_v40, %v621_v52 }
  0xf5   : > { %v755_v57 = vsel %vm691_vm6, %v659_v46, %v723_v53  ;;  %vm692_vm9 = vcmp.gt.f32.partialorder %v660_v54, 0.0  ;;  %v724_v59 = vmul.f32 0.01, %v660_v54  ;;  %vm2022_vm6 = vcmask 1045509  }
  0xf6   : > { %v787_v60 = vsel %vm785_vm7, %v755_v57, -inf  ;;  %v753_v61 = vsel %vm689_vm8, %v657_v51, %v721_v55  ;;  %vm690_vm10 = vcmp.gt.f32.partialorder %v658_v56, 0.0  ;;  %v722_v62 = vmul.f32 0.01, %v658_v56  ;;  %v7994_v63 = vpop.f32.mrb[4].mxu0 }
  0xf7   : > { %v786_v0 = vsel %vm785_vm7, %v753_v61, -inf  ;;  %v756_v1 = vsel %vm692_vm9, %v660_v54, %v724_v59  ;;  %v626_v2 = vmul.f32 %v7994_v63, %v8954_v34  ;;  %v504_v3 = vpop.f32.mrb[5].mxu0  ;;  %vm2024_vm8 = vcmask 1046534  }
  0xf8   : > { %v788_v4 = vmax.f32 %v786_v0, %v787_v60  ;;  %v790_v5 = vsel %vm785_vm7, %v756_v1, -inf  ;;  %v754_v6 = vsel %vm690_vm10, %v658_v56, %v722_v62  ;;  %v624_v7 = vmul.f32 %v8954_v34, %v504_v3  ;;  %v7995_v8 = vpop.f32.mrb[6].mxu0 }
  0xf9   : > { %v789_v9 = vsel %vm785_vm7, %v754_v6, -inf  ;;  %v663_v10 = vadd.f32 %v8959_v40, %v626_v2  ;;  %v627_v11 = vmul.f32 %v7995_v8, %v8954_v34  ;;  %v507_v12 = vpop.f32.mrb[7].mxu0  ;;  %vm10568_vm9 = vcmask 519168  }
  0xfa   : > { %v850_v13 = vcombine.high %v788_v4, %v788_v4  ;;  %v857_v14 = vrot.slane %v788_v4, %v8974_v58  ;;  %v791_v15 = vmax.f32 %v789_v9, %v790_v5  ;;  %v8986_v17 = vadd.f32 %v8959_v40, %v624_v7  ;;  %vm9059_vm4 = vmand %vm10568_vm9, %vm1670_vm2 }
  0xfb   : > { %vm695_vm12 = vcmp.gt.f32.partialorder %v663_v10, 0.0  ;;  %v727_v16 = vmul.f32 0.01, %v663_v10  ;;  %v8989_v19 = vadd.f32 %v8959_v40, %v627_v11  ;;  %v8997_v28 = vmul.f32 %v8954_v34, %v507_v12 }
  0xfc   : > { %v864_v20 = vrot.slane %v850_v13, %v8974_v58  ;;  %v865_v22 = vcombine.high %v857_v14, %v857_v14  ;;  %v1187_v23 = vsel %vm1186_vm11, %v857_v14, -inf  ;;  %v867_v24 = vcombine.high %v791_v15, %v791_v15 }
  0xfd   : > { %v1188_v25 = vrot.slane %v1187_v23, 4  ;;  %v874_v26 = vrot.slane %v791_v15, %v8974_v58  ;;  %v8994_v27 = vsel %vm695_vm12, %v663_v10, %v727_v16  ;;  %vm693_vm0 = vcmp.gt.f32.partialorder %v8986_v17, 0.0 }
  0xfe   : > { %v866_v29 = vcombine.high %v864_v20, %v864_v20  ;;  %v1194_v30 = vsel %vm1186_vm11, %v865_v22, -inf  ;;  %v1201_v31 = vsel %vm1186_vm11, %v864_v20, -inf  ;;  %v881_v32 = vrot.slane %v867_v24, %v8974_v58  ;;  %v9002_v33 = vpop.f32.mrb[8].mxu0 }
  0xff   : > { %v1189_v35 = vmax.f32 %v1187_v23, %v1188_v25  ;;  %v1195_v36 = vrot.slane %v1194_v30, 4  ;;  %v1202_v37 = vrot.slane %v1201_v31, 4  ;;  %v882_v38 = vcombine.high %v874_v26, %v874_v26  ;;  %v9004_v39 = vpop.f32.mrb[9].mxu0 }
 0x100   : > { %v1208_v41 = vsel %vm1186_vm11, %v866_v29, -inf  ;;  %v883_v42 = vcombine.high %v881_v32, %v881_v32  ;;  %v1215_v43 = vsel %vm1186_vm11, %v874_v26, -inf  ;;  %v1229_v44 = vsel %vm1186_vm11, %v881_v32, -inf  ;;  %v9009_v45 = vpop.f32.mrb[10].mxu0 }
 0x101   : > { %v1190_v46 = vrot.slane %v1189_v35, 2  ;;  %v1196_v47 = vmax.f32 %v1194_v30, %v1195_v36  ;;  %v1203_v49 = vmax.f32 %v1201_v31, %v1202_v37  ;;  %v1209_v50 = vrot.slane %v1208_v41, 4  ;;  %v9011_v51 = vpop.f32.mrb[11].mxu0 }
 0x102   : > { %v1216_v52 = vrot.slane %v1215_v43, 4  ;;  %v1222_v53 = vsel %vm1186_vm11, %v882_v38, -inf  ;;  %v1230_v54 = vrot.slane %v1229_v44, 4  ;;  %v1236_v55 = vsel %vm1186_vm11, %v883_v42, -inf }
 0x103   : > { %v1191_v56 = vmax.f32 %v1189_v35, %v1190_v46  ;;  %v1197_v57 = vrot.slane %v1196_v47, 2  ;;  %v1204_v59 = vrot.slane %v1203_v49, 2  ;;  %v1210_v60 = vmax.f32 %v1208_v41, %v1209_v50 }
 0x104   : > { %v1217_v61 = vmax.f32 %v1215_v43, %v1216_v52  ;;  %v1223_v62 = vrot.slane %v1222_v53, 4  ;;  %v1231_v63 = vmax.f32 %v1229_v44, %v1230_v54  ;;  %v1237_v0 = vrot.slane %v1236_v55, 4 }
 0x105   : > { %v1192_v1 = vrot.slane %v1191_v56, 1  ;;  %v1198_v2 = vmax.f32 %v1196_v47, %v1197_v57  ;;  %v1205_v3 = vmax.f32 %v1203_v49, %v1204_v59  ;;  %v1211_v4 = vrot.slane %v1210_v60, 2 }
 0x106   : > { %v1218_v5 = vrot.slane %v1217_v61, 2  ;;  %v1224_v6 = vmax.f32 %v1222_v53, %v1223_v62  ;;  %v1232_v7 = vrot.slane %v1231_v63, 2  ;;  %v1238_v8 = vmax.f32 %v1236_v55, %v1237_v0  ;;  %v9016_v9 = vpop.f32.mrb[12].mxu0 }
 0x107   : > { %v1193_v10 = vmax.f32 %v1191_v56, %v1192_v1  ;;  %v1199_v11 = vrot.slane %v1198_v2, 1  ;;  %v1206_v12 = vrot.slane %v1205_v3, 1  ;;  %v1212_v13 = vmax.f32 %v1210_v60, %v1211_v4  ;;  %v9018_v14 = vpop.f32.mrb[13].mxu0 }
 0x108   : > { %v1219_v15 = vmax.f32 %v1217_v61, %v1218_v5  ;;  %v1225_v16 = vrot.slane %v1224_v6, 2  ;;  %v1233_v20 = vmax.f32 %v1231_v63, %v1232_v7  ;;  %v1239_v22 = vrot.slane %v1238_v8, 2  ;;  %v9020_v23 = vpop.f32.mrb[14].mxu0 }
 0x109   : > { %v1200_v24 = vmax.f32 %v1198_v2, %v1199_v11  ;;  %v1207_v25 = vmax.f32 %v1205_v3, %v1206_v12  ;;  %v1213_v26 = vrot.slane %v1212_v13, 1  ;;  %v7711_v29 = vpack.c.bf16 %v1193_v10, %v1193_v10  ;;  %v9022_v30 = vpop.f32.mrb[15].mxu0  ;;  %v2107_v3 = vld [vmem:[#allocation2 + $0xc] sm:$0x1] }
 0x10a   : > { %v1220_v31 = vrot.slane %v1219_v15, 1  ;;  %v1226_v32 = vmax.f32 %v1224_v6, %v1225_v16  ;;  %v1234_v35 = vrot.slane %v1233_v20, 1  ;;  %v1240_v36 = vmax.f32 %v1238_v8, %v1239_v22 }
 0x10b   : > { %vm2026_vm10 = vcmask 1047559   ;;  %v1214_v37 = vmax.f32 %v1212_v13, %v1213_v26  ;;  %v7712_v38 = vpack.c.bf16 %v1200_v24, %v1200_v24  ;;  %v7713_v41 = vpack.c.bf16 %v1207_v25, %v1207_v25 }
 0x10c   : > { %v1952_v42 = vunpack.c.l.b16 %v7711_v29  ;;  %v1221_v43 = vmax.f32 %v1219_v15, %v1220_v31  ;;  %v1227_v44 = vrot.slane %v1226_v32, 1  ;;  %v1235_v46 = vmax.f32 %v1233_v20, %v1234_v35  ;;  %v2104_v31 = vld [vmem:[#allocation2 + $0x8] sm:$0xf] }
 0x10d   : > { %v1241_v47 = vrot.slane %v1240_v36, 1  ;;  %v7714_v49 = vpack.c.bf16 %v1214_v37, %v1214_v37  ;;  %v1953_v50 = vunpack.c.l.b16 %v7712_v38  ;;  %v1954_v52 = vunpack.c.l.b16 %v7713_v41 }
 0x10e   : > { %v793_v53 = vsel %vm785_vm7, %v8994_v27, -inf  ;;  %v1228_v54 = vmax.f32 %v1226_v32, %v1227_v44  ;;  %v7715_v56 = vpack.c.bf16 %v1221_v43, %v1221_v43  ;;  %v7717_v57 = vpack.c.bf16 %v1235_v46, %v1235_v46  ;;  %v9026_v59 = vpop.f32.mrb[16].mxu0 }
 0x10f   : > { %v1242_v55 = vmax.f32 %v1240_v36, %v1241_v47  ;;  %v1955_v60 = vunpack.c.l.b16 %v7714_v49  ;;  %v2017_v61 = vsel %vm2016_vm13, %v1953_v50, %v1952_v42  ;;  %v725_v62 = vmul.f32 0.01, %v8986_v17  ;;  %v9031_v63 = vpop.f32.mrb[17].mxu0 }
 0x110   : > { %vm696_vm12 = vcmp.gt.f32.partialorder %v8989_v19, 0.0  ;;  %v2019_v0 = vsel %vm2018_vm14, %v1954_v52, %v2017_v61  ;;  %v7716_v1 = vpack.c.bf16 %v1228_v54, %v1228_v54  ;;  %v1956_v2 = vunpack.c.l.b16 %v7715_v56  ;;  %v9034_v4 = vpop.f32.mrb[18].mxu0 }
 0x111   : > { %v1958_v27 = vunpack.c.l.b16 %v7717_v57  ;;  %v2021_v5 = vsel %vm2020_vm15, %v1955_v60, %v2019_v0  ;;  %v7775_v6 = vpack.c.bf16 %v1242_v55, %v1242_v55  ;;  %v757_v7 = vsel %vm693_vm0, %v8986_v17, %v725_v62  ;;  %v9041_v10 = vpop.f32.mrb[19].mxu0 }
 0x112   : > { %v728_v8 = vmul.f32 0.01, %v8989_v19  ;;  %v1957_v11 = vunpack.c.l.b16 %v7716_v1  ;;  %v2023_v12 = vsel %vm2022_vm6, %v1956_v2, %v2021_v5  ;;  %v792_v13 = vsel %vm785_vm7, %v757_v7, -inf }
 0x113   : > { %v662_v15 = vadd.f32 %v8959_v40, %v8997_v28  ;;  %v2108_v16 = vsel %vm8935_vm5, %v7775_v6, %v2107_v3  ;;  %v794_v20 = vmax.f32 %v792_v13, %v793_v53  ;;  %v630_v22 = vmul.f32 %v9002_v33, %v8954_v34 }
 0x114   : > { %v760_v17 = vsel %vm696_vm12, %v8989_v19, %v728_v8  ;;  %v2025_v24 = vsel %vm2024_vm8, %v1957_v11, %v2023_v12  ;;  %2109 = vst [vmem:[#allocation2 + $0xc] sm:$0x1] %v2108_v16  ;;  %v628_v37 = vmul.f32 %v8954_v34, %v9004_v39  ;;  %v9069_v38 = vmul.f32 %v9009_v45, %v8954_v34 }
 0x115   : > { %v796_v25 = vsel %vm785_vm7, %v760_v17, -inf  ;;  %vm694_vm0 = vcmp.gt.f32.partialorder %v662_v15, 0.0  ;;  %v726_v26 = vmul.f32 0.01, %v662_v15  ;;  %v2027_v28 = vsel %vm2026_vm10, %v1958_v27, %v2025_v24 }
 0x116   : > { %v884_v19 = vcombine.high %v794_v20, %v794_v20  ;;  %v891_v32 = vrot.slane %v794_v20, %v8974_v58  ;;  %v667_v33 = vadd.f32 %v8959_v40, %v630_v22  ;;  %v2070_v35 = vpack.c.b16 %v2027_v28, %v2027_v28  ;;  %v9071_v41 = vpop.f32.mrb[20].mxu0 }
 0x117   : > { %v758_v36 = vsel %vm694_vm0, %v662_v15, %v726_v26  ;;  %v9076_v47 = vpop.f32.mrb[21].mxu0  ;;  %v9089_v27 = vadd.f32 %v8959_v40, %v628_v37 }
 0x118   : > { %v898_v42 = vrot.slane %v884_v19, %v8974_v58  ;;  %v899_v43 = vcombine.high %v891_v32, %v891_v32  ;;  %v1243_v44 = vsel %vm1186_vm11, %v891_v32, -inf  ;;  %v795_v46 = vsel %vm785_vm7, %v758_v36, -inf  ;;  %v9080_v52 = vpop.f32.mrb[22].mxu0 }
 0x119   : > { %v2105_v49 = vsel %vm9059_vm4, %v2070_v35, %v2104_v31  ;;  %v1244_v50 = vrot.slane %v1243_v44, 4  ;;  %v797_v39 = vmax.f32 %v795_v46, %v796_v25  ;;  %vm699_vm2 = vcmp.gt.f32.partialorder %v667_v33, 0.0  ;;  %v9084_v56 = vpop.f32.mrb[23].mxu0 }
 0x11a   : > { %2106 = vst [vmem:[#allocation2 + $0x8] sm:$0xf] %v2105_v49  ;;  %v900_v45 = vcombine.high %v898_v42, %v898_v42  ;;  %v1250_v53 = vsel %vm1186_vm11, %v899_v43, -inf  ;;  %v1257_v54 = vsel %vm1186_vm11, %v898_v42, -inf  ;;  %v731_v55 = vmul.f32 0.01, %v667_v33 }
 0x11b   : > { %v1245_v57 = vmax.f32 %v1243_v44, %v1244_v50  ;;  %v1251_v60 = vrot.slane %v1250_v53, 4  ;;  %v1258_v61 = vrot.slane %v1257_v54, 4  ;;  %v901_v62 = vcombine.high %v797_v39, %v797_v39 }
 0x11c   : > { %v1264_v0 = vsel %vm1186_vm11, %v900_v45, -inf  ;;  %v908_v1 = vrot.slane %v797_v39, %v8974_v58  ;;  %v763_v2 = vsel %vm699_vm2, %v667_v33, %v731_v55  ;;  %vm697_vm12 = vcmp.gt.f32.partialorder %v9089_v27, 0.0 }
 0x11d   : > { %v1246_v3 = vrot.slane %v1245_v57, 2  ;;  %v1252_v5 = vmax.f32 %v1250_v53, %v1251_v60  ;;  %v1259_v6 = vmax.f32 %v1257_v54, %v1258_v61  ;;  %v1265_v7 = vrot.slane %v1264_v0, 4 }
 0x11e   : > { %v915_v8 = vrot.slane %v901_v62, %v8974_v58  ;;  %v916_v11 = vcombine.high %v908_v1, %v908_v1  ;;  %v1271_v12 = vsel %vm1186_vm11, %v908_v1, -inf  ;;  %v9094_v13 = vsel %vm785_vm7, %v763_v2, -inf  ;;  %v9096_v22 = vpop.f32.mrb[24].mxu0 }
 0x11f   : > { %v1247_v15 = vmax.f32 %v1245_v57, %v1246_v3  ;;  %v1253_v16 = vrot.slane %v1252_v5, 2  ;;  %v1260_v20 = vrot.slane %v1259_v6, 2  ;;  %v1266_v17 = vmax.f32 %v1264_v0, %v1265_v7  ;;  %v9100_v31 = vpop.f32.mrb[25].mxu0 }
 0x120   : > { %v917_v24 = vcombine.high %v915_v8, %v915_v8  ;;  %v1272_v25 = vrot.slane %v1271_v12, 4  ;;  %v1278_v26 = vsel %vm1186_vm11, %v916_v11, -inf  ;;  %v1285_v28 = vsel %vm1186_vm11, %v915_v8, -inf  ;;  %v9102_v36 = vpop.f32.mrb[26].mxu0 }
 0x121   : > { %v1248_v19 = vrot.slane %v1247_v15, 1  ;;  %v1254_v32 = vmax.f32 %v1252_v5, %v1253_v16  ;;  %v1261_v33 = vmax.f32 %v1259_v6, %v1260_v20  ;;  %v1267_v35 = vrot.slane %v1266_v17, 2  ;;  %v9105_v46 = vpop.f32.mrb[27].mxu0 }
 0x122   : > { %v1273_v37 = vmax.f32 %v1271_v12, %v1272_v25  ;;  %v1279_v42 = vrot.slane %v1278_v26, 4  ;;  %v1286_v43 = vrot.slane %v1285_v28, 4  ;;  %v1292_v44 = vsel %vm1186_vm11, %v917_v24, -inf }
 0x123   : > { %v1249_v49 = vmax.f32 %v1247_v15, %v1248_v19  ;;  %v1255_v50 = vrot.slane %v1254_v32, 1  ;;  %v1262_v39 = vrot.slane %v1261_v33, 1  ;;  %v1268_v45 = vmax.f32 %v1266_v17, %v1267_v35  ;;  %v8582_v17 = vld [vmem:[%s10560_s2 + $0x40] sm:$0xff]  }
 0x124   : > { %v1274_v53 = vrot.slane %v1273_v37, 2  ;;  %v1280_v54 = vmax.f32 %v1278_v26, %v1279_v42  ;;  %v1287_v55 = vmax.f32 %v1285_v28, %v1286_v43  ;;  %v1293_v57 = vrot.slane %v1292_v44, 4  ;;  %8052 = vmatprep.subr.bf16.mxu1 %v8582_v17 }
 0x125   : > { %v1256_v60 = vmax.f32 %v1254_v32, %v1255_v50  ;;  %v1263_v61 = vmax.f32 %v1261_v33, %v1262_v39  ;;  %v1269_v62 = vrot.slane %v1268_v45, 1  ;;  %v7719_v0 = vpack.c.bf16 %v1249_v49, %v1249_v49  ;;  %8053 = vmatpush3.bf16.msra.mxu1 %v8582_v17  ;;  %v2110_v17 = vld [vmem:[#allocation2 + $0x10] sm:$0xf] }
 0x126   : > { %v1275_v1 = vmax.f32 %v1273_v37, %v1274_v53  ;;  %v1281_v2 = vrot.slane %v1280_v54, 2  ;;  %v1288_v3 = vrot.slane %v1287_v55, 2  ;;  %v1294_v5 = vmax.f32 %v1292_v44, %v1293_v57 }
 0x127   : > { %v1270_v6 = vmax.f32 %v1268_v45, %v1269_v62  ;;  %v7720_v7 = vpack.c.bf16 %v1256_v60, %v1256_v60  ;;  %v7721_v8 = vpack.c.bf16 %v1263_v61, %v1263_v61  ;;  %v1960_v11 = vunpack.c.l.b16 %v7719_v0  ;;  %v2113_v62 = vld [vmem:[#allocation2 + $0x14] sm:$0x1] }
 0x128   : > { %v1276_v12 = vrot.slane %v1275_v1, 1  ;;  %v1282_v15 = vmax.f32 %v1280_v54, %v1281_v2  ;;  %v1289_v16 = vmax.f32 %v1287_v55, %v1288_v3  ;;  %v1295_v20 = vrot.slane %v1294_v5, 2 }
 0x129   : > { %v7722_v24 = vpack.c.bf16 %v1270_v6, %v1270_v6  ;;  %v1961_v25 = vunpack.c.l.b16 %v7720_v7  ;;  %v1962_v26 = vunpack.c.l.b16 %v7721_v8  ;;  %v729_v42 = vmul.f32 0.01, %v9089_v27 }
 0x12a   : > { %v1277_v28 = vmax.f32 %v1275_v1, %v1276_v12  ;;  %v1283_v19 = vrot.slane %v1282_v15, 1  ;;  %v1290_v32 = vrot.slane %v1289_v16, 1  ;;  %v1296_v33 = vmax.f32 %v1294_v5, %v1295_v20 }
 0x12b   : > { %v1963_v35 = vunpack.c.l.b16 %v7722_v24  ;;  %v2028_v37 = vsel %vm2016_vm13, %v1961_v25, %v1960_v11  ;;  %v668_v43 = vadd.f32 %v8959_v40, %v9069_v38  ;;  %v761_v54 = vsel %vm697_vm12, %v9089_v27, %v729_v42 }
 0x12c   : > { %v2029_v44 = vsel %vm2018_vm14, %v1962_v26, %v2028_v37  ;;  %v1284_v49 = vmax.f32 %v1282_v15, %v1283_v19  ;;  %v1291_v50 = vmax.f32 %v1289_v16, %v1290_v32  ;;  %v1297_v39 = vrot.slane %v1296_v33, 1 }
 0x12d   : > { %v7723_v45 = vpack.c.bf16 %v1277_v28, %v1277_v28  ;;  %v2030_v53 = vsel %vm2020_vm15, %v1963_v35, %v2029_v44  ;;  %vm700_vm0 = vcmp.gt.f32.partialorder %v668_v43, 0.0  ;;  %v798_v61 = vsel %vm785_vm7, %v761_v54, -inf }
 0x12e   : > { %v1298_v55 = vmax.f32 %v1296_v33, %v1297_v39  ;;  %v7724_v57 = vpack.c.bf16 %v1284_v49, %v1284_v49  ;;  %v7725_v60 = vpack.c.bf16 %v1291_v50, %v1291_v50  ;;  %v800_v0 = vmax.f32 %v798_v61, %v9094_v13 }
 0x12f   : > { %v1964_v38 = vunpack.c.l.b16 %v7723_v45  ;;  %v732_v1 = vmul.f32 0.01, %v668_v43  ;;  %v629_v2 = vmul.f32 %v8954_v34, %v9011_v51  ;;  %v634_v27 = vmul.f32 %v9016_v9, %v8954_v34 }
 0x130   : > { %v1965_v3 = vunpack.c.l.b16 %v7724_v57  ;;  %v1966_v5 = vunpack.c.l.b16 %v7725_v60  ;;  %v7776_v6 = vpack.c.bf16 %v1298_v55, %v1298_v55  ;;  %v918_v8 = vcombine.high %v800_v0, %v800_v0 }
 0x131   : > { %v2031_v7 = vsel %vm2022_vm6, %v1964_v38, %v2030_v53  ;;  %v925_v11 = vrot.slane %v800_v0, %v8974_v58  ;;  %v764_v12 = vsel %vm700_vm0, %v668_v43, %v732_v1  ;;  %v666_v16 = vadd.f32 %v8959_v40, %v629_v2 }
 0x132   : > { %v2032_v15 = vsel %vm2024_vm8, %v1965_v3, %v2031_v7  ;;  %v2114_v13 = vsel %vm8935_vm5, %v7776_v6, %v2113_v62  ;;  %v802_v51 = vsel %vm785_vm7, %v764_v12, -inf  ;;  %v932_v9 = vrot.slane %v918_v8, %v8974_v58 }
 0x133   : > { %v2033_v20 = vsel %vm2026_vm10, %v1966_v5, %v2032_v15  ;;  %2115 = vst [vmem:[#allocation2 + $0x14] sm:$0x1] %v2114_v13  ;;  %v933_v24 = vcombine.high %v925_v11, %v925_v11  ;;  %v1299_v25 = vsel %vm1186_vm11, %v925_v11, -inf  ;;  %vm698_vm2 = vcmp.gt.f32.partialorder %v666_v16, 0.0 }
 0x134   : > { %v2072_v26 = vpack.c.b16 %v2033_v20, %v2033_v20  ;;  %v1300_v28 = vrot.slane %v1299_v25, 4  ;;  %v730_v19 = vmul.f32 0.01, %v666_v16  ;;  %v934_v32 = vcombine.high %v932_v9, %v932_v9 }
 0x135   : > { %v1306_v33 = vsel %vm1186_vm11, %v933_v24, -inf  ;;  %v1313_v35 = vsel %vm1186_vm11, %v932_v9, -inf  ;;  %v671_v37 = vadd.f32 %v8959_v40, %v634_v27  ;;  %v632_v38 = vmul.f32 %v8954_v34, %v9018_v14 }
 0x136   : > { %v2111_v42 = vsel %vm9059_vm4, %v2072_v26, %v2110_v17  ;;  %v1301_v43 = vmax.f32 %v1299_v25, %v1300_v28  ;;  %v1307_v44 = vrot.slane %v1306_v33, 4  ;;  %v1314_v49 = vrot.slane %v1313_v35, 4 }
 0x137   : > { %2112 = vst [vmem:[#allocation2 + $0x10] sm:$0xf] %v2111_v42  ;;  %v1320_v50 = vsel %vm1186_vm11, %v934_v32, -inf  ;;  %v762_v39 = vsel %vm698_vm2, %v666_v16, %v730_v19  ;;  %vm703_vm12 = vcmp.gt.f32.partialorder %v671_v37, 0.0  ;;  %v735_v45 = vmul.f32 0.01, %v671_v37 }
 0x138   : > { %v1302_v53 = vrot.slane %v1301_v43, 2  ;;  %v1308_v54 = vmax.f32 %v1306_v33, %v1307_v44  ;;  %v1315_v55 = vmax.f32 %v1313_v35, %v1314_v49  ;;  %v1321_v57 = vrot.slane %v1320_v50, 4 }
 0x139   : > { %v801_v60 = vsel %vm785_vm7, %v762_v39, -inf  ;;  %v767_v61 = vsel %vm703_vm12, %v671_v37, %v735_v45  ;;  %v635_v62 = vmul.f32 %v9020_v23, %v8954_v34  ;;  %v669_v27 = vadd.f32 %v8959_v40, %v632_v38 }
 0x13a   : > { %v1303_v0 = vmax.f32 %v1301_v43, %v1302_v53  ;;  %v1309_v1 = vrot.slane %v1308_v54, 2  ;;  %v1316_v2 = vrot.slane %v1315_v55, 2  ;;  %v1322_v3 = vmax.f32 %v1320_v50, %v1321_v57 }
 0x13b   : > { %v803_v5 = vmax.f32 %v801_v60, %v802_v51  ;;  %v805_v6 = vsel %vm785_vm7, %v767_v61, -inf  ;;  %v9151_v7 = vadd.f32 %v8959_v40, %v635_v62  ;;  %vm701_vm0 = vcmp.gt.f32.partialorder %v669_v27, 0.0 }
 0x13c   : > { %v1304_v8 = vrot.slane %v1303_v0, 1  ;;  %v1310_v11 = vmax.f32 %v1308_v54, %v1309_v1  ;;  %v1317_v12 = vmax.f32 %v1315_v55, %v1316_v2  ;;  %v1323_v15 = vrot.slane %v1322_v3, 2 }
 0x13d   : > { %v935_v14 = vcombine.high %v803_v5, %v803_v5  ;;  %v942_v13 = vrot.slane %v803_v5, %v8974_v58  ;;  %v733_v23 = vmul.f32 0.01, %v669_v27  ;;  %vm704_vm2 = vcmp.gt.f32.partialorder %v9151_v7, 0.0 }
 0x13e   : > { %v1305_v16 = vmax.f32 %v1303_v0, %v1304_v8  ;;  %v1311_v20 = vrot.slane %v1310_v11, 1  ;;  %v1318_v17 = vrot.slane %v1317_v12, 1  ;;  %v1324_v51 = vmax.f32 %v1322_v3, %v1323_v15 }
 0x13f   : > { %v949_v9 = vrot.slane %v935_v14, %v8974_v58  ;;  %v950_v24 = vcombine.high %v942_v13, %v942_v13  ;;  %v1327_v25 = vsel %vm1186_vm11, %v942_v13, -inf  ;;  %v765_v26 = vsel %vm701_vm0, %v669_v27, %v733_v23 }
 0x140   : > { %v1312_v28 = vmax.f32 %v1310_v11, %v1311_v20  ;;  %v1319_v19 = vmax.f32 %v1317_v12, %v1318_v17  ;;  %v1325_v32 = vrot.slane %v1324_v51, 1  ;;  %v7727_v33 = vpack.c.bf16 %v1305_v16, %v1305_v16 }
 0x141   : > { %v951_v35 = vcombine.high %v949_v9, %v949_v9  ;;  %v1328_v37 = vrot.slane %v1327_v25, 4  ;;  %v1334_v42 = vsel %vm1186_vm11, %v950_v24, -inf  ;;  %v1341_v43 = vsel %vm1186_vm11, %v949_v9, -inf }
 0x142   : > { %v1326_v44 = vmax.f32 %v1324_v51, %v1325_v32  ;;  %v7728_v49 = vpack.c.bf16 %v1312_v28, %v1312_v28  ;;  %v7729_v50 = vpack.c.bf16 %v1319_v19, %v1319_v19  ;;  %v1968_v39 = vunpack.c.l.b16 %v7727_v33  ;;  %v9167_v28 = vpop.f32.mrb[28].mxu0 }
 0x143   : > { %v1329_v45 = vmax.f32 %v1327_v25, %v1328_v37  ;;  %v1335_v53 = vrot.slane %v1334_v42, 4  ;;  %v1342_v54 = vrot.slane %v1341_v43, 4  ;;  %v1348_v55 = vsel %vm1186_vm11, %v951_v35, -inf  ;;  %v9169_v37 = vpop.f32.mrb[29].mxu0 }
 0x144   : > { %v7730_v57 = vpack.c.bf16 %v1326_v44, %v1326_v44  ;;  %v1969_v60 = vunpack.c.l.b16 %v7728_v49  ;;  %v1970_v61 = vunpack.c.l.b16 %v7729_v50  ;;  %v1349_v38 = vrot.slane %v1348_v55, 4 }
 0x145   : > { %v1330_v62 = vrot.slane %v1329_v45, 2  ;;  %v1336_v0 = vmax.f32 %v1334_v42, %v1335_v53  ;;  %v1343_v1 = vmax.f32 %v1341_v43, %v1342_v54  ;;  %v804_v2 = vsel %vm785_vm7, %v765_v26, -inf  ;;  %v8583_v42 = vld [vmem:[%s10560_s2 + $0x48] sm:$0xff]  }
 0x146   : > { %v1971_v3 = vunpack.c.l.b16 %v7730_v57  ;;  %v2034_v5 = vsel %vm2016_vm13, %v1969_v60, %v1968_v39  ;;  %v1350_v27 = vmax.f32 %v1348_v55, %v1349_v38  ;;  %v806_v8 = vmax.f32 %v804_v2, %v805_v6  ;;  %v9176_v55 = vpop.f32.mrb[30].mxu0  ;;  %8054 = vmatprep.subr.bf16.mxu1 %v8583_v42  ;;  %v8584_v57 = vld [vmem:[%s10560_s2 + $0x20] sm:$0xff]  }
 0x147   : > { %v2035_v11 = vsel %vm2018_vm14, %v1970_v61, %v2034_v5  ;;  %v1331_v12 = vmax.f32 %v1329_v45, %v1330_v62  ;;  %v1337_v15 = vrot.slane %v1336_v0, 2  ;;  %v1344_v14 = vrot.slane %v1343_v1, 2  ;;  %8055 = vmatpush3.bf16.msra.mxu1 %v8583_v42  ;;  %v2119_v5 = vld [vmem:[#allocation2 + $0x1c] sm:$0x1]  ;;  %8020 = vmatprep.subr.bf16.mxu0 %v8584_v57 }
 0x148   : > { %v1351_v13 = vrot.slane %v1350_v27, 2  ;;  %v952_v23 = vcombine.high %v806_v8, %v806_v8  ;;  %v959_v16 = vrot.slane %v806_v8, %v8974_v58  ;;  %v2036_v9 = vsel %vm2020_vm15, %v1971_v3, %v2035_v11  ;;  %8021 = vmatpush3.bf16.msra.mxu0 %v8584_v57 }
 0x149   : > { %v1332_v20 = vrot.slane %v1331_v12, 1  ;;  %v1338_v17 = vmax.f32 %v1336_v0, %v1337_v15  ;;  %v1345_v51 = vmax.f32 %v1343_v1, %v1344_v14  ;;  %v9182_v0 = vpop.f32.mrb[31].mxu0 }
 0x14a   : > { %v1352_v24 = vmax.f32 %v1350_v27, %v1351_v13  ;;  %v966_v25 = vrot.slane %v952_v23, %v8974_v58  ;;  %v967_v26 = vcombine.high %v959_v16, %v959_v16  ;;  %v1355_v6 = vsel %vm1186_vm11, %v959_v16, -inf }
 0x14b   : > { %v1333_v19 = vmax.f32 %v1331_v12, %v1332_v20  ;;  %v1339_v32 = vrot.slane %v1338_v17, 1  ;;  %v1346_v33 = vrot.slane %v1345_v51, 1  ;;  %v1356_v35 = vrot.slane %v1355_v6, 4 }
 0x14c   : > { %v1353_v43 = vrot.slane %v1352_v24, 1  ;;  %v968_v44 = vcombine.high %v966_v25, %v966_v25  ;;  %v1362_v49 = vsel %vm1186_vm11, %v967_v26, -inf  ;;  %v1369_v50 = vsel %vm1186_vm11, %v966_v25, -inf }
 0x14d   : > { %v1340_v39 = vmax.f32 %v1338_v17, %v1339_v32  ;;  %v1347_v45 = vmax.f32 %v1345_v51, %v1346_v33  ;;  %v7731_v53 = vpack.c.bf16 %v1333_v19, %v1333_v19  ;;  %v1357_v54 = vmax.f32 %v1355_v6, %v1356_v35  ;;  %v2116_v33 = vld [vmem:[#allocation2 + $0x18] sm:$0xf] }
 0x14e   : > { %v1354_v60 = vmax.f32 %v1352_v24, %v1353_v43  ;;  %v1363_v61 = vrot.slane %v1362_v49, 4  ;;  %v1370_v38 = vrot.slane %v1369_v50, 4  ;;  %v1376_v62 = vsel %vm1186_vm11, %v968_v44, -inf }
 0x14f   : > { %v7732_v1 = vpack.c.bf16 %v1340_v39, %v1340_v39  ;;  %v7733_v2 = vpack.c.bf16 %v1347_v45, %v1347_v45  ;;  %v1972_v3 = vunpack.c.l.b16 %v7731_v53  ;;  %v1358_v27 = vrot.slane %v1357_v54, 2 }
 0x150   : > { %v7777_v8 = vpack.c.bf16 %v1354_v60, %v1354_v60  ;;  %v1364_v11 = vmax.f32 %v1362_v49, %v1363_v61  ;;  %v1371_v12 = vmax.f32 %v1369_v50, %v1370_v38  ;;  %v1377_v15 = vrot.slane %v1376_v62, 4 }
 0x151   : > { %v1973_v14 = vunpack.c.l.b16 %v7732_v1  ;;  %v1974_v13 = vunpack.c.l.b16 %v7733_v2  ;;  %v2037_v23 = vsel %vm2022_vm6, %v1972_v3, %v2036_v9  ;;  %v1359_v16 = vmax.f32 %v1357_v54, %v1358_v27 }
 0x152   : > { %v2120_v20 = vsel %vm8935_vm5, %v7777_v8, %v2119_v5  ;;  %v1365_v17 = vrot.slane %v1364_v11, 2  ;;  %v1372_v51 = vrot.slane %v1371_v12, 2  ;;  %v1378_v24 = vmax.f32 %v1376_v62, %v1377_v15 }
 0x153   : > { %v2038_v25 = vsel %vm2024_vm8, %v1973_v14, %v2037_v23  ;;  %2121 = vst [vmem:[#allocation2 + $0x1c] sm:$0x1] %v2120_v20  ;;  %v1360_v26 = vrot.slane %v1359_v16, 1  ;;  %v736_v6 = vmul.f32 0.01, %v9151_v7  ;;  %v633_v19 = vmul.f32 %v8954_v34, %v9022_v30 }
 0x154   : > { %v2039_v32 = vsel %vm2026_vm10, %v1974_v13, %v2038_v25  ;;  %v1366_v9 = vmax.f32 %v1364_v11, %v1365_v17  ;;  %v1373_v35 = vmax.f32 %v1371_v12, %v1372_v51  ;;  %v1379_v42 = vrot.slane %v1378_v24, 2 }
 0x155   : > { %v2074_v43 = vpack.c.b16 %v2039_v32, %v2039_v32  ;;  %v1361_v44 = vmax.f32 %v1359_v16, %v1360_v26  ;;  %v768_v49 = vsel %vm704_vm2, %v9151_v7, %v736_v6  ;;  %v670_v50 = vadd.f32 %v8959_v40, %v633_v19 }
 0x156   : > { %v1367_v39 = vrot.slane %v1366_v9, 1  ;;  %v1374_v45 = vrot.slane %v1373_v35, 1  ;;  %v1380_v53 = vmax.f32 %v1378_v24, %v1379_v42  ;;  %v808_v54 = vsel %vm785_vm7, %v768_v49, -inf }
 0x157   : > { %v2117_v30 = vsel %vm9059_vm4, %v2074_v43, %v2116_v33  ;;  %v7735_v57 = vpack.c.bf16 %v1361_v44, %v1361_v44  ;;  %vm702_vm12 = vcmp.gt.f32.partialorder %v670_v50, 0.0  ;;  %v734_v60 = vmul.f32 0.01, %v670_v50 }
 0x158   : > { %2118 = vst [vmem:[#allocation2 + $0x18] sm:$0xf] %v2117_v30  ;;  %v1368_v61 = vmax.f32 %v1366_v9, %v1367_v39  ;;  %v1375_v38 = vmax.f32 %v1373_v35, %v1374_v45  ;;  %v1381_v62 = vrot.slane %v1380_v53, 1  ;;  %v638_v7 = vmul.f32 %v9026_v59, %v8954_v34 }
 0x159   : > { %v1976_v1 = vunpack.c.l.b16 %v7735_v57  ;;  %v766_v2 = vsel %vm702_vm12, %v670_v50, %v734_v60  ;;  %v636_v3 = vmul.f32 %v8954_v34, %v9031_v63  ;;  %v639_v5 = vmul.f32 %v9034_v4, %v8954_v34 }
 0x15a   : > { %v1382_v27 = vmax.f32 %v1380_v53, %v1381_v62  ;;  %v7736_v8 = vpack.c.bf16 %v1368_v61, %v1368_v61  ;;  %v7737_v11 = vpack.c.bf16 %v1375_v38, %v1375_v38  ;;  %v807_v12 = vsel %vm785_vm7, %v766_v2, -inf  ;;  %v9228_v2 = vld [vmem:[%s10562_s4] ss:$0 sm:$0xff] }
 0x15b   : > { %v809_v15 = vmax.f32 %v807_v12, %v808_v54  ;;  %v675_v14 = vadd.f32 %v8959_v40, %v638_v7  ;;  %v673_v13 = vadd.f32 %v8959_v40, %v636_v3  ;;  %v676_v59 = vadd.f32 %v8959_v40, %v639_v5 }
 0x15c   : > { %v7738_v23 = vpack.c.bf16 %v1382_v27, %v1382_v27  ;;  %v1977_v16 = vunpack.c.l.b16 %v7736_v8  ;;  %v1978_v20 = vunpack.c.l.b16 %v7737_v11  ;;  %v637_v63 = vmul.f32 %v8954_v34, %v9041_v10 }
 0x15d   : > { %v969_v17 = vcombine.high %v809_v15, %v809_v15  ;;  %v976_v4 = vrot.slane %v809_v15, %v8974_v58  ;;  %vm707_vm0 = vcmp.gt.f32.partialorder %v675_v14, 0.0  ;;  %v739_v51 = vmul.f32 0.01, %v675_v14 }
 0x15e   : > { %v1979_v24 = vunpack.c.l.b16 %v7738_v23  ;;  %v2040_v25 = vsel %vm2016_vm13, %v1977_v16, %v1976_v1  ;;  %vm705_vm2 = vcmp.gt.f32.partialorder %v673_v13, 0.0  ;;  %v737_v26 = vmul.f32 0.01, %v673_v13 }
 0x15f   : > { %v2041_v6 = vsel %vm2018_vm14, %v1978_v20, %v2040_v25  ;;  %v983_v40 = vrot.slane %v969_v17, %v8974_v58  ;;  %v984_v19 = vcombine.high %v976_v4, %v976_v4  ;;  %v1383_v32 = vsel %vm1186_vm11, %v976_v4, -inf }
 0x160   : > { %v1384_v33 = vrot.slane %v1383_v32, 4  ;;  %v9217_v34 = vsel %vm2020_vm15, %v1979_v24, %v2041_v6  ;;  %v771_v10 = vsel %vm707_vm0, %v675_v14, %v739_v51  ;;  %v769_v9 = vsel %vm705_vm2, %v673_v13, %v737_v26  ;;  %v8585_v24 = vld [vmem:[%s10560_s2 + $0x50] sm:$0xff]  }
 0x161   : > { %v985_v35 = vcombine.high %v983_v40, %v983_v40  ;;  %v1390_v42 = vsel %vm1186_vm11, %v984_v19, -inf  ;;  %v1397_v43 = vsel %vm1186_vm11, %v983_v40, -inf  ;;  %v811_v44 = vsel %vm785_vm7, %v771_v10, -inf  ;;  %v8586_v19 = vld [vmem:[%s10560_s2 + $0x28] sm:$0xff]   ;;  %8056 = vmatprep.subr.bf16.mxu1 %v8585_v24 }
 0x162   : > { %v1385_v49 = vmax.f32 %v1383_v32, %v1384_v33  ;;  %v1391_v50 = vrot.slane %v1390_v42, 4  ;;  %v1398_v39 = vrot.slane %v1397_v43, 4  ;;  %v810_v45 = vsel %vm785_vm7, %v769_v9, -inf  ;;  %v8587_v32 = vld [vmem:[%s10560_s2 + $0x58] sm:$0xff]   ;;  %v8588_v33 = vld [vmem:[%s10560_s2 + $0x30] sm:$0xff]   ;;  %8057 = vmatpush3.bf16.msra.mxu1 %v8585_v24  ;;  %8022 = vmatprep.subr.bf16.mxu0 %v8586_v19 }
 0x163   : > { %v1404_v53 = vsel %vm1186_vm11, %v985_v35, -inf  ;;  %v812_v54 = vmax.f32 %v810_v45, %v811_v44  ;;  %vm708_vm12 = vcmp.gt.f32.partialorder %v676_v59, 0.0  ;;  %v740_v30 = vmul.f32 0.01, %v676_v59  ;;  %8023 = vmatpush3.bf16.msra.mxu0 %v8586_v19  ;;  %8058 = vmatprep.subr.bf16.mxu1 %v8587_v32 }
 0x164   : > { %v1386_v57 = vrot.slane %v1385_v49, 2  ;;  %v1392_v60 = vmax.f32 %v1390_v42, %v1391_v50  ;;  %v1399_v61 = vmax.f32 %v1397_v43, %v1398_v39  ;;  %v1405_v38 = vrot.slane %v1404_v53, 4  ;;  %8024 = vmatprep.subr.bf16.mxu0 %v8588_v33 }
 0x165   : > { %v986_v62 = vcombine.high %v812_v54, %v812_v54  ;;  %v993_v7 = vrot.slane %v812_v54, %v8974_v58  ;;  %v772_v1 = vsel %vm708_vm12, %v676_v59, %v740_v30  ;;  %v9231_v3 = vadd.f32 %v9228_v2, %v637_v63 }
 0x166   : > { %v1387_v5 = vmax.f32 %v1385_v49, %v1386_v57  ;;  %v1393_v27 = vrot.slane %v1392_v60, 2  ;;  %v1400_v8 = vrot.slane %v1399_v61, 2  ;;  %v1406_v11 = vmax.f32 %v1404_v53, %v1405_v38  ;;  %v8589_v38 = vld [vmem:[%s10560_s2 + $0x38] sm:$0xff]   ;;  %8059 = vmatpush3.bf16.msra.mxu1 %v8587_v32 }
 0x167   : > { %v1000_v12 = vrot.slane %v986_v62, %v8974_v58  ;;  %v1001_v15 = vcombine.high %v993_v7, %v993_v7  ;;  %v1411_v14 = vsel %vm1186_vm11, %v993_v7, -inf  ;;  %v9236_v13 = vsel %vm785_vm7, %v772_v1, -inf  ;;  %v2125_v62 = vld [vmem:[#allocation2 + $0x24] sm:$0x1]  ;;  %8025 = vmatpush3.bf16.msra.mxu0 %v8588_v33 }
 0x168   : > { %v1388_v59 = vrot.slane %v1387_v5, 1  ;;  %v1394_v23 = vmax.f32 %v1392_v60, %v1393_v27  ;;  %v1401_v16 = vmax.f32 %v1399_v61, %v1400_v8  ;;  %v1407_v20 = vrot.slane %v1406_v11, 2  ;;  %8026 = vmatprep.subr.bf16.mxu0 %v8589_v38 }
 0x169   : > { %v1002_v17 = vcombine.high %v1000_v12, %v1000_v12  ;;  %v1412_v4 = vrot.slane %v1411_v14, 4  ;;  %v1418_v63 = vsel %vm1186_vm11, %v1001_v15, -inf  ;;  %v1425_v51 = vsel %vm1186_vm11, %v1000_v12, -inf }
 0x16a   : > { %v1389_v25 = vmax.f32 %v1387_v5, %v1388_v59  ;;  %v1395_v26 = vrot.slane %v1394_v23, 1  ;;  %v1402_v6 = vrot.slane %v1401_v16, 1  ;;  %v1408_v40 = vmax.f32 %v1406_v11, %v1407_v20  ;;  %v1658_v20 = vld [vmem:[#allocation2 + $0x28] sm:$0x1] }
 0x16b   : > { %v1413_v10 = vmax.f32 %v1411_v14, %v1412_v4  ;;  %v1419_v9 = vrot.slane %v1418_v63, 4  ;;  %v1426_v35 = vrot.slane %v1425_v51, 4  ;;  %v1432_v42 = vsel %vm1186_vm11, %v1002_v17, -inf  ;;  %8027 = vmatpush3.bf16.msra.mxu0 %v8589_v38 }
 0x16c   : > { %v1396_v43 = vmax.f32 %v1394_v23, %v1395_v26  ;;  %v1403_v44 = vmax.f32 %v1401_v16, %v1402_v6  ;;  %v1409_v49 = vrot.slane %v1408_v40, 1  ;;  %v7739_v50 = vpack.c.bf16 %v1389_v25, %v1389_v25  ;;  %v1684_v6 = vld [vmem:[#allocation2 + $0x2c] sm:$0x1] }
 0x16d   : > { %v1414_v39 = vrot.slane %v1413_v10, 2  ;;  %v1420_v45 = vmax.f32 %v1418_v63, %v1419_v9  ;;  %v1427_v53 = vmax.f32 %v1425_v51, %v1426_v35  ;;  %v1433_v54 = vrot.slane %v1432_v42, 4  ;;  %v2122_v51 = vld [vmem:[#allocation2 + $0x20] sm:$0xf] }
 0x16e   : > { %v1410_v30 = vmax.f32 %v1408_v40, %v1409_v49  ;;  %v7740_v57 = vpack.c.bf16 %v1396_v43, %v1396_v43  ;;  %v7741_v60 = vpack.c.bf16 %v1403_v44, %v1403_v44  ;;  %v1980_v61 = vunpack.c.l.b16 %v7739_v50 }
 0x16f   : > { %v1415_v7 = vmax.f32 %v1413_v10, %v1414_v39  ;;  %v1421_v1 = vrot.slane %v1420_v45, 2  ;;  %v1428_v5 = vrot.slane %v1427_v53, 2  ;;  %v1434_v27 = vmax.f32 %v1432_v42, %v1433_v54 }
 0x170   : > { %v1981_v8 = vunpack.c.l.b16 %v7740_v57  ;;  %v1982_v11 = vunpack.c.l.b16 %v7741_v60  ;;  %v2043_v12 = vsel %vm2022_vm6, %v1980_v61, %v9217_v34  ;;  %v7778_v15 = vpack.c.bf16 %v1410_v30, %v1410_v30 }
 0x171   : > { %v1416_v14 = vrot.slane %v1415_v7, 1  ;;  %v1422_v59 = vmax.f32 %v1420_v45, %v1421_v1  ;;  %v1429_v23 = vmax.f32 %v1427_v53, %v1428_v5  ;;  %v1435_v16 = vrot.slane %v1434_v27, 2  ;;  %v9276_v53 = vld [vmem:[%s10561_s3] ss:$0 sm:$0xff] }
 0x172   : > { %v2044_v17 = vsel %vm2024_vm8, %v1981_v8, %v2043_v12  ;;  %v2126_v4 = vsel %vm8935_vm5, %v7778_v15, %v2125_v62  ;;  %vm706_vm0 = vcmp.gt.f32.partialorder %v9231_v3, 0.0  ;;  %v738_v63 = vmul.f32 0.01, %v9231_v3  ;;  %v8590_v8 = vld [vmem:[%s10560_s2 + $0x60] sm:$0xff]  }
 0x173   : > { %v2045_v34 = vsel %vm2026_vm10, %v1982_v11, %v2044_v17  ;;  %2127 = vst [vmem:[#allocation2 + $0x24] sm:$0x1] %v2126_v4  ;;  %v1417_v24 = vmax.f32 %v1415_v7, %v1416_v14  ;;  %v1423_v25 = vrot.slane %v1422_v59, 1  ;;  %v1430_v26 = vrot.slane %v1429_v23, 1  ;;  %v8592_v15 = vld [vmem:[%s10560_s2] sm:$0xff]   ;;  %8068 = vmatprep.subr.bf16.mxu1 %v8590_v8 }
 0x174   : > { %v2076_v40 = vpack.c.b16 %v2045_v34, %v2045_v34  ;;  %v1436_v19 = vmax.f32 %v1434_v27, %v1435_v16  ;;  %v770_v32 = vsel %vm706_vm0, %v9231_v3, %v738_v63  ;;  %v1659_v33 = vsel %vm8935_vm5, 0, %v1658_v20  ;;  %v1661_v63 = vld [vmem:[#allocation2 + $0x30] sm:$0x1]  ;;  %8036 = vmatprep.subr.bf16.mxu0 %v8592_v15 }
 0x175   : > { %v1424_v10 = vmax.f32 %v1422_v59, %v1423_v25  ;;  %v1431_v9 = vmax.f32 %v1429_v23, %v1430_v26  ;;  %v7743_v35 = vpack.c.bf16 %v1417_v24, %v1417_v24  ;;  %v813_v42 = vsel %vm785_vm7, %v770_v32, -inf  ;;  %1660 = vst [vmem:[#allocation2 + $0x28] sm:$0x1] %v1659_v33 }
 0x176   : > { %v2123_v43 = vsel %vm9059_vm4, %v2076_v40, %v2122_v51  ;;  %v1437_v44 = vrot.slane %v1436_v19, 1  ;;  %v815_v49 = vmax.f32 %v813_v42, %v9236_v13  ;;  %v1685_v50 = vsel %vm8927_vm3, 0, %v1684_v6 }
 0x177   : > { %2124 = vst [vmem:[#allocation2 + $0x20] sm:$0xf] %v2123_v43  ;;  %v7744_v3 = vpack.c.bf16 %v1424_v10, %v1424_v10  ;;  %v7745_v39 = vpack.c.bf16 %v1431_v9, %v1431_v9  ;;  %v1984_v45 = vunpack.c.l.b16 %v7743_v35  ;;  %1686 = vst [vmem:[#allocation2 + $0x2c] sm:$0x1] %v1685_v50  ;;  %v642_v54 = vmul.f32 %v9276_v53, %v9071_v41 }
 0x178   : > { %v1438_v30 = vmax.f32 %v1436_v19, %v1437_v44  ;;  %v1003_v57 = vcombine.high %v815_v49, %v815_v49  ;;  %v1010_v13 = vrot.slane %v815_v49, %v8974_v58  ;;  %v640_v60 = vmul.f32 %v9276_v53, %v9076_v47  ;;  %v1687_v44 = vld [vmem:[#allocation2 + $0x34] sm:$0x1] }
 0x179   : > { %v1985_v61 = vunpack.c.l.b16 %v7744_v3  ;;  %v1986_v38 = vunpack.c.l.b16 %v7745_v39  ;;  %v679_v62 = vadd.f32 %v9228_v2, %v642_v54  ;;  %v643_v7 = vmul.f32 %v9276_v53, %v9080_v52 }
 0x17a   : > { %v7746_v1 = vpack.c.bf16 %v1438_v30, %v1438_v30  ;;  %v1017_v5 = vrot.slane %v1003_v57, %v8974_v58  ;;  %v1018_v27 = vcombine.high %v1010_v13, %v1010_v13  ;;  %v1439_v41 = vsel %vm1186_vm11, %v1010_v13, -inf }
 0x17b   : > { %v2046_v11 = vsel %vm2016_vm13, %v1985_v61, %v1984_v45  ;;  %v1440_v47 = vrot.slane %v1439_v41, 4  ;;  %vm711_vm2 = vcmp.gt.f32.partialorder %v679_v62, 0.0  ;;  %v743_v12 = vmul.f32 0.01, %v679_v62 }
 0x17c   : > { %v1987_v52 = vunpack.c.l.b16 %v7746_v1  ;;  %v2047_v14 = vsel %vm2018_vm14, %v1986_v38, %v2046_v11  ;;  %v1019_v59 = vcombine.high %v1017_v5, %v1017_v5  ;;  %v1446_v23 = vsel %vm1186_vm11, %v1018_v27, -inf }
 0x17d   : > { %v1441_v16 = vmax.f32 %v1439_v41, %v1440_v47  ;;  %v1447_v20 = vrot.slane %v1446_v23, 4  ;;  %v1453_v17 = vsel %vm1186_vm11, %v1017_v5, -inf  ;;  %v775_v4 = vsel %vm711_vm2, %v679_v62, %v743_v12 }
 0x17e   : > { %v1454_v34 = vrot.slane %v1453_v17, 4  ;;  %v1460_v51 = vsel %vm1186_vm11, %v1019_v59, -inf  ;;  %v2048_v24 = vsel %vm2020_vm15, %v1987_v52, %v2047_v14  ;;  %v817_v25 = vsel %vm785_vm7, %v775_v4, -inf  ;;  %v2131_v4 = vld [vmem:[#allocation2 + $0x2c] sm:$0x1] }
 0x17f   : > { %v1442_v26 = vrot.slane %v1441_v16, 2  ;;  %v1448_v6 = vmax.f32 %v1446_v23, %v1447_v20  ;;  %v1461_v40 = vrot.slane %v1460_v51, 4  ;;  %v677_v19 = vadd.f32 %v9228_v2, %v640_v60 }
 0x180   : > { %v1455_v32 = vmax.f32 %v1453_v17, %v1454_v34  ;;  %v680_v33 = vadd.f32 %v9228_v2, %v643_v7  ;;  %v641_v10 = vmul.f32 %v9276_v53, %v9084_v56  ;;  %v1662_v9 = vsel %vm8935_vm5, 0, %v1661_v63 }
 0x181   : > { %v1443_v35 = vmax.f32 %v1441_v16, %v1442_v26  ;;  %v1449_v42 = vrot.slane %v1448_v6, 2  ;;  %v1462_v43 = vmax.f32 %v1460_v51, %v1461_v40  ;;  %vm709_vm12 = vcmp.gt.f32.partialorder %v677_v19, 0.0  ;;  %1663 = vst [vmem:[#allocation2 + $0x30] sm:$0x1] %v1662_v9 }
 0x182   : > { %v1456_v49 = vrot.slane %v1455_v32, 2  ;;  %v741_v50 = vmul.f32 0.01, %v677_v19  ;;  %vm712_vm0 = vcmp.gt.f32.partialorder %v680_v33, 0.0  ;;  %v744_v3 = vmul.f32 0.01, %v680_v33 }
 0x183   : > { %v1444_v39 = vrot.slane %v1443_v35, 1  ;;  %v1450_v45 = vmax.f32 %v1448_v6, %v1449_v42  ;;  %v1463_v54 = vrot.slane %v1462_v43, 2  ;;  %v678_v30 = vadd.f32 %v9228_v2, %v641_v10 }
 0x184   : > { %v1457_v57 = vmax.f32 %v1455_v32, %v1456_v49  ;;  %v773_v56 = vsel %vm709_vm12, %v677_v19, %v741_v50  ;;  %v776_v13 = vsel %vm712_vm0, %v680_v33, %v744_v3  ;;  %v1688_v60 = vsel %vm8927_vm3, 0, %v1687_v44  ;;  %v2128_v44 = vld [vmem:[#allocation2 + $0x28] sm:$0xf] }
 0x185   : > { %v1445_v61 = vmax.f32 %v1443_v35, %v1444_v39  ;;  %v1451_v38 = vrot.slane %v1450_v45, 1  ;;  %v1464_v62 = vmax.f32 %v1462_v43, %v1463_v54  ;;  %v816_v7 = vsel %vm785_vm7, %v773_v56, -inf  ;;  %1689 = vst [vmem:[#allocation2 + $0x34] sm:$0x1] %v1688_v60 }
 0x186   : > { %v1458_v1 = vrot.slane %v1457_v57, 1  ;;  %v818_v5 = vmax.f32 %v816_v7, %v817_v25  ;;  %v820_v27 = vsel %vm785_vm7, %v776_v13, -inf  ;;  %vm710_vm2 = vcmp.gt.f32.partialorder %v678_v30, 0.0 }
 0x187   : > { %v1452_v41 = vmax.f32 %v1450_v45, %v1451_v38  ;;  %v1465_v8 = vrot.slane %v1464_v62, 1  ;;  %v7747_v11 = vpack.c.bf16 %v1445_v61, %v1445_v61  ;;  %v742_v47 = vmul.f32 0.01, %v678_v30 }
 0x188   : > { %v1459_v12 = vmax.f32 %v1457_v57, %v1458_v1  ;;  %v1020_v15 = vcombine.high %v818_v5, %v818_v5  ;;  %v1027_v52 = vrot.slane %v818_v5, %v8974_v58  ;;  %v646_v14 = vmul.f32 %v9276_v53, %v9096_v22 }
 0x189   : > { %v1466_v59 = vmax.f32 %v1464_v62, %v1465_v8  ;;  %v7748_v23 = vpack.c.bf16 %v1452_v41, %v1452_v41  ;;  %v1988_v16 = vunpack.c.l.b16 %v7747_v11  ;;  %v774_v20 = vsel %vm710_vm2, %v678_v30, %v742_v47 }
 0x18a   : > { %v7749_v17 = vpack.c.bf16 %v1459_v12, %v1459_v12  ;;  %v1034_v63 = vrot.slane %v1020_v15, %v8974_v58  ;;  %v1035_v34 = vcombine.high %v1027_v52, %v1027_v52  ;;  %v1467_v51 = vsel %vm1186_vm11, %v1027_v52, -inf }
 0x18b   : > { %v1989_v25 = vunpack.c.l.b16 %v7748_v23  ;;  %v2049_v26 = vsel %vm2022_vm6, %v1988_v16, %v2048_v24  ;;  %v7779_v6 = vpack.c.bf16 %v1466_v59, %v1466_v59  ;;  %v1468_v40 = vrot.slane %v1467_v51, 4 }
 0x18c   : > { %v1990_v19 = vunpack.c.l.b16 %v7749_v17  ;;  %v1036_v32 = vcombine.high %v1034_v63, %v1034_v63  ;;  %v1474_v22 = vsel %vm1186_vm11, %v1035_v34, -inf  ;;  %v1481_v33 = vsel %vm1186_vm11, %v1034_v63, -inf }
 0x18d   : > { %v2050_v10 = vsel %vm2024_vm8, %v1989_v25, %v2049_v26  ;;  %v2132_v9 = vsel %vm8935_vm5, %v7779_v6, %v2131_v4  ;;  %v1469_v35 = vmax.f32 %v1467_v51, %v1468_v40  ;;  %v1475_v42 = vrot.slane %v1474_v22, 4 }
 0x18e   : > { %v2051_v43 = vsel %vm2026_vm10, %v1990_v19, %v2050_v10  ;;  %2133 = vst [vmem:[#allocation2 + $0x2c] sm:$0x1] %v2132_v9  ;;  %v1482_v24 = vrot.slane %v1481_v33, 4  ;;  %v1488_v49 = vsel %vm1186_vm11, %v1036_v32, -inf  ;;  %v819_v50 = vsel %vm785_vm7, %v774_v20, -inf }
 0x18f   : > { %v2078_v3 = vpack.c.b16 %v2051_v43, %v2051_v43  ;;  %v1470_v39 = vrot.slane %v1469_v35, 2  ;;  %v1476_v45 = vmax.f32 %v1474_v22, %v1475_v42  ;;  %v1489_v54 = vrot.slane %v1488_v49, 4 }
 0x190   : > { %v1483_v30 = vmax.f32 %v1481_v33, %v1482_v24  ;;  %v821_v57 = vmax.f32 %v819_v50, %v820_v27  ;;  %v683_v56 = vadd.f32 %v9228_v2, %v646_v14  ;;  %v644_v13 = vmul.f32 %v9276_v53, %v9100_v31 }
 0x191   : > { %v2129_v60 = vsel %vm9059_vm4, %v2078_v3, %v2128_v44  ;;  %v1471_v61 = vmax.f32 %v1469_v35, %v1470_v39  ;;  %v1477_v38 = vrot.slane %v1476_v45, 2  ;;  %v1490_v62 = vmax.f32 %v1488_v49, %v1489_v54 }
 0x192   : > { %2130 = vst [vmem:[#allocation2 + $0x28] sm:$0xf] %v2129_v60  ;;  %v1484_v7 = vrot.slane %v1483_v30, 2  ;;  %v1037_v1 = vcombine.high %v821_v57, %v821_v57  ;;  %v1044_v5 = vrot.slane %v821_v57, %v8974_v58  ;;  %vm715_vm12 = vcmp.gt.f32.partialorder %v683_v56, 0.0 }
 0x193   : > { %v1472_v41 = vrot.slane %v1471_v61, 1  ;;  %v1478_v8 = vmax.f32 %v1476_v45, %v1477_v38  ;;  %v1491_v27 = vrot.slane %v1490_v62, 2  ;;  %v747_v11 = vmul.f32 0.01, %v683_v56 }
 0x194   : > { %v1485_v47 = vmax.f32 %v1483_v30, %v1484_v7  ;;  %v1051_v12 = vrot.slane %v1037_v1, %v8974_v58  ;;  %v1052_v31 = vcombine.high %v1044_v5, %v1044_v5  ;;  %v1495_v15 = vsel %vm1186_vm11, %v1044_v5, -inf }
 0x195   : > { %v1473_v52 = vmax.f32 %v1471_v61, %v1472_v41  ;;  %v1479_v14 = vrot.slane %v1478_v8, 1  ;;  %v1492_v59 = vmax.f32 %v1490_v62, %v1491_v27  ;;  %v1496_v23 = vrot.slane %v1495_v15, 4 }
 0x196   : > { %v1486_v16 = vrot.slane %v1485_v47, 1  ;;  %v1053_v20 = vcombine.high %v1051_v12, %v1051_v12  ;;  %v1502_v17 = vsel %vm1186_vm11, %v1052_v31, -inf  ;;  %v1509_v4 = vsel %vm1186_vm11, %v1051_v12, -inf }
 0x197   : > { %v1480_v63 = vmax.f32 %v1478_v8, %v1479_v14  ;;  %v1493_v34 = vrot.slane %v1492_v59, 1  ;;  %v7751_v51 = vpack.c.bf16 %v1473_v52, %v1473_v52  ;;  %v1497_v25 = vmax.f32 %v1495_v15, %v1496_v23 }
 0x198   : > { %v1487_v26 = vmax.f32 %v1485_v47, %v1486_v16  ;;  %v1503_v6 = vrot.slane %v1502_v17, 4  ;;  %v1510_v40 = vrot.slane %v1509_v4, 4  ;;  %v1516_v19 = vsel %vm1186_vm11, %v1053_v20, -inf }
 0x199   : > { %v1494_v32 = vmax.f32 %v1492_v59, %v1493_v34  ;;  %v7752_v22 = vpack.c.bf16 %v1480_v63, %v1480_v63  ;;  %v1992_v33 = vunpack.c.l.b16 %v7751_v51  ;;  %v1498_v10 = vrot.slane %v1497_v25, 2 }
 0x19a   : > { %v7753_v9 = vpack.c.bf16 %v1487_v26, %v1487_v26  ;;  %v1504_v35 = vmax.f32 %v1502_v17, %v1503_v6  ;;  %v1511_v42 = vmax.f32 %v1509_v4, %v1510_v40  ;;  %v1517_v43 = vrot.slane %v1516_v19, 4  ;;  %v1690_v40 = vld [vmem:[#allocation2 + $0x3c] sm:$0x1] }
 0x19b   : > { %v7754_v44 = vpack.c.bf16 %v1494_v32, %v1494_v32  ;;  %v1993_v24 = vunpack.c.l.b16 %v7752_v22  ;;  %v1499_v49 = vmax.f32 %v1497_v25, %v1498_v10  ;;  %v779_v50 = vsel %vm715_vm12, %v683_v56, %v747_v11  ;;  %v2137_v25 = vld [vmem:[#allocation2 + $0x34] sm:$0x1] }
 0x19c   : > { %v1994_v3 = vunpack.c.l.b16 %v7753_v9  ;;  %v1505_v39 = vrot.slane %v1504_v35, 2  ;;  %v1512_v45 = vrot.slane %v1511_v42, 2  ;;  %v1518_v54 = vmax.f32 %v1516_v19, %v1517_v43 }
 0x19d   : > { %v1995_v30 = vunpack.c.l.b16 %v7754_v44  ;;  %v2052_v57 = vsel %vm2016_vm13, %v1993_v24, %v1992_v33  ;;  %v1500_v60 = vrot.slane %v1499_v49, 1  ;;  %v823_v61 = vsel %vm785_vm7, %v779_v50, -inf }
 0x19e   : > { %v2053_v38 = vsel %vm2018_vm14, %v1994_v3, %v2052_v57  ;;  %v1506_v62 = vmax.f32 %v1504_v35, %v1505_v39  ;;  %v1513_v7 = vmax.f32 %v1511_v42, %v1512_v45  ;;  %v1519_v1 = vrot.slane %v1518_v54, 2 }
 0x19f   : > { %v1501_v5 = vmax.f32 %v1499_v49, %v1500_v60  ;;  %v2054_v41 = vsel %vm2020_vm15, %v1995_v30, %v2053_v38  ;;  %v681_v56 = vadd.f32 %v9228_v2, %v644_v13  ;;  %v647_v8 = vmul.f32 %v9276_v53, %v9102_v36  ;;  %v2134_v49 = vld [vmem:[#allocation2 + $0x30] sm:$0xf] }
 0x1a0   : > { %v1507_v27 = vrot.slane %v1506_v62, 1  ;;  %v1514_v11 = vrot.slane %v1513_v7, 1  ;;  %v1520_v47 = vmax.f32 %v1518_v54, %v1519_v1  ;;  %v645_v12 = vmul.f32 %v9276_v53, %v9105_v46  ;;  %v1664_v46 = vld [vmem:[#allocation2 + $0x38] sm:$0x1] }
 0x1a1   : > { %v7755_v31 = vpack.c.bf16 %v1501_v5, %v1501_v5  ;;  %vm713_vm0 = vcmp.gt.f32.partialorder %v681_v56, 0.0  ;;  %v745_v15 = vmul.f32 0.01, %v681_v56  ;;  %v684_v52 = vadd.f32 %v9228_v2, %v647_v8 }
 0x1a2   : > { %v1508_v14 = vmax.f32 %v1506_v62, %v1507_v27  ;;  %v1515_v59 = vmax.f32 %v1513_v7, %v1514_v11  ;;  %v1521_v23 = vrot.slane %v1520_v47, 1  ;;  %v682_v16 = vadd.f32 %v9228_v2, %v645_v12 }
 0x1a3   : > { %v1996_v13 = vunpack.c.l.b16 %v7755_v31  ;;  %v777_v20 = vsel %vm713_vm0, %v681_v56, %v745_v15  ;;  %vm716_vm2 = vcmp.gt.f32.partialorder %v684_v52, 0.0  ;;  %v748_v36 = vmul.f32 0.01, %v684_v52  ;;  %v9382_v15 = vld [vmem:[#allocation2 + $0x8] sm:$0xe] }
 0x1a4   : > { %v1522_v17 = vmax.f32 %v1520_v47, %v1521_v23  ;;  %v7756_v4 = vpack.c.bf16 %v1508_v14, %v1508_v14  ;;  %v7757_v63 = vpack.c.bf16 %v1515_v59, %v1515_v59  ;;  %v822_v34 = vsel %vm785_vm7, %v777_v20, -inf }
 0x1a5   : > { %v2055_v51 = vsel %vm2022_vm6, %v1996_v13, %v2054_v41  ;;  %v824_v26 = vmax.f32 %v822_v34, %v823_v61  ;;  %v780_v6 = vsel %vm716_vm2, %v684_v52, %v748_v36  ;;  %vm714_vm12 = vcmp.gt.f32.partialorder %v682_v16, 0.0 }
 0x1a6   : > { %v1997_v19 = vunpack.c.l.b16 %v7756_v4  ;;  %v1998_v32 = vunpack.c.l.b16 %v7757_v63  ;;  %v7780_v22 = vpack.c.bf16 %v1522_v17, %v1522_v17  ;;  %v746_v9 = vmul.f32 0.01, %v682_v16 }
 0x1a7   : > { %v1054_v33 = vcombine.high %v824_v26, %v824_v26  ;;  %v1061_v10 = vrot.slane %v824_v26, %v8974_v58  ;;  %v1665_v35 = vsel %vm8935_vm5, 0, %v1664_v46  ;;  %v1691_v44 = vsel %vm8927_vm3, 0, %v1690_v40 }
 0x1a8   : > { %v2056_v42 = vsel %vm2024_vm8, %v1997_v19, %v2055_v51  ;;  %v2138_v43 = vsel %vm8935_vm5, %v7780_v22, %v2137_v25  ;;  %1666 = vst [vmem:[#allocation2 + $0x38] sm:$0x1] %v1665_v35  ;;  %1692 = vst [vmem:[#allocation2 + $0x3c] sm:$0x1] %v1691_v44  ;;  %v8787_v45 = vmov 0   ;;  %v826_v57 = vsel %vm785_vm7, %v780_v6, -inf }
 0x1a9   : > { %v2057_v24 = vsel %vm2026_vm10, %v1998_v32, %v2056_v42  ;;  %2139 = vst [vmem:[#allocation2 + $0x34] sm:$0x1] %v2138_v43  ;;  %v1068_v50 = vrot.slane %v1054_v33, %v8974_v58  ;;  %v1069_v3 = vcombine.high %v1061_v10, %v1061_v10  ;;  %v1523_v39 = vsel %vm1186_vm11, %v1061_v10, -inf  ;;  %1636 = vst.msk [vmem:[#allocation2] sm:$0xf] %vm10568_vm9, %v8787_v45 }
 0x1aa   : > { %1638 = vst.msk [vmem:[#allocation2 + $0x4] sm:$0x1] %vm10567_vm1, %v8787_v45  ;;  %1641 = vst.msk [vmem:[#allocation2 + $0x4c] sm:$0x1] %vm10567_vm1, %v8787_v45  ;;  %v2080_v54 = vpack.c.b16 %v2057_v24, %v2057_v24  ;;  %v1524_v30 = vrot.slane %v1523_v39, 4  ;;  %v778_v60 = vsel %vm714_vm12, %v682_v16, %v746_v9  ;;  %vm2558_vm0 = vcmask 1042432  }
 0x1ab   : > { %1640 = vst.msk [vmem:[#allocation2 + $0x48] sm:$0xf] %vm10568_vm9, %v8787_v45  ;;  %v1070_v61 = vcombine.high %v1068_v50, %v1068_v50  ;;  %v1530_v38 = vsel %vm1186_vm11, %v1069_v3, -inf  ;;  %v1537_v62 = vsel %vm1186_vm11, %v1068_v50, -inf  ;;  %v825_v7 = vsel %vm785_vm7, %v778_v60, -inf }
 0x1ac   : > { %5750 = vst.msk [vmem:[#allocation4] sm:$0x3] %vm1186_vm11, %v8787_v45  ;;  %5752 = vst.msk [vmem:[#allocation4 + $0x6] sm:$0x3] %vm1186_vm11, %v8787_v45  ;;  %v2135_v1 = vsel %vm9059_vm4, %v2080_v54, %v2134_v49  ;;  %v1525_v5 = vmax.f32 %v1523_v39, %v1524_v30  ;;  %v1531_v41 = vrot.slane %v1530_v38, 4  ;;  %v1538_v56 = vrot.slane %v1537_v62, 4 }
 0x1ad   : > { %2136 = vst [vmem:[#allocation2 + $0x30] sm:$0xf] %v2135_v1  ;;  %v1544_v8 = vsel %vm1186_vm11, %v1070_v61, -inf  ;;  %v827_v27 = vmax.f32 %v825_v7, %v826_v57  ;;  %vm2559_vm2 = vcmask 1046532   ;;  %v7226_v4 = vrot.slane %v9382_v15, 9 }
 0x1ae   : > { %v1526_v11 = vrot.slane %v1525_v5, 2  ;;  %v1532_v47 = vmax.f32 %v1530_v38, %v1531_v41  ;;  %v1539_v12 = vmax.f32 %v1537_v62, %v1538_v56  ;;  %v1545_v31 = vrot.slane %v1544_v8, 4  ;;  %vm9398_vm12 = vmor %vm2558_vm0, %vm2559_vm2 }
 0x1af   : > { %v1071_v52 = vcombine.high %v827_v27, %v827_v27  ;;  %v1078_v14 = vrot.slane %v827_v27, %v8974_v58 }
 0x1b0   : > { %v1527_v59 = vmax.f32 %v1525_v5, %v1526_v11  ;;  %v1533_v23 = vrot.slane %v1532_v47, 2  ;;  %v1540_v16 = vrot.slane %v1539_v12, 2  ;;  %v1546_v13 = vmax.f32 %v1544_v8, %v1545_v31  ;;  %v2534_v41 = vld [vmem:[#allocation2] sm:$0xe] }
 0x1b1   : > { %v1085_v20 = vrot.slane %v1071_v52, %v8974_v58  ;;  %v1086_v36 = vcombine.high %v1078_v14, %v1078_v14  ;;  %v1551_v17 = vsel %vm1186_vm11, %v1078_v14, -inf  ;;  %v9391_v30 = vld [vmem:[#allocation2 + $0x4] sm:$0x1]  ;;  %v9394_v14 = vld [vmem:[#allocation2 + $0xc] sm:$0x1] }
 0x1b2   : > { %v1528_v63 = vrot.slane %v1527_v59, 1  ;;  %v1534_v34 = vmax.f32 %v1532_v47, %v1533_v23  ;;  %v1541_v46 = vmax.f32 %v1539_v12, %v1540_v16  ;;  %v1547_v51 = vrot.slane %v1546_v13, 2 }
 0x1b3   : > { %v1087_v25 = vcombine.high %v1085_v20, %v1085_v20  ;;  %v1552_v26 = vrot.slane %v1551_v17, 4  ;;  %v1558_v6 = vsel %vm1186_vm11, %v1086_v36, -inf  ;;  %v1565_v40 = vsel %vm1186_vm11, %v1085_v20, -inf }
 0x1b4   : > { %v1529_v19 = vmax.f32 %v1527_v59, %v1528_v63  ;;  %v1535_v32 = vrot.slane %v1534_v34, 1  ;;  %v1542_v22 = vrot.slane %v1541_v46, 1  ;;  %v1548_v33 = vmax.f32 %v1546_v13, %v1547_v51  ;;  %v4189_v59 = vld [vmem:[#allocation3 + $0x8] sm:$0x4] }
 0x1b5   : > { %v1553_v10 = vmax.f32 %v1551_v17, %v1552_v26  ;;  %v1559_v9 = vrot.slane %v1558_v6, 4  ;;  %v1566_v35 = vrot.slane %v1565_v40, 4  ;;  %v1572_v42 = vsel %vm1186_vm11, %v1087_v25, -inf }
 0x1b6   : > { %v1536_v43 = vmax.f32 %v1534_v34, %v1535_v32  ;;  %v1543_v44 = vmax.f32 %v1541_v46, %v1542_v22  ;;  %v1549_v24 = vrot.slane %v1548_v33, 1  ;;  %v7759_v49 = vpack.c.bf16 %v1529_v19, %v1529_v19 }
 0x1b7   : > { %v1554_v50 = vrot.slane %v1553_v10, 2  ;;  %v1560_v3 = vmax.f32 %v1558_v6, %v1559_v9  ;;  %v1567_v39 = vmax.f32 %v1565_v40, %v1566_v35  ;;  %v1573_v54 = vrot.slane %v1572_v42, 4 }
 0x1b8   : > { %v1550_v57 = vmax.f32 %v1548_v33, %v1549_v24  ;;  %v7760_v60 = vpack.c.bf16 %v1536_v43, %v1536_v43  ;;  %v7761_v61 = vpack.c.bf16 %v1543_v44, %v1543_v44  ;;  %v2189_v38 = vshll.u32 %v9391_v30, 16 }
 0x1b9   : > { %v1555_v62 = vmax.f32 %v1553_v10, %v1554_v50  ;;  %v1561_v7 = vrot.slane %v1560_v3, 2  ;;  %v1568_v1 = vrot.slane %v1567_v39, 2  ;;  %v1574_v5 = vmax.f32 %v1572_v42, %v1573_v54 }
 0x1ba   : > { %v7762_v56 = vpack.c.bf16 %v1550_v57, %v1550_v57  ;;  %v2000_v8 = vunpack.c.l.b16 %v7759_v49  ;;  %v2001_v27 = vunpack.c.l.b16 %v7760_v60  ;;  %v2002_v11 = vunpack.c.l.b16 %v7761_v61 }
 0x1bb   : > { %v1556_v47 = vrot.slane %v1555_v62, 1  ;;  %v1562_v12 = vmax.f32 %v1560_v3, %v1561_v7  ;;  %v1569_v31 = vmax.f32 %v1567_v39, %v1568_v1  ;;  %v1575_v52 = vrot.slane %v1574_v5, 2  ;;  %v2143_v39 = vld [vmem:[#allocation2 + $0x3c] sm:$0x1]  ;;  %v2140_v7 = vld [vmem:[#allocation2 + $0x38] sm:$0xf] }
 0x1bc   : > { %v2003_v23 = vunpack.c.l.b16 %v7762_v56  ;;  %v2058_v16 = vsel %vm2016_vm13, %v2001_v27, %v2000_v8  ;;  %v7225_v13 = vrot.slane %v2534_v41, 9  ;;  %v2563_v20 = vrot.slane %v9391_v30, 5  ;;  %v1667_v56 = vld [vmem:[#allocation2 + $0x40] sm:$0x1] }
 0x1bd   : > { %v2059_v36 = vsel %vm2018_vm14, %v2002_v11, %v2058_v16  ;;  %v1557_v17 = vmax.f32 %v1555_v62, %v1556_v47  ;;  %v1563_v63 = vrot.slane %v1562_v12, 1  ;;  %v1570_v34 = vrot.slane %v1569_v31, 1  ;;  %v9432_v47 = vld [vmem:[#allocation2] sm:$0xf] }
 0x1be   : > { %v1576_v46 = vmax.f32 %v1574_v5, %v1575_v52  ;;  %v2060_v51 = vsel %vm2020_vm15, %v2003_v23, %v2059_v36  ;;  %v2564_v25 = vsel %vm9398_vm12, %v7225_v13, %v2563_v20  ;;  %v2567_v26 = vrot.slane %v9394_v14, 5  ;;  %v9442_v20 = vld [vmem:[#allocation2 + $0x8] sm:$0xf] }
 0x1bf   : > { %v1564_v6 = vmax.f32 %v1562_v12, %v1563_v63  ;;  %v1571_v40 = vmax.f32 %v1569_v31, %v1570_v34  ;;  %v7763_v19 = vpack.c.bf16 %v1557_v17, %v1557_v17  ;;  %v650_v32 = vmul.f32 %v9276_v53, %v9167_v28 }
 0x1c0   : > { %v1577_v22 = vrot.slane %v1576_v46, 1  ;;  %v2568_v33 = vsel %vm9398_vm12, %v7226_v4, %v2567_v26  ;;  %v648_v10 = vmul.f32 %v9276_v53, %v9169_v37  ;;  %v651_v9 = vmul.f32 %v9276_v53, %v9176_v55 }
 0x1c1   : > { %v7764_v35 = vpack.c.bf16 %v1564_v6, %v1564_v6  ;;  %v7765_v42 = vpack.c.bf16 %v1571_v40, %v1571_v40  ;;  %v2004_v43 = vunpack.c.l.b16 %v7763_v19  ;;  %v7241_v44 = vcombine.low %v2564_v25, %v2568_v33 }
 0x1c2   : > { %v1578_v24 = vmax.f32 %v1576_v46, %v1577_v22  ;;  %v687_v49 = vadd.f32 %v9228_v2, %v650_v32  ;;  %v685_v28 = vadd.f32 %v9228_v2, %v648_v10  ;;  %v688_v15 = vadd.f32 %v9228_v2, %v651_v9 }
 0x1c3   : > { %v2005_v50 = vunpack.c.l.b16 %v7764_v35  ;;  %v2006_v3 = vunpack.c.l.b16 %v7765_v42  ;;  %v2061_v4 = vsel %vm2022_vm6, %v2004_v43, %v2060_v51  ;;  %8060 = vmatprep.mubr.msk.bf16.mxu1 %vm785_vm7, %v7241_v44  ;;  %v649_v37 = vmul.f32 %v9276_v53, %v9182_v0  ;;  %v1693_v0 = vld [vmem:[#allocation2 + $0x44] sm:$0x1] }
 0x1c4   : > { %v7781_v55 = vpack.c.bf16 %v1578_v24, %v1578_v24  ;;  %vm719_vm0 = vcmp.gt.f32.partialorder %v687_v49, 0.0  ;;  %v751_v54 = vmul.f32 0.01, %v687_v49  ;;  %vm717_vm2 = vcmp.gt.f32.partialorder %v685_v28, 0.0 }
 0x1c5   : > { %v2062_v57 = vsel %vm2024_vm8, %v2005_v50, %v2061_v4  ;;  %v749_v60 = vmul.f32 0.01, %v685_v28  ;;  %vm720_vm1 = vcmp.gt.f32.partialorder %v688_v15, 0.0  ;;  %v752_v61 = vmul.f32 0.01, %v688_v15 }
 0x1c6   : > { %v2063_v62 = vsel %vm2026_vm10, %v2006_v3, %v2062_v57  ;;  %v2144_v1 = vsel %vm8935_vm5, %v7781_v55, %v2143_v39  ;;  %v783_v5 = vsel %vm719_vm0, %v687_v49, %v751_v54  ;;  %v686_v41 = vadd.f32 %v9228_v2, %v649_v37 }
 0x1c7   : > { %v2082_v53 = vpack.c.b16 %v2063_v62, %v2063_v62  ;;  %2145 = vst [vmem:[#allocation2 + $0x3c] sm:$0x1] %v2144_v1  ;;  %v829_v8 = vsel %vm785_vm7, %v783_v5, -inf  ;;  %v781_v27 = vsel %vm717_vm2, %v685_v28, %v749_v60  ;;  %v784_v11 = vsel %vm720_vm1, %v688_v15, %v752_v61 }
 0x1c8   : > { %v828_v12 = vsel %vm785_vm7, %v781_v27, -inf  ;;  %v832_v31 = vsel %vm785_vm7, %v784_v11, -inf  ;;  %vm718_vm9 = vcmp.gt.f32.partialorder %v686_v41, 0.0  ;;  %v750_v52 = vmul.f32 0.01, %v686_v41 }
 0x1c9   : > { %v2141_v23 = vsel %vm9059_vm4, %v2082_v53, %v2140_v7  ;;  %v830_v2 = vmax.f32 %v828_v12, %v829_v8  ;;  %v1668_v16 = vsel %vm8935_vm5, 0, %v1667_v56  ;;  %v1694_v13 = vsel %vm8927_vm3, 0, %v1693_v0 }
 0x1ca   : > { %2142 = vst [vmem:[#allocation2 + $0x38] sm:$0xf] %v2141_v23  ;;  %v2203_v36 = vshll.u32 %v9394_v14, 16  ;;  %v782_v17 = vsel %vm718_vm9, %v686_v41, %v750_v52  ;;  %1669 = vst [vmem:[#allocation2 + $0x40] sm:$0x1] %v1668_v16  ;;  %v2180_v63 = vshrl.u32 %v9432_v47, 16 }
 0x1cb   : > { %1695 = vst [vmem:[#allocation2 + $0x44] sm:$0x1] %v1694_v13  ;;  %v1088_v34 = vcombine.high %v830_v2, %v830_v2  ;;  %v1095_v46 = vrot.slane %v830_v2, %v8974_v58  ;;  %v831_v51 = vsel %vm785_vm7, %v782_v17, -inf  ;;  %v2183_v25 = vshll.u32 %v9432_v47, 16  ;;  %v2536_v14 = vld [vmem:[#allocation2 + $0x10] sm:$0xe] }
 0x1cc   : > { %v9451_v18 = vrot.slane %v2189_v38, 5  ;;  %v833_v26 = vmax.f32 %v831_v51, %v832_v31  ;;  %v9453_v6 = vrot.slane %v2180_v63, 4  ;;  %v2194_v40 = vshrl.u32 %v9442_v20, 16 }
 0x1cd   : > { %v1102_v19 = vrot.slane %v1088_v34, %v8974_v58  ;;  %v1103_v32 = vcombine.high %v1095_v46, %v1095_v46  ;;  %v1579_v22 = vsel %vm1186_vm11, %v1095_v46, -inf  ;;  %v9458_v33 = vrot.slane %v2183_v25, 5 }
 0x1ce   : > { %v1580_v10 = vrot.slane %v1579_v22, 4  ;;  %v1105_v9 = vcombine.high %v833_v26, %v833_v26  ;;  %v1112_v35 = vrot.slane %v833_v26, %v8974_v58  ;;  %v2197_v30 = vshll.u32 %v9442_v20, 16 }
 0x1cf   : > { %v1104_v38 = vcombine.high %v1102_v19, %v1102_v19  ;;  %v1586_v42 = vsel %vm1186_vm11, %v1103_v32, -inf  ;;  %v1593_v43 = vsel %vm1186_vm11, %v1102_v19, -inf  ;;  %v9464_v44 = vrot.slane %v2194_v40, 4 }
 0x1d0   : > { %v1581_v24 = vmax.f32 %v1579_v22, %v1580_v10  ;;  %v1587_v49 = vrot.slane %v1586_v42, 4  ;;  %v1594_v28 = vrot.slane %v1593_v43, 4  ;;  %v1119_v15 = vrot.slane %v1105_v9, %v8974_v58 }
 0x1d1   : > { %v1600_v50 = vsel %vm1186_vm11, %v1104_v38, -inf  ;;  %v1120_v3 = vcombine.high %v1112_v35, %v1112_v35  ;;  %v1607_v4 = vsel %vm1186_vm11, %v1112_v35, -inf  ;;  %v2186_v39 = vor.u32 %v9458_v33, %v9453_v6 }
 0x1d2   : > { %v1582_v37 = vrot.slane %v1581_v24, 2  ;;  %v1588_v55 = vmax.f32 %v1586_v42, %v1587_v49  ;;  %v1595_v54 = vmax.f32 %v1593_v43, %v1594_v28  ;;  %v1601_v57 = vrot.slane %v1600_v50, 4 }
 0x1d3   : > { %v1121_v60 = vcombine.high %v1119_v15, %v1119_v15  ;;  %v1608_v61 = vrot.slane %v1607_v4, 4  ;;  %v1614_v62 = vsel %vm1186_vm11, %v1120_v3, -inf  ;;  %v1621_v7 = vsel %vm1186_vm11, %v1119_v15, -inf }
 0x1d4   : > { %v1583_v1 = vmax.f32 %v1581_v24, %v1582_v37  ;;  %v1589_v5 = vrot.slane %v1588_v55, 2  ;;  %v1596_v41 = vrot.slane %v1595_v54, 2  ;;  %v1602_v56 = vmax.f32 %v1600_v50, %v1601_v57 }
 0x1d5   : > { %v1609_v0 = vmax.f32 %v1607_v4, %v1608_v61  ;;  %v1615_v53 = vrot.slane %v1614_v62, 4  ;;  %v1622_v8 = vrot.slane %v1621_v7, 4  ;;  %v1628_v27 = vsel %vm1186_vm11, %v1121_v60, -inf }
 0x1d6   : > { %vm2176_vm1 = vsmask.f32 3328  ;;  %vm2177_vm3 = vsmask.f32 7440  ;;  %v1584_v11 = vrot.slane %v1583_v1, 1  ;;  %v1590_v12 = vmax.f32 %v1588_v55, %v1589_v5 }
 0x1d7   : > { %v1597_v31 = vmax.f32 %v1595_v54, %v1596_v41  ;;  %v1603_v52 = vrot.slane %v1602_v56, 2  ;;  %v1610_v23 = vrot.slane %v1609_v0, 2  ;;  %v1616_v2 = vmax.f32 %v1614_v62, %v1615_v53  ;;  %v2170_v62 = vld [vmem:[#allocation2 + $0x14] sm:$0x1]  ;;  %vm9479_vm9 = vmor %vm2176_vm1, %vm2177_vm3 }
 0x1d8   : > { %v1623_v16 = vmax.f32 %v1621_v7, %v1622_v8  ;;  %v1629_v13 = vrot.slane %v1628_v27, 4  ;;  %v1585_v17 = vmax.f32 %v1583_v1, %v1584_v11  ;;  %v1591_v63 = vrot.slane %v1590_v12, 1 }
 0x1d9   : > { %v1598_v34 = vrot.slane %v1597_v31, 1  ;;  %v1604_v46 = vmax.f32 %v1602_v56, %v1603_v52  ;;  %v1611_v51 = vmax.f32 %v1609_v0, %v1610_v23  ;;  %v1617_v25 = vrot.slane %v1616_v2, 2 }
 0x1da   : > { %v1624_v26 = vrot.slane %v1623_v16, 2  ;;  %v1630_v6 = vmax.f32 %v1628_v27, %v1629_v13  ;;  %v1592_v40 = vmax.f32 %v1590_v12, %v1591_v63  ;;  %v7767_v22 = vpack.c.bf16 %v1585_v17, %v1585_v17  ;;  %v9486_v27 = vld [vmem:[#allocation2 + $0x1c] sm:$0x1]  ;;  %v2149_v12 = vld [vmem:[#allocation2 + $0x44] sm:$0x1] }
 0x1db   : > { %v1599_v19 = vmax.f32 %v1597_v31, %v1598_v34  ;;  %v1605_v32 = vrot.slane %v1604_v46, 1  ;;  %v1612_v33 = vrot.slane %v1611_v51, 1  ;;  %v1618_v10 = vmax.f32 %v1616_v2, %v1617_v25  ;;  %v2537_v13 = vld [vmem:[#allocation2 + $0x18] sm:$0xe] }
 0x1dc   : > { %v1625_v9 = vmax.f32 %v1623_v16, %v1624_v26  ;;  %v1631_v35 = vrot.slane %v1630_v6, 2  ;;  %v7768_v42 = vpack.c.bf16 %v1592_v40, %v1592_v40  ;;  %v2008_v24 = vunpack.c.l.b16 %v7767_v22  ;;  %v9502_v40 = vld [vmem:[#allocation2 + $0x18] sm:$0xf] }
 0x1dd   : > { %v1606_v38 = vmax.f32 %v1604_v46, %v1605_v32  ;;  %v7769_v43 = vpack.c.bf16 %v1599_v19, %v1599_v19  ;;  %v1613_v49 = vmax.f32 %v1611_v51, %v1612_v33  ;;  %v1619_v28 = vrot.slane %v1618_v10, 1  ;;  %v9495_v51 = vld [vmem:[#allocation2 + $0x10] sm:$0xf]  ;;  %v2146_v32 = vld [vmem:[#allocation2 + $0x40] sm:$0xf] }
 0x1de   : > { %v1626_v15 = vrot.slane %v1625_v9, 1  ;;  %v1632_v50 = vmax.f32 %v1630_v6, %v1631_v35  ;;  %v2009_v4 = vunpack.c.l.b16 %v7768_v42  ;;  %v2187_v55 = vrot.slane %v2186_v39, 4 }
 0x1df   : > { %v7770_v3 = vpack.c.bf16 %v1606_v38, %v1606_v38  ;;  %v2010_v37 = vunpack.c.l.b16 %v7769_v43  ;;  %v1620_v54 = vmax.f32 %v1618_v10, %v1619_v28  ;;  %v7771_v61 = vpack.c.bf16 %v1613_v49, %v1613_v49  ;;  %v9515_v49 = vld [vmem:[#allocation2 + $0x20] sm:$0xf] }
 0x1e0   : > { %v1627_v57 = vmax.f32 %v1625_v9, %v1626_v15  ;;  %v1633_v60 = vrot.slane %v1632_v50, 1  ;;  %v2205_v7 = vrot.slane %v2203_v36, 5  ;;  %v2064_v5 = vsel %vm2016_vm13, %v2009_v4, %v2008_v24  ;;  %v2538_v9 = vld [vmem:[#allocation2 + $0x20] sm:$0xe]  ;;  %v9513_v24 = vld [vmem:[#allocation2 + $0x2c] sm:$0x1] }
 0x1e1   : > { %v2011_v1 = vunpack.c.l.b16 %v7770_v3  ;;  %v2199_v39 = vrot.slane %v2197_v30, 5  ;;  %v2065_v56 = vsel %vm2018_vm14, %v2010_v37, %v2064_v5  ;;  %v7772_v53 = vpack.c.bf16 %v1620_v54, %v1620_v54  ;;  %v2539_v4 = vld [vmem:[#allocation2 + $0x28] sm:$0xe] }
 0x1e2   : > { %v1634_v0 = vmax.f32 %v1632_v50, %v1633_v60  ;;  %v7773_v8 = vpack.c.bf16 %v1627_v57, %v1627_v57  ;;  %v2012_v36 = vunpack.c.l.b16 %v7771_v61  ;;  %v2217_v52 = vshll.u32 %v2170_v62, 16  ;;  %v8591_v60 = vld [vmem:[%s10560_s2 + $0x68] sm:$0xff]  }
 0x1e3   : > { %v2066_v11 = vsel %vm2020_vm15, %v2011_v1, %v2065_v56  ;;  %v2200_v31 = vor.u32 %v2199_v39, %v9464_v44  ;;  %v2013_v23 = vunpack.c.l.b16 %v7772_v53  ;;  %v2192_v30 = vsel %vm9479_vm9, %v2187_v55, %v9451_v18  ;;  %v9504_v18 = vld [vmem:[#allocation2 + $0x24] sm:$0x1]  ;;  %v9529_v5 = vld [vmem:[#allocation2 + $0x28] sm:$0xf] }
 0x1e4   : > { %v2014_v2 = vunpack.c.l.b16 %v7773_v8  ;;  %v7782_v16 = vpack.c.bf16 %v1634_v0, %v1634_v0  ;;  %v2067_v17 = vsel %vm2022_vm6, %v2012_v36, %v2066_v11  ;;  %v2231_v34 = vshll.u32 %v9486_v27, 16  ;;  %v8714_v36 = vld [vmem:[%s10560_s2 + $0x60] sm:$0xff]   ;;  %v9541_v11 = vld [vmem:[#allocation2 + $0x34] sm:$0x1] }
 0x1e5   : > { %v2201_v63 = vrot.slane %v2200_v31, 4  ;;  %v7227_v46 = vrot.slane %v2536_v14, 9  ;;  %v2068_v25 = vsel %vm2024_vm8, %v2013_v23, %v2067_v17  ;;  %v9500_v26 = vrot.slane %v2217_v52, 5 }
 0x1e6   : > { %v2150_v44 = vsel %vm8935_vm5, %v7782_v16, %v2149_v12  ;;  %v2571_v6 = vrot.slane %v2170_v62, 5  ;;  %v2069_v19 = vsel %vm2026_vm10, %v2014_v2, %v2068_v25  ;;  %v7228_v33 = vrot.slane %v2537_v13, 9  ;;  %v2540_v12 = vld [vmem:[#allocation2 + $0x30] sm:$0xe]  ;;  %v9551_v25 = vld [vmem:[#allocation2 + $0x3c] sm:$0x1] }
 0x1e7   : > { %2151 = vst [vmem:[#allocation2 + $0x44] sm:$0x1] %v2150_v44  ;;  %v2206_v22 = vsel %vm9479_vm9, %v2201_v63, %v2205_v7  ;;  %v2575_v10 = vrot.slane %v9486_v27, 5  ;;  %v2084_v35 = vpack.c.b16 %v2069_v19, %v2069_v19  ;;  %v2208_v43 = vshrl.u32 %v9495_v51, 16  ;;  %v8593_v16 = vld [vmem:[%s10560_s2 + $0x70] sm:$0xff]  }
 0x1e8   : > { %v7201_v38 = vcombine.low %v2192_v30, %v2206_v22  ;;  %v2572_v42 = vsel %vm9398_vm12, %v7227_v46, %v2571_v6  ;;  %v2211_v15 = vshll.u32 %v9495_v51, 16  ;;  %v2222_v50 = vshrl.u32 %v9502_v40, 16  ;;  %v9549_v30 = vld [vmem:[#allocation2 + $0x30] sm:$0xf] }
 0x1e9   : > { %v2576_v28 = vsel %vm9398_vm12, %v7228_v33, %v2575_v10  ;;  %v2225_v3 = vshll.u32 %v9502_v40, 16  ;;  %v2147_v37 = vsel %vm9059_vm4, %v2084_v35, %v2146_v32  ;;  %v2210_v54 = vrot.slane %v2208_v43, 4  ;;  %v2541_v32 = vld [vmem:[#allocation2 + $0x38] sm:$0xe]  ;;  %v8595_v10 = vld [vmem:[%s10560_s2 + $0x8] sm:$0xff]  }
 0x1ea   : > { %8028 = vmatprep.mubr.msk.bf16.mxu0 %vm785_vm7, %v7201_v38  ;;  %v7242_v55 = vcombine.low %v2572_v42, %v2576_v28  ;;  %v7229_v57 = vrot.slane %v2538_v9, 9  ;;  %2148 = vst [vmem:[#allocation2 + $0x40] sm:$0xf] %v2147_v37  ;;  %v2213_v61 = vrot.slane %v2211_v15, 5  ;;  %v2224_v62 = vrot.slane %v2222_v50, 4 }
 0x1eb   : > { %v2227_v7 = vrot.slane %v2225_v3, 5  ;;  %v2579_v1 = vrot.slane %v9504_v18, 5  ;;  %v7230_v29 = vrot.slane %v2539_v4, 9  ;;  %v2583_v39 = vrot.slane %v9513_v24, 5  ;;  %v9564_v9 = vld [vmem:[#allocation2 + $0x38] sm:$0xf] }
 0x1ec   : > { %8061 = vmatmul.mubr.msk.bf16.vlgmr.msra.gmra.mrb[0].mxu1 %vm785_vm7, %v7242_v55  ;;  %v2236_v56 = vshrl.u32 %v9515_v49, 16  ;;  %v2239_v0 = vshll.u32 %v9515_v49, 16  ;;  %v2214_v53 = vor.u32 %v2213_v61, %v2210_v54  ;;  %v2245_v14 = vshll.u32 %v9504_v18, 16  ;;  %v2869_v54 = vld [vmem:[#allocation2 + $0x8] sm:$0xf] }
 0x1ed   : > { %v2228_v8 = vor.u32 %v2227_v7, %v2224_v62  ;;  %v2580_v27 = vsel %vm9398_vm12, %v7229_v57, %v2579_v1  ;;  %8069 = vmatpush3.bf16.msra.mxu1 %v8714_v36  ;;  %v2584_v31 = vsel %vm9398_vm12, %v7230_v29, %v2583_v39  ;;  %v2250_v2 = vshrl.u32 %v9529_v5, 16  ;;  %v8715_v57 = vld [vmem:[%s10560_s2] sm:$0xff]   ;;  %v8594_v39 = vld [vmem:[#allocation2 + $0x8] ss:$8 sps:$4 sm:$0xff]  }
 0x1ee   : > { %v2238_v52 = vrot.slane %v2236_v56, 4  ;;  %v2241_v23 = vrot.slane %v2239_v0, 5  ;;  %8070 = vmatprep.subr.bf16.mxu1 %v8591_v60  ;;  %v2233_v13 = vrot.slane %v2231_v34, 5  ;;  %v2215_v17 = vrot.slane %v2214_v53, 4  ;;  %v8597_v53 = vld [vmem:[%s10560_s2 + $0x10] sm:$0xff]   ;;  %v8599_v36 = vld [vmem:[%s10560_s2 + $0x80] sm:$0xff]  }
 0x1ef   : > { %v2229_v63 = vrot.slane %v2228_v8, 4  ;;  %v7243_v46 = vcombine.low %v2580_v27, %v2584_v31  ;;  %v2252_v6 = vrot.slane %v2250_v2, 4  ;;  %v2253_v18 = vshll.u32 %v9529_v5, 16 }
 0x1f0   : > { %v2242_v44 = vor.u32 %v2241_v23, %v2238_v52  ;;  %v2259_v19 = vshll.u32 %v9513_v24, 16  ;;  %v2220_v22 = vsel %vm9479_vm9, %v2215_v17, %v9500_v26  ;;  %v7231_v34 = vrot.slane %v2540_v12, 9  ;;  %v8596_v26 = vld [vmem:[%s10560_s2 + $0x78] sm:$0xff]   ;;  %v2871_v12 = vld [vmem:[#allocation2 + $0x10] sm:$0xf] }
 0x1f1   : > { %v2234_v33 = vsel %vm9479_vm9, %v2229_v63, %v2233_v13  ;;  %8064 = vmatprep.mubr.msk.bf16.mxu1 %vm785_vm7, %v7243_v46  ;;  %8071 = vmatpush3.bf16.msra.mxu1 %v8591_v60  ;;  %v2247_v38 = vrot.slane %v2245_v14, 5  ;;  %v2255_v42 = vrot.slane %v2253_v18, 5  ;;  %v2587_v43 = vrot.slane %v9541_v11, 5  ;;  %v9597_v13 = vld [vmem:[#allocation2 + $0xc] sm:$0x1] }
 0x1f2   : > { %v7202_v35 = vcombine.low %v2220_v22, %v2234_v33  ;;  %8072 = vmatprep.subr.bf16.mxu1 %v8593_v16  ;;  %v2243_v24 = vrot.slane %v2242_v44, 4  ;;  %v7232_v28 = vrot.slane %v2541_v32, 9  ;;  %v2591_v15 = vrot.slane %v9551_v25, 5  ;;  %v2873_v33 = vld [vmem:[#allocation2 + $0x18] sm:$0xf] }
 0x1f3   : > { %v2264_v50 = vshrl.u32 %v9549_v30, 16  ;;  %v2256_v3 = vor.u32 %v2255_v42, %v2252_v6  ;;  %v2261_v4 = vrot.slane %v2259_v19, 5  ;;  %v2588_v37 = vsel %vm9398_vm12, %v7231_v34, %v2587_v43 }
 0x1f4   : > { %8029 = vmatmul.mubr.msk.bf16.vlgmr.msra.gmra.mrb[32].mxu0 %vm785_vm7, %v7202_v35  ;;  %v2267_v55 = vshll.u32 %v9549_v30, 16  ;;  %v2592_v60 = vsel %vm9398_vm12, %v7232_v28, %v2591_v15  ;;  %v2278_v62 = vshrl.u32 %v9564_v9, 16  ;;  %v2281_v7 = vshll.u32 %v9564_v9, 16  ;;  %v8600_v15 = vld [vmem:[#allocation2 + $0x18] ss:$8 sps:$4 sm:$0xff]  }
 0x1f5   : > { %8037 = vmatpush3.bf16.msra.mxu0 %v8715_v57  ;;  %8073 = vmatpush3.bf16.msra.mxu1 %v8593_v16  ;;  %v2266_v61 = vrot.slane %v2264_v50, 4  ;;  %v2257_v1 = vrot.slane %v2256_v3, 4  ;;  %v7244_v29 = vcombine.low %v2588_v37, %v2592_v60  ;;  %v2273_v0 = vshll.u32 %v9541_v11, 16  ;;  %v2877_v57 = vld [vmem:[#allocation2 + $0x28] sm:$0xf] }
 0x1f6   : > { %8038 = vmatprep.subr.bf16.mxu0 %v8595_v10  ;;  %8074 = vmatprep.subr.bf16.mxu1 %v8596_v26  ;;  %v2269_v56 = vrot.slane %v2267_v55, 5  ;;  %v2280_v8 = vrot.slane %v2278_v62, 4  ;;  %v2283_v27 = vrot.slane %v2281_v7, 5  ;;  %v2287_v14 = vshll.u32 %v9551_v25, 16  ;;  %v8602_v25 = vld [vmem:[%s10560_s2 + $0x18] sm:$0xff]  }
 0x1f7   : > { %v2248_v31 = vsel %vm9479_vm9, %v2243_v24, %v2247_v38  ;;  %v2262_v52 = vsel %vm9479_vm9, %v2257_v1, %v2261_v4  ;;  %8065 = vmatmul.mubr.msk.bf16.gmra.mrb[4].mxu1 %vm785_vm7, %v7244_v29  ;;  %v2886_v23 = vshrl.u32 %v2869_v54, 16  ;;  %v2889_v17 = vshll.u32 %v2869_v54, 16  ;;  %v2875_v38 = vld [vmem:[#allocation2 + $0x20] sm:$0xf]  ;;  %v8601_v60 = vld [vmem:[#allocation2 + $0x28] ss:$8 sps:$4 sm:$0xff]  }
 0x1f8   : > { %v2270_v11 = vor.u32 %v2269_v56, %v2266_v61  ;;  %v7203_v2 = vcombine.low %v2248_v31, %v2262_v52  ;;  %8076 = vmatprep.mubr.msk.bf16.mxu1 %vm785_vm7, %v8594_v39  ;;  %v2284_v16 = vor.u32 %v2283_v27, %v2280_v8  ;;  %v2275_v46 = vrot.slane %v2273_v0, 5  ;;  %v2879_v7 = vld [vmem:[#allocation2 + $0x30] sm:$0xf]  ;;  %v9619_v29 = vld [vmem:[#allocation2 + $0x24] sm:$0x1] }
 0x1f9   : > { %8039 = vmatpush3.bf16.msra.mxu0 %v8595_v10  ;;  %8075 = vmatpush3.bf16.msra.mxu1 %v8596_v26  ;;  %v2888_v44 = vrot.slane %v2886_v23, 4  ;;  %v2900_v6 = vshrl.u32 %v2871_v12, 16  ;;  %v2289_v19 = vrot.slane %v2287_v14, 5  ;;  %v2891_v32 = vrot.slane %v2889_v17, 5  ;;  %v9605_v10 = vld [vmem:[#allocation2 + $0x14] sm:$0x1] }
 0x1fa   : > { %v2271_v63 = vrot.slane %v2270_v11, 4  ;;  %8040 = vmatprep.subr.bf16.mxu0 %v8597_v53  ;;  %8032 = vmatprep.mubr.msk.bf16.mxu0 %vm785_vm7, %v7203_v2  ;;  %v2285_v18 = vrot.slane %v2284_v16, 4  ;;  %v2903_v22 = vshll.u32 %v2871_v12, 16  ;;  %v7213_v34 = vcombine.low %v9432_v47, %v9442_v20  ;;  %v8603_v20 = vld [vmem:[%s10560_s2 + $0x88] sm:$0xff]   ;;  %v9627_v27 = vld [vmem:[#allocation2 + $0x1c] sm:$0x1] }
 0x1fb   : > { %8084 = vmatprep.subr.bf16.mxu1 %v8599_v36  ;;  %v2902_v35 = vrot.slane %v2900_v6, 4  ;;  %v2895_v26 = vshll.u32 %v9597_v13, 16  ;;  %v2892_v50 = vor.u32 %v2891_v32, %v2888_v44  ;;  %v2914_v3 = vshrl.u32 %v2873_v33, 16  ;;  %v2881_v23 = vld [vmem:[#allocation2 + $0x38] sm:$0xf] }
 0x1fc   : > { %v2276_v42 = vsel %vm9479_vm9, %v2271_v63, %v2275_v46  ;;  %v2290_v43 = vsel %vm9479_vm9, %v2285_v18, %v2289_v19  ;;  %v2905_v24 = vrot.slane %v2903_v22, 5  ;;  %v2917_v47 = vshll.u32 %v2873_v33, 16  ;;  %v9630_v17 = vld [vmem:[#allocation2 + $0x34] sm:$0x1]  ;;  %v9639_v44 = vld [vmem:[#allocation2 + $0x2c] sm:$0x1] }
 0x1fd   : > { %8041 = vmatpush3.bf16.msra.mxu0 %v8597_v53  ;;  %v7204_v28 = vcombine.low %v2276_v42, %v2290_v43  ;;  %v2909_v37 = vshll.u32 %v9605_v10, 16  ;;  %v2928_v55 = vshrl.u32 %v2875_v38, 16  ;;  %v2931_v54 = vshll.u32 %v2875_v38, 16  ;;  %v8606_v53 = vld [vmem:[%s10560_s2 + $0x90] sm:$0xff]   ;;  %v8607_v19 = vld [vmem:[#allocation2 + $0x38] ss:$8 sps:$4 sm:$0xff]  }
 0x1fe   : > { %8042 = vmatprep.subr.bf16.mxu0 %v8602_v25  ;;  %v2906_v4 = vor.u32 %v2905_v24, %v2902_v35  ;;  %v2916_v61 = vrot.slane %v2914_v3, 4  ;;  %v2919_v62 = vrot.slane %v2917_v47, 5  ;;  %v7214_v0 = vcombine.low %v9495_v51, %v9502_v40 }
 0x1ff   : > { %8033 = vmatmul.mubr.msk.bf16.gmra.mrb[36].mxu0 %vm785_vm7, %v7204_v28  ;;  %8077 = vmatmul.mubr.msk.bf16.vlgmr.msra.gmra.mrb[0].mxu1 %vm785_vm7, %v8600_v15  ;;  %v2930_v39 = vrot.slane %v2928_v55, 4  ;;  %v2933_v56 = vrot.slane %v2931_v54, 5  ;;  %v2893_v8 = vrot.slane %v2892_v50, 4  ;;  %v2942_v14 = vshrl.u32 %v2877_v57, 16  ;;  %v9653_v55 = vld [vmem:[#allocation2 + $0x44] sm:$0x1] }
 0x200   : > { %8044 = vmatprep.mubr.msk.bf16.mxu0 %vm785_vm7, %v7213_v34  ;;  %8085 = vmatpush3.bf16.msra.mxu1 %v8599_v36  ;;  %v2907_v1 = vrot.slane %v2906_v4, 4  ;;  %v2945_v36 = vshll.u32 %v2877_v57, 16  ;;  %v2897_v12 = vrot.slane %v2895_v26, 5  ;;  %v2911_v31 = vrot.slane %v2909_v37, 5 }
 0x201   : > { %8080 = vmatprep.mubr.msk.bf16.mxu1 %vm785_vm7, %v8601_v60  ;;  %8043 = vmatpush3.bf16.msra.mxu0 %v8602_v25  ;;  %v2934_v52 = vor.u32 %v2933_v56, %v2930_v39  ;;  %v2956_v11 = vshrl.u32 %v2879_v7, 16  ;;  %v2920_v2 = vor.u32 %v2919_v62, %v2916_v61  ;;  %v2937_v16 = vshll.u32 %v9619_v29, 16  ;;  %v8608_v25 = vld [vmem:[%s10560_s2 + $0x98] sm:$0xff]  }
 0x202   : > { %8086 = vmatprep.subr.bf16.mxu1 %v8603_v20  ;;  %v2944_v51 = vrot.slane %v2942_v14, 4  ;;  %v2947_v40 = vrot.slane %v2945_v36, 5  ;;  %v7215_v63 = vcombine.low %v9515_v49, %v9529_v5  ;;  %v2912_v46 = vsel %vm9479_vm9, %v2907_v1, %v2911_v31  ;;  %v2883_v49 = vld [vmem:[#allocation2 + $0x40] sm:$0xf]  ;;  %v9657_v1 = vld [vmem:[#allocation2 + $0x3c] sm:$0x1] }
 0x203   : > { %v2958_v6 = vrot.slane %v2956_v11, 4  ;;  %v2959_v18 = vshll.u32 %v2879_v7, 16  ;;  %v2898_v32 = vsel %vm9479_vm9, %v2893_v8, %v2897_v12  ;;  %v2923_v22 = vshll.u32 %v9627_v27, 16  ;;  %v3128_v14 = vld [vmem:[#allocation2 + $0x10] sm:$0xe] }
 0x204   : > { %8087 = vmatpush3.bf16.msra.mxu1 %v8603_v20  ;;  %v2948_v33 = vor.u32 %v2947_v40, %v2944_v51  ;;  %v2970_v5 = vshrl.u32 %v2881_v23, 16  ;;  %v2935_v34 = vrot.slane %v2934_v52, 4  ;;  %v2965_v38 = vshll.u32 %v9630_v17, 16  ;;  %v8610_v20 = vld [vmem:[%s10560_s2 + $0xa0] sm:$0xff]   ;;  %v8611_v52 = vld [vmem:[%s10560_s2 + $0xa8] sm:$0xff]  }
 0x205   : > { %8088 = vmatprep.subr.bf16.mxu1 %v8606_v53  ;;  %v2961_v35 = vrot.slane %v2959_v18, 5  ;;  %v2973_v42 = vshll.u32 %v2881_v23, 16  ;;  %v7281_v43 = vcombine.low %v2898_v32, %v2912_v46  ;;  %v2921_v26 = vrot.slane %v2920_v2, 4 }
 0x206   : > { %v2939_v24 = vrot.slane %v2937_v16, 5  ;;  %v2951_v28 = vshll.u32 %v9639_v44, 16  ;;  %v2972_v50 = vrot.slane %v2970_v5, 4  ;;  %v2984_v47 = vshrl.u32 %v2883_v49, 16  ;;  %v3127_v16 = vld [vmem:[#allocation2 + $0x8] sm:$0xe] }
 0x207   : > { %8045 = vmatmul.mubr.msk.bf16.vlgmr.msra.gmra.mrb[32].mxu0 %vm785_vm7, %v7214_v0  ;;  %8081 = vmatmul.mubr.msk.bf16.gmra.mrb[4].mxu1 %vm785_vm7, %v8607_v19  ;;  %v2962_v15 = vor.u32 %v2961_v35, %v2958_v6  ;;  %v2975_v3 = vrot.slane %v2973_v42, 5  ;;  %v2925_v4 = vrot.slane %v2923_v22, 5  ;;  %v2949_v37 = vrot.slane %v2948_v33, 4  ;;  %v3130_v22 = vld [vmem:[#allocation2 + $0x20] sm:$0xe] }
 0x208   : > { %8048 = vmatprep.mubr.msk.bf16.mxu0 %vm785_vm7, %v7215_v63  ;;  %8089 = vmatpush3.bf16.msra.mxu1 %v8606_v53  ;;  %v2987_v54 = vshll.u32 %v2883_v49, 16  ;;  %v2940_v57 = vsel %vm9479_vm9, %v2935_v34, %v2939_v24  ;;  %v2967_v61 = vrot.slane %v2965_v38, 5  ;;  %v2986_v62 = vrot.slane %v2984_v47, 4  ;;  %v8612_v63 = vld [vmem:[%s10560_s2 + $0xb0] sm:$0xff]   ;;  %v8613_v34 = vld [vmem:[%s10560_s2 + $0xb8] sm:$0xff]  }
 0x209   : > { %8092 = vmatprep.mubr.msk.bf16.mxu1 %vm785_vm7, %v7281_v43  ;;  %8090 = vmatprep.subr.bf16.mxu1 %v8608_v25  ;;  %v2963_v60 = vrot.slane %v2962_v15, 4  ;;  %v2953_v7 = vrot.slane %v2951_v28, 5  ;;  %v2926_v56 = vsel %vm9479_vm9, %v2921_v26, %v2925_v4  ;;  %v2976_v53 = vor.u32 %v2975_v3, %v2972_v50  ;;  %v3132_v49 = vld [vmem:[#allocation2 + $0x30] sm:$0xe]  ;;  %v3129_v35 = vld [vmem:[#allocation2 + $0x18] sm:$0xe] }
 0x20a   : > { %v2989_v39 = vrot.slane %v2987_v54, 5  ;;  %v2993_v8 = vshll.u32 %v9653_v55, 16  ;;  %v7216_v36 = vcombine.low %v9549_v30, %v9564_v9  ;;  %v7282_v12 = vcombine.low %v2926_v56, %v2940_v57  ;;  %v3131_v42 = vld [vmem:[#allocation2 + $0x28] sm:$0xe]  ;;  %v8614_v28 = vld [vmem:[%s10560_s2 + $0xc0] sm:$0xff]  }
 0x20b   : > { %v2968_v0 = vsel %vm9479_vm9, %v2963_v60, %v2967_v61  ;;  %v2954_v31 = vsel %vm9479_vm9, %v2949_v37, %v2953_v7  ;;  %v2979_v2 = vshll.u32 %v9657_v1, 16  ;;  %v7294_v30 = vrot.slane %v3128_v14, 9  ;;  %v3134_v37 = vld [vmem:[#allocation2 + $0x40] sm:$0xe]  ;;  %v3133_v54 = vld [vmem:[#allocation2 + $0x38] sm:$0xe] }
 0x20c   : > { %8091 = vmatpush3.bf16.msra.mxu1 %v8608_v25  ;;  %v2990_v11 = vor.u32 %v2989_v39, %v2986_v62  ;;  %v7283_v23 = vcombine.low %v2954_v31, %v2968_v0  ;;  %v2977_v9 = vrot.slane %v2976_v53, 4  ;;  %v2995_v40 = vrot.slane %v2993_v8, 5  ;;  %v3462_v60 = vld [vmem:[#allocation2 + $0x18] sm:$0xf]  ;;  %v8616_v0 = vld [vmem:[%s10560_s2 + $0xd0] sm:$0xff]  }
 0x20d   : > { %8100 = vmatprep.subr.bf16.mxu1 %v8610_v20  ;;  %v7293_v46 = vrot.slane %v3127_v16, 9  ;;  %v3157_v25 = vrot.slane %v9605_v10, 5  ;;  %v2981_v6 = vrot.slane %v2979_v2, 5  ;;  %v3153_v19 = vrot.slane %v9597_v13, 5  ;;  %v3460_v8 = vld [vmem:[#allocation2 + $0x10] sm:$0xf] }
 0x20e   : > { %v2991_v51 = vrot.slane %v2990_v11, 4  ;;  %v7296_v38 = vrot.slane %v3130_v22, 9  ;;  %v7298_v43 = vrot.slane %v3132_v49, 9  ;;  %v7295_v26 = vrot.slane %v3129_v35, 9  ;;  %v8617_v2 = vld [vmem:[#allocation2 + $0x10] ss:$8 sps:$4 sm:$0xff]  }
 0x20f   : > { %8049 = vmatmul.mubr.msk.bf16.gmra.mrb[36].mxu0 %vm785_vm7, %v7216_v36  ;;  %8093 = vmatmul.mubr.msk.bf16.vlgmr.msra.gmra.mrb[0].mxu1 %vm785_vm7, %v7282_v12  ;;  %v3158_v32 = vsel %vm9398_vm12, %v7294_v30, %v3157_v25  ;;  %v2982_v33 = vsel %vm9479_vm9, %v2977_v9, %v2981_v6  ;;  %v3154_v10 = vsel %vm9398_vm12, %v7293_v46, %v3153_v19  ;;  %v3165_v24 = vrot.slane %v9619_v29, 5  ;;  %v9726_v16 = vld [vmem:[#allocation2 + $0x14] sm:$0x1]  ;;  %v8619_v46 = vld [vmem:[%s10560_s2 + $0xe0] sm:$0xff]   ;;  %v3468_v19 = vld [vmem:[#allocation2 + $0x30] sm:$0xf] }
 0x210   : > { %8101 = vmatpush3.bf16.msra.mxu1 %v8610_v20  ;;  %8096 = vmatprep.mubr.msk.bf16.mxu1 %vm785_vm7, %v7283_v23  ;;  %v2996_v18 = vsel %vm9479_vm9, %v2991_v51, %v2995_v40  ;;  %v7309_v13 = vcombine.low %v3154_v10, %v3158_v32  ;;  %v7297_v15 = vrot.slane %v3131_v42, 9  ;;  %v3173_v50 = vrot.slane %v9630_v17, 5  ;;  %v8618_v23 = vld [vmem:[%s10560_s2 + $0xd8] sm:$0xff]   ;;  %v3464_v25 = vld [vmem:[#allocation2 + $0x20] sm:$0xf] }
 0x211   : > { %8102 = vmatprep.subr.bf16.mxu1 %v8611_v52  ;;  %v7284_v5 = vcombine.low %v2982_v33, %v2996_v18  ;;  %v3161_v3 = vrot.slane %v9627_v27, 5  ;;  %v3166_v47 = vsel %vm9398_vm12, %v7296_v38, %v3165_v24  ;;  %v3169_v20 = vrot.slane %v9639_v44, 5  ;;  %v8615_v27 = vld [vmem:[%s10560_s2 + $0xc8] sm:$0xff]   ;;  %v9729_v51 = vld [vmem:[#allocation2 + $0x1c] sm:$0x1] }
 0x212   : > { %v3174_v4 = vsel %vm9398_vm12, %v7298_v43, %v3173_v50  ;;  %v7300_v61 = vrot.slane %v3134_v37, 9  ;;  %v7299_v62 = vrot.slane %v3133_v54, 9  ;;  %v3181_v7 = vrot.slane %v9653_v55, 5  ;;  %v8622_v38 = vld [vmem:[%s10560_s2 + $0xe8] sm:$0xff]  }
 0x213   : > { %v3162_v29 = vsel %vm9398_vm12, %v7295_v26, %v3161_v3  ;;  %v3170_v17 = vsel %vm9398_vm12, %v7297_v15, %v3169_v20  ;;  %v3491_v39 = vshrl.u32 %v3462_v60, 16  ;;  %v3494_v56 = vshll.u32 %v3462_v60, 16  ;;  %v3474_v15 = vld [vmem:[#allocation2 + $0x48] sm:$0xf]  ;;  %v3472_v20 = vld [vmem:[#allocation2 + $0x40] sm:$0xf] }
 0x214   : > { %8103 = vmatpush3.bf16.msra.mxu1 %v8611_v52  ;;  %v7310_v57 = vcombine.low %v3162_v29, %v3166_v47  ;;  %v7311_v44 = vcombine.low %v3170_v17, %v3174_v4  ;;  %v3177_v53 = vrot.slane %v9657_v1, 5  ;;  %v3182_v14 = vsel %vm9398_vm12, %v7300_v61, %v3181_v7  ;;  %v3466_v1 = vld [vmem:[#allocation2 + $0x28] sm:$0xf]  ;;  %v9741_v29 = vld [vmem:[#allocation2 + $0x24] sm:$0x1]  ;;  %v8623_v17 = vld [vmem:[%s10560_s2 + $0xf0] sm:$0xff]  }
 0x215   : > { %8104 = vmatprep.subr.bf16.mxu1 %v8612_v63  ;;  %v3477_v12 = vshrl.u32 %v3460_v8, 16  ;;  %v3480_v31 = vshll.u32 %v3460_v8, 16  ;;  %v3493_v55 = vrot.slane %v3491_v39, 4  ;;  %v3496_v52 = vrot.slane %v3494_v56, 5  ;;  %v9748_v60 = vld [vmem:[#allocation2 + $0x2c] sm:$0x1] }
 0x216   : > { %v3178_v36 = vsel %vm9398_vm12, %v7299_v62, %v3177_v53  ;;  %v3519_v6 = vshrl.u32 %v3466_v1, 16  ;;  %v3522_v18 = vshll.u32 %v3466_v1, 16  ;;  %v3486_v32 = vshll.u32 %v9726_v16, 16  ;;  %v9750_v7 = vld [vmem:[#allocation2 + $0x3c] sm:$0x1] }
 0x217   : > { %8097 = vmatmul.mubr.msk.bf16.gmra.mrb[4].mxu1 %vm785_vm7, %v7284_v5  ;;  %v7312_v11 = vcombine.low %v3178_v36, %v3182_v14  ;;  %v3479_v30 = vrot.slane %v3477_v12, 4  ;;  %v3482_v9 = vrot.slane %v3480_v31, 5  ;;  %v3497_v40 = vor.u32 %v3496_v52, %v3493_v55  ;;  %v8620_v5 = vld [vmem:[#allocation2 + $0x20] ss:$8 sps:$4 sm:$0xff]   ;;  %v9756_v55 = vld [vmem:[#allocation2 + $0x34] sm:$0x1] }
 0x218   : > { %8105 = vmatpush3.bf16.msra.mxu1 %v8612_v63  ;;  %8108 = vmatprep.mubr.msk.bf16.mxu1 %vm785_vm7, %v7309_v13  ;;  %v3470_v63 = vld [vmem:[#allocation2 + $0x38] sm:$0xf]  ;;  %v3500_v22 = vshll.u32 %v9729_v51, 16  ;;  %v3505_v35 = vshrl.u32 %v3464_v25, 16  ;;  %v3508_v13 = vshll.u32 %v3464_v25, 16  ;;  %v3521_v42 = vrot.slane %v3519_v6, 4 }
 0x219   : > { %8106 = vmatprep.subr.bf16.mxu1 %v8613_v34  ;;  %v3547_v33 = vshrl.u32 %v3470_v63, 16  ;;  %v3550_v49 = vshll.u32 %v3470_v63, 16  ;;  %v3483_v10 = vor.u32 %v3482_v9, %v3479_v30  ;;  %v3524_v43 = vrot.slane %v3522_v18, 5  ;;  %v8624_v52 = vld [vmem:[#allocation2 + $0x40] ss:$8 sps:$4 sm:$0xff]  }
 0x21a   : > { %v3533_v26 = vshrl.u32 %v3468_v19, 16  ;;  %v3536_v24 = vshll.u32 %v3468_v19, 16  ;;  %v3502_v50 = vrot.slane %v3500_v22, 5  ;;  %v3488_v37 = vrot.slane %v3486_v32, 5  ;;  %v9765_v32 = vld [vmem:[#allocation2 + $0x4c] sm:$0x1] }
 0x21b   : > { %v3549_v3 = vrot.slane %v3547_v33, 4  ;;  %v3552_v47 = vrot.slane %v3550_v49, 5  ;;  %v3484_v4 = vrot.slane %v3483_v10, 4  ;;  %v3507_v54 = vrot.slane %v3505_v35, 4  ;;  %v8626_v22 = vld [vmem:[%s10560_s2 + $0x100] sm:$0xff]  }
 0x21c   : > { %8107 = vmatpush3.bf16.msra.mxu1 %v8613_v34  ;;  %v3498_v34 = vrot.slane %v3497_v40, 4  ;;  %v3535_v61 = vrot.slane %v3533_v26, 4  ;;  %v3538_v62 = vrot.slane %v3536_v24, 5  ;;  %v3561_v39 = vshrl.u32 %v3472_v20, 16  ;;  %v9770_v10 = vld [vmem:[#allocation2 + $0x44] sm:$0x1] }
 0x21d   : > { %8116 = vmatprep.subr.bf16.mxu1 %v8614_v28  ;;  %v3564_v56 = vshll.u32 %v3472_v20, 16  ;;  %v3578_v53 = vshll.u32 %v3474_v15, 16  ;;  %v3553_v8 = vor.u32 %v3552_v47, %v3549_v3  ;;  %v3489_v14 = vsel %vm9479_vm9, %v3484_v4, %v3488_v37  ;;  %v8627_v3 = vld [vmem:[%s10560_s2 + $0x108] sm:$0xff]  }
 0x21e   : > { %v3514_v12 = vshll.u32 %v9741_v29, 16  ;;  %v3528_v31 = vshll.u32 %v9748_v60, 16  ;;  %v3539_v1 = vor.u32 %v3538_v62, %v3535_v61  ;;  %v3556_v30 = vshll.u32 %v9750_v7, 16 }
 0x21f   : > { %8109 = vmatmul.mubr.msk.bf16.vlgmr.msra.gmra.mrb[0].mxu1 %vm785_vm7, %v7310_v57  ;;  %v3510_v57 = vrot.slane %v3508_v13, 5  ;;  %v3563_v9 = vrot.slane %v3561_v39, 4  ;;  %v3566_v40 = vrot.slane %v3564_v56, 5  ;;  %v3542_v25 = vshll.u32 %v9756_v55, 16 }
 0x220   : > { %8117 = vmatpush3.bf16.msra.mxu1 %v8614_v28  ;;  %8112 = vmatprep.mubr.msk.bf16.mxu1 %vm785_vm7, %v7311_v44  ;;  %v8621_v28 = vld [vmem:[#allocation2 + $0x30] ss:$8 sps:$4 sm:$0xff]   ;;  %v3525_v44 = vor.u32 %v3524_v43, %v3521_v42  ;;  %v3554_v6 = vrot.slane %v3553_v8, 4  ;;  %v3530_v19 = vrot.slane %v3528_v31, 5  ;;  %v3516_v33 = vrot.slane %v3514_v12, 5 }
 0x221   : > { %8118 = vmatprep.subr.bf16.mxu1 %v8615_v27  ;;  %v3511_v36 = vor.u32 %v3510_v57, %v3507_v54  ;;  %v3540_v49 = vrot.slane %v3539_v1, 4  ;;  %v3567_v35 = vor.u32 %v3566_v40, %v3563_v9  ;;  %v3544_v42 = vrot.slane %v3542_v25, 5  ;;  %v3718_v54 = vld [vmem:[#allocation2 + $0x10] sm:$0xe]  ;;  %v3723_v8 = vld [vmem:[#allocation2 + $0x38] sm:$0xe] }
 0x222   : > { %v3570_v24 = vshll.u32 %v9770_v10, 16  ;;  %v3748_v61 = vrot.slane %v9729_v51, 5  ;;  %v3744_v56 = vrot.slane %v9726_v16, 5  ;;  %v8629_v51 = vld [vmem:[%s10560_s2 + $0x118] sm:$0xff]   ;;  %v3720_v12 = vld [vmem:[#allocation2 + $0x20] sm:$0xe] }
 0x223   : > { %v3512_v18 = vrot.slane %v3511_v36, 4  ;;  %v3568_v20 = vrot.slane %v3567_v35, 4  ;;  %v7366_v16 = vrot.slane %v3723_v8, 9  ;;  %v3764_v1 = vrot.slane %v9750_v7, 5  ;;  %v3725_v25 = vld [vmem:[#allocation2 + $0x48] sm:$0xe] }
 0x224   : > { %8119 = vmatpush3.bf16.msra.mxu1 %v8615_v27  ;;  %v3503_v27 = vsel %vm9479_vm9, %v3498_v34, %v3502_v50  ;;  %v3545_v50 = vsel %vm9479_vm9, %v3540_v49, %v3544_v42  ;;  %v3760_v40 = vrot.slane %v9756_v55, 5  ;;  %v3768_v55 = vrot.slane %v9770_v10, 5  ;;  %v7389_v8 = vld [vmem:[%s10561_s3 + $0x1] ss:$0 sm:$0xff] }
 0x225   : > { %8120 = vmatprep.subr.bf16.mxu1 %v8616_v0  ;;  %v3517_v26 = vsel %vm9479_vm9, %v3512_v18, %v3516_v33  ;;  %vm4166_vm4 = vcmask 518144   ;;  %vm4183_vm6 = vcmask 518146   ;;  %vm4184_vm10 = vsmask.f32 7946 }
 0x226   : > { %4167 = vst.msk [vmem:[#allocation3] sm:$0x7] %vm4166_vm4, %v8787_v45  ;;  %4169 = vst.msk [vmem:[#allocation3 + $0x14] sm:$0x7] %vm4166_vm4, %v8787_v45 }
 0x227   : > { %8113 = vmatmul.mubr.msk.bf16.gmra.mrb[4].mxu1 %vm785_vm7, %v7312_v11  ;;  %v7349_v11 = vcombine.low %v3489_v14, %v3503_v27  ;;  %v8628_v27 = vld [vmem:[%s10560_s2 + $0x110] sm:$0xff]   ;;  %vm9832_vm0 = vmand %vm4183_vm6, %vm4184_vm10  ;;  %vm4299_vm6 = vsmask.f32 2306 }
 0x228   : > { %8121 = vmatpush3.bf16.msra.mxu1 %v8616_v0  ;;  %8124 = vmatprep.mubr.msk.bf16.mxu1 %vm785_vm7, %v8617_v2  ;;  %v3575_v0 = vshrl.u32 %v3474_v15, 16  ;;  %v3526_v2 = vrot.slane %v3525_v44, 4  ;;  %v7361_v44 = vrot.slane %v3718_v54, 9  ;;  %v4190_v35 = vsel %vm9832_vm0, 0, %v4189_v59 }
 0x229   : > { %8122 = vmatprep.subr.bf16.mxu1 %v8618_v23  ;;  %4191 = vst [vmem:[#allocation3 + $0x8] sm:$0x4] %v4190_v35 }
 0x22a   : > { %v3577_v63 = vrot.slane %v3575_v0, 4  ;;  %v3531_v34 = vsel %vm9479_vm9, %v3526_v2, %v3530_v19  ;;  %v3745_v36 = vsel %vm9398_vm12, %v7361_v44, %v3744_v56  ;;  %v7368_v19 = vrot.slane %v3725_v25, 9  ;;  %v8632_v56 = vld [vmem:[%s10560_s2 + $0x150] sm:$0xff]  }
 0x22b   : > { %v7350_v15 = vcombine.low %v3517_v26, %v3531_v34  ;;  %v4174_v34 = vld [vmem:[#allocation3 + $0x8] sm:$0x1] }
 0x22c   : > { %8123 = vmatpush3.bf16.msra.mxu1 %v8618_v23  ;;  %v8625_v23 = vld [vmem:[%s10560_s2 + $0xf8] sm:$0xff]  }
 0x22d   : > { %8132 = vmatprep.subr.bf16.mxu1 %v8619_v46 }
 0x22f   : > { %8125 = vmatmul.mubr.msk.bf16.vlgmr.msra.gmra.mrb[0].mxu1 %vm785_vm7, %v8620_v5  ;;  %v3558_v5 = vrot.slane %v3556_v30, 5  ;;  %v3752_v30 = vrot.slane %v9741_v29, 5 }
 0x230   : > { %8133 = vmatpush3.bf16.msra.mxu1 %v8619_v46  ;;  %8128 = vmatprep.mubr.msk.bf16.mxu1 %vm785_vm7, %v8621_v28  ;;  %v3580_v46 = vrot.slane %v3578_v53, 5  ;;  %v3719_v28 = vld [vmem:[#allocation2 + $0x18] sm:$0xe]  ;;  %v3721_v53 = vld [vmem:[#allocation2 + $0x28] sm:$0xe] }
 0x231   : > { %8134 = vmatprep.subr.bf16.mxu1 %v8622_v38  ;;  %v3559_v43 = vsel %vm9479_vm9, %v3554_v6, %v3558_v5  ;;  %v7362_v57 = vrot.slane %v3719_v28, 9  ;;  %v7364_v31 = vrot.slane %v3721_v53, 9 }
 0x232   : > { %v3581_v13 = vor.u32 %v3580_v46, %v3577_v63  ;;  %v7351_v47 = vcombine.low %v3545_v50, %v3559_v43  ;;  %v3765_v63 = vsel %vm9398_vm12, %v7366_v16, %v3764_v1  ;;  %v3724_v46 = vld [vmem:[#allocation2 + $0x40] sm:$0xe] }
 0x233   : > { %v3749_v0 = vsel %vm9398_vm12, %v7362_v57, %v3748_v61  ;;  %v7367_v29 = vrot.slane %v3724_v46, 9  ;;  %v4195_v50 = vld [vmem:[#allocation3 + $0x10] sm:$0x4]  ;;  %v4177_v57 = vld [vmem:[#allocation3 + $0xc] sm:$0x1] }
 0x234   : > { %8135 = vmatpush3.bf16.msra.mxu1 %v8622_v38  ;;  %v3584_v38 = vshll.u32 %v9765_v32, 16  ;;  %v3582_v4 = vrot.slane %v3581_v13, 4  ;;  %v7377_v41 = vcombine.low %v3745_v36, %v3749_v0  ;;  %v4171_v13 = vld [vmem:[#allocation3 + $0x4] sm:$0x1]  ;;  %v8630_v61 = vld [vmem:[%s10560_s2 + $0x140] sm:$0xff]   ;;  %v8633_v0 = vld [vmem:[%s10560_s2 + $0x158] sm:$0xff]  }
 0x235   : > { %8136 = vmatprep.subr.bf16.mxu1 %v8623_v17  ;;  %v3769_v33 = vsel %vm9398_vm12, %v7367_v29, %v3768_v55  ;;  %v4172_v42 = vsel %vm8935_vm5, 0, %v4171_v13 }
 0x236   : > { %v3586_v37 = vrot.slane %v3584_v38, 5  ;;  %v4186_v38 = vld [vmem:[#allocation3 + $0x4] sm:$0x4]  ;;  %4173 = vst [vmem:[#allocation3 + $0x4] sm:$0x1] %v4172_v42 }
 0x237   : > { %8129 = vmatmul.mubr.msk.bf16.gmra.mrb[4].mxu1 %vm785_vm7, %v8624_v52  ;;  %v3722_v52 = vld [vmem:[#allocation2 + $0x30] sm:$0xe]  ;;  %v4187_v45 = vsel %vm9832_vm0, 0, %v4186_v38 }
 0x238   : > { %8137 = vmatpush3.bf16.msra.mxu1 %v8623_v17  ;;  %8140 = vmatprep.mubr.msk.bf16.mxu1 %vm785_vm7, %v7349_v11  ;;  %v3572_v17 = vrot.slane %v3570_v24, 5  ;;  %v3587_v39 = vsel %vm9479_vm9, %v3582_v4, %v3586_v37  ;;  %v7363_v11 = vrot.slane %v3720_v12, 9  ;;  %v7365_v2 = vrot.slane %v3722_v52, 9  ;;  %4188 = vst [vmem:[#allocation3 + $0x4] sm:$0x4] %v4187_v45 }
 0x239   : > { %8138 = vmatprep.subr.bf16.mxu1 %v8625_v23 }
 0x23a   : > { %v3573_v62 = vsel %vm9479_vm9, %v3568_v20, %v3572_v17  ;;  %v3761_v7 = vsel %vm9398_vm12, %v7365_v2, %v3760_v40  ;;  %v4192_v17 = vld [vmem:[#allocation3 + $0xc] sm:$0x4] }
 0x23b   : > { %v7352_v14 = vcombine.low %v3573_v62, %v3587_v39  ;;  %v7379_v18 = vcombine.low %v3761_v7, %v3765_v63  ;;  %v4193_v44 = vsel %vm9832_vm0, 0, %v4192_v17  ;;  %v8788_v62 = vmov 0.0   ;;  %v8631_v39 = vld [vmem:[%s10560_s2 + $0x148] sm:$0xff]  }
 0x23c   : > { %8139 = vmatpush3.bf16.msra.mxu1 %v8625_v23  ;;  %v3756_v23 = vrot.slane %v9748_v60, 5  ;;  %v3753_v60 = vsel %vm9398_vm12, %v7363_v11, %v3752_v30  ;;  %4194 = vst [vmem:[#allocation3 + $0xc] sm:$0x4] %v4193_v44  ;;  %8164 = vmatprep.subr.bf16.mxu0 %v8788_v62 }
 0x23d   : > { %8148 = vmatprep.subr.bf16.mxu1 %v8626_v22  ;;  %8165 = vmatpush3.bf16.msra.mxu0 %v8630_v61 }
 0x23e   : > { %v3757_v9 = vsel %vm9398_vm12, %v7364_v31, %v3756_v23  ;;  %8166 = vmatprep.subr.bf16.mxu0 %v8788_v62 }
 0x23f   : > { %8141 = vmatmul.mubr.msk.bf16.vlgmr.msra.gmra.mrb[0].mxu1 %vm785_vm7, %v7350_v15  ;;  %v7378_v6 = vcombine.low %v3753_v60, %v3757_v9  ;;  %v4180_v15 = vld [vmem:[#allocation3 + $0x10] sm:$0x1] }
 0x240   : > { %8149 = vmatpush3.bf16.msra.mxu1 %v8626_v22  ;;  %8144 = vmatprep.mubr.msk.bf16.mxu1 %vm785_vm7, %v7351_v47  ;;  %v3772_v22 = vrot.slane %v9765_v32, 5  ;;  %v4175_v32 = vsel %vm8935_vm5, 0, %v4174_v34  ;;  %v4196_v47 = vsel %vm9832_vm0, 0, %v4195_v50 }
 0x241   : > { %8150 = vmatprep.subr.bf16.mxu1 %v8627_v3  ;;  %4176 = vst [vmem:[#allocation3 + $0x8] sm:$0x1] %v4175_v32  ;;  %4197 = vst [vmem:[#allocation3 + $0x10] sm:$0x4] %v4196_v47  ;;  %8167 = vmatpush3.bf16.msra.mxu0 %v8631_v39 }
 0x242   : > { %v3773_v49 = vsel %vm9398_vm12, %v7368_v19, %v3772_v22  ;;  %vm8789_vm12 = vmmov 0   ;;  %8168 = vmatprep.subr.bf16.mxu0 %v8788_v62 }
 0x243   : > { %v7380_v5 = vcombine.low %v3769_v33, %v3773_v49  ;;  %8172 = vmatprep.mubr.msk.bf16.mxu0 %vm8789_vm12, %v8788_v62 }
 0x244   : > { %8151 = vmatpush3.bf16.msra.mxu1 %v8627_v3  ;;  %v4181_v3 = vsel %vm8935_vm5, 0, %v4180_v15 }
 0x245   : > { %8152 = vmatprep.subr.bf16.mxu1 %v8628_v27  ;;  %4182 = vst [vmem:[#allocation3 + $0x10] sm:$0x1] %v4181_v3  ;;  %8169 = vmatpush3.bf16.msra.mxu0 %v8632_v56 }
 0x246   : > { %8170 = vmatprep.subr.bf16.mxu0 %v8788_v62 }
 0x247   : > { %8145 = vmatmul.mubr.msk.bf16.gmra.mrb[4].mxu1 %vm785_vm7, %v7352_v14 }
 0x248   : > { %8153 = vmatpush3.bf16.msra.mxu1 %v8628_v27  ;;  %8156 = vmatprep.mubr.msk.bf16.mxu1 %vm785_vm7, %v7377_v41  ;;  %v4178_v27 = vsel %vm8935_vm5, 0, %v4177_v57 }
 0x249   : > { %8154 = vmatprep.subr.bf16.mxu1 %v8629_v51  ;;  %4179 = vst [vmem:[#allocation3 + $0xc] sm:$0x1] %v4178_v27  ;;  %8171 = vmatpush3.bf16.msra.mxu0 %v8633_v0 }
 0x24a   : > { %8176 = vmatprep.subr.bf16.mxu0 %v8788_v62 }
 0x24c   : > { %8155 = vmatpush3.bf16.msra.mxu1 %v8629_v51  ;;  %v9884_v51 = vld [vmem:[%s10562_s4 + $0x1] ss:$0 sm:$0xff] }
 0x24d   : > { %8272 = vmatprep.subr.bf16.mxu1 %v8788_v62 }
 0x24f   : > { %8157 = vmatmul.mubr.msk.bf16.vlgmr.msra.gmra.mrb[0].mxu1 %vm785_vm7, %v7378_v6 }
 0x250   : > { %8160 = vmatprep.mubr.msk.bf16.mxu1 %vm785_vm7, %v7379_v18 }
 0x257   : > { %8161 = vmatmul.mubr.msk.bf16.gmra.mrb[4].mxu1 %vm785_vm7, %v7380_v5 }
 0x258   : > { %8280 = vmatprep.mubr.msk.bf16.mxu1 %vm8789_vm12, %v8788_v62 }
 0x2da   : > { %v8046_v43 = vpop.f32.mrb[32].mxu0 }
 0x2db   : > { %v2503_v26 = vpop.f32.mrb[33].mxu0 }
 0x2dc   : > { %v8047_v24 = vpop.f32.mrb[34].mxu0 }
 0x2dd   : > { %v2506_v28 = vpop.f32.mrb[35].mxu0 }
 0x2e2   : > { %v8050_v20 = vpop.f32.mrb[36].mxu0 }
 0x2e3   : > { %v9846_v4 = vpop.f32.mrb[37].mxu0 }
 0x2e4   : > { %v9848_v37 = vpop.f32.mrb[38].mxu0 }
 0x2e5   : > { %v9850_v54 = vpop.f32.mrb[39].mxu0 }
 0x322   : > { %v8158_v53 = vpop.f32.mrb[0].mxu1 }
 0x323   : > { %v8392_v14 = vadd.f32 %v8158_v53, %v8046_v43  ;;  %v3865_v36 = vpop.f32.mrb[1].mxu1 }
 0x324   : > { %v8393_v12 = vadd.f32 %v3865_v36, %v2503_v26  ;;  %v8159_v41 = vpop.f32.mrb[2].mxu1 }
 0x325   : > { %v3911_v31 = vmul.f32 %v8392_v14, %v7389_v8  ;;  %v8394_v52 = vadd.f32 %v8159_v41, %v8047_v24  ;;  %v3868_v16 = vpop.f32.mrb[3].mxu1 }
 0x326   : > { %v3909_v11 = vmul.f32 %v8393_v12, %v7389_v8  ;;  %v8395_v23 = vadd.f32 %v3868_v16, %v2506_v28 }
 0x327   : > { %v3924_v2 = vadd.f32 %v9884_v51, %v3911_v31  ;;  %v3912_v1 = vmul.f32 %v8394_v52, %v7389_v8 }
 0x328   : > { %v3922_v30 = vadd.f32 %v9884_v51, %v3909_v11  ;;  %v3910_v9 = vmul.f32 %v8395_v23, %v7389_v8 }
 0x329   : > { %vm3932_vm2 = vcmp.gt.f32.partialorder %v3924_v2, 0.0  ;;  %v3940_v40 = vmul.f32 0.01, %v3924_v2  ;;  %v3925_v63 = vadd.f32 %v9884_v51, %v3912_v1 }
 0x32a   : > { %vm3930_vm1 = vcmp.gt.f32.partialorder %v3922_v30, 0.0  ;;  %v3938_v46 = vmul.f32 0.01, %v3922_v30  ;;  %v3923_v25 = vadd.f32 %v9884_v51, %v3910_v9  ;;  %v8162_v60 = vpop.f32.mrb[4].mxu1 }
 0x32b   : > { %v3948_v6 = vsel %vm3932_vm2, %v3924_v2, %v3940_v40  ;;  %vm3933_vm3 = vcmp.gt.f32.partialorder %v3925_v63, 0.0  ;;  %v3941_v7 = vmul.f32 0.01, %v3925_v63  ;;  %v8396_v18 = vadd.f32 %v8162_v60, %v8050_v20  ;;  %v3881_v29 = vpop.f32.mrb[5].mxu1 }
 0x32c   : > { %v3957_v19 = vsel %vm785_vm7, %v3948_v6, -inf  ;;  %v3946_v22 = vsel %vm3930_vm1, %v3922_v30, %v3938_v46  ;;  %vm3931_vm9 = vcmp.gt.f32.partialorder %v3923_v25, 0.0  ;;  %v3939_v55 = vmul.f32 0.01, %v3923_v25  ;;  %v8163_v33 = vpop.f32.mrb[6].mxu1  ;;  %vm9932_vm1 = vmand %vm4166_vm4, %vm4299_vm6 }
 0x32d   : > { %v3954_v49 = vsel %vm785_vm7, %v3946_v22, -inf  ;;  %v3949_v5 = vsel %vm3933_vm3, %v3925_v63, %v3941_v7  ;;  %v3915_v34 = vmul.f32 %v8396_v18, %v7389_v8  ;;  %v8397_v32 = vadd.f32 %v3881_v29, %v9846_v4  ;;  %v3884_v10 = vpop.f32.mrb[7].mxu1 }
 0x32e   : > { %v3958_v59 = vsel %vm785_vm7, %v3949_v5, -inf  ;;  %v3947_v35 = vsel %vm3931_vm9, %v3923_v25, %v3939_v55  ;;  %v8398_v13 = vadd.f32 %v8163_v33, %v9848_v37  ;;  %v8399_v38 = vadd.f32 %v3884_v10, %v9850_v54 }
 0x32f   : > { %v3959_v42 = vmax.f32 %v3957_v19, %v3958_v59  ;;  %v3955_v45 = vsel %vm785_vm7, %v3947_v35, -inf  ;;  %v9898_v43 = vadd.f32 %v9884_v51, %v3915_v34  ;;  %v3913_v26 = vmul.f32 %v8397_v32, %v7389_v8 }
 0x330   : > { %v3956_v24 = vmax.f32 %v3954_v49, %v3955_v45  ;;  %v9901_v50 = vmul.f32 %v8398_v13, %v7389_v8  ;;  %v9907_v4 = vmul.f32 %v8399_v38, %v7389_v8  ;;  %vm4366_vm3 = vsmask.f32 1280 }
 0x331   : > { %v3987_v28 = vcombine.high %v3959_v42, %v3959_v42  ;;  %v3994_v15 = vrot.slane %v3959_v42, %v8974_v58  ;;  %v9905_v20 = vmul.f32 0.01, %v9898_v43  ;;  %v9912_v17 = vadd.f32 %v9884_v51, %v3913_v26 }
 0x332   : > { %v3970_v3 = vcombine.high %v3956_v24, %v3956_v24  ;;  %v3977_v47 = vrot.slane %v3956_v24, %v8974_v58  ;;  %vm3936_vm10 = vcmp.gt.f32.partialorder %v9898_v43, 0.0  ;;  %vm4367_vm9 = vsmask.f32 3336 }
 0x333   : > { %v4001_v37 = vrot.slane %v3987_v28, %v8974_v58  ;;  %v4002_v54 = vcombine.high %v3994_v15, %v3994_v15  ;;  %v4082_v57 = vsel %vm1186_vm11, %v3994_v15, -inf  ;;  %vm3934_vm0 = vcmp.gt.f32.partialorder %v9912_v17, 0.0 }
 0x334   : > { %v4083_v27 = vrot.slane %v4082_v57, 4  ;;  %v3984_v44 = vrot.slane %v3970_v3, %v8974_v58  ;;  %v3985_v61 = vcombine.high %v3977_v47, %v3977_v47  ;;  %v4054_v39 = vsel %vm1186_vm11, %v3977_v47, -inf }
 0x335   : > { %v4003_v56 = vcombine.high %v4001_v37, %v4001_v37  ;;  %v4089_v0 = vsel %vm1186_vm11, %v4002_v54, -inf  ;;  %v4096_v53 = vsel %vm1186_vm11, %v4001_v37, -inf  ;;  %v4055_v8 = vrot.slane %v4054_v39, 4 }
 0x336   : > { %v4084_v14 = vmax.f32 %v4082_v57, %v4083_v27  ;;  %v4090_v36 = vrot.slane %v4089_v0, 4  ;;  %v4097_v12 = vrot.slane %v4096_v53, 4  ;;  %v3986_v41 = vcombine.high %v3984_v44, %v3984_v44 }
 0x337   : > { %v4103_v31 = vsel %vm1186_vm11, %v4003_v56, -inf  ;;  %v4056_v52 = vmax.f32 %v4054_v39, %v4055_v8  ;;  %v4061_v16 = vsel %vm1186_vm11, %v3985_v61, -inf  ;;  %v4068_v11 = vsel %vm1186_vm11, %v3984_v44, -inf }
 0x338   : > { %v4085_v23 = vrot.slane %v4084_v14, 2  ;;  %v4091_v2 = vmax.f32 %v4089_v0, %v4090_v36  ;;  %v4098_v1 = vmax.f32 %v4096_v53, %v4097_v12  ;;  %v4104_v30 = vrot.slane %v4103_v31, 4 }
 0x339   : > { %v4057_v9 = vrot.slane %v4056_v52, 2  ;;  %v4062_v40 = vrot.slane %v4061_v16, 4  ;;  %v4069_v63 = vrot.slane %v4068_v11, 4  ;;  %v4075_v46 = vsel %vm1186_vm11, %v3986_v41, -inf }
 0x33a   : > { %v4086_v25 = vmax.f32 %v4084_v14, %v4085_v23  ;;  %v4092_v60 = vrot.slane %v4091_v2, 2  ;;  %v4099_v6 = vrot.slane %v4098_v1, 2  ;;  %v4105_v7 = vmax.f32 %v4103_v31, %v4104_v30 }
 0x33b   : > { %v4058_v18 = vmax.f32 %v4056_v52, %v4057_v9  ;;  %v4063_v29 = vmax.f32 %v4061_v16, %v4062_v40  ;;  %v4070_v19 = vmax.f32 %v4068_v11, %v4069_v63  ;;  %v4076_v22 = vrot.slane %v4075_v46, 4 }
 0x33c   : > { %v4087_v55 = vrot.slane %v4086_v25, 1  ;;  %v4093_v33 = vmax.f32 %v4091_v2, %v4092_v60  ;;  %v4100_v49 = vmax.f32 %v4098_v1, %v4099_v6  ;;  %v4106_v5 = vrot.slane %v4105_v7, 2  ;;  %v4304_v60 = vld [vmem:[#allocation3 + $0x8] sm:$0x7] }
 0x33d   : > { %v4059_v34 = vrot.slane %v4058_v18, 1  ;;  %v4064_v32 = vrot.slane %v4063_v29, 2  ;;  %v4071_v10 = vrot.slane %v4070_v19, 2  ;;  %v4077_v59 = vmax.f32 %v4075_v46, %v4076_v22 }
 0x33e   : > { %v4088_v35 = vmax.f32 %v4086_v25, %v4087_v55  ;;  %v4094_v13 = vrot.slane %v4093_v33, 1  ;;  %v4101_v38 = vrot.slane %v4100_v49, 1  ;;  %v4107_v42 = vmax.f32 %v4105_v7, %v4106_v5 }
 0x33f   : > { %v4060_v45 = vmax.f32 %v4058_v18, %v4059_v34  ;;  %v4065_v26 = vmax.f32 %v4063_v29, %v4064_v32  ;;  %v4072_v24 = vmax.f32 %v4070_v19, %v4071_v10  ;;  %v4078_v28 = vrot.slane %v4077_v59, 2 }
 0x340   : > { %v4095_v15 = vmax.f32 %v4093_v33, %v4094_v13  ;;  %v4102_v3 = vmax.f32 %v4100_v49, %v4101_v38  ;;  %v4108_v47 = vrot.slane %v4107_v42, 1  ;;  %v7787_v37 = vpack.c.bf16 %v4088_v35, %v4088_v35 }
 0x341   : > { %v4066_v54 = vrot.slane %v4065_v26, 1  ;;  %v4073_v57 = vrot.slane %v4072_v24, 1  ;;  %v4079_v27 = vmax.f32 %v4077_v59, %v4078_v28  ;;  %v7783_v44 = vpack.c.bf16 %v4060_v45, %v4060_v45 }
 0x342   : > { %v4109_v61 = vmax.f32 %v4107_v42, %v4108_v47  ;;  %v7788_v39 = vpack.c.bf16 %v4095_v15, %v4095_v15  ;;  %v7789_v56 = vpack.c.bf16 %v4102_v3, %v4102_v3  ;;  %v3929_v0 = vadd.f32 %v9884_v51, %v9901_v50 }
 0x343   : > { %v4266_v53 = vunpack.c.l.b16 %v7787_v37  ;;  %v4067_v8 = vmax.f32 %v4065_v26, %v4066_v54  ;;  %v4074_v14 = vmax.f32 %v4072_v24, %v4073_v57  ;;  %v4080_v36 = vrot.slane %v4079_v27, 1 }
 0x344   : > { %v7790_v12 = vpack.c.bf16 %v4109_v61, %v4109_v61  ;;  %v4267_v41 = vunpack.c.l.b16 %v7788_v39  ;;  %v4268_v31 = vunpack.c.l.b16 %v7789_v56  ;;  %v4262_v52 = vunpack.c.l.b16 %v7783_v44 }
 0x345   : > { %v4081_v16 = vmax.f32 %v4079_v27, %v4080_v36  ;;  %v7784_v11 = vpack.c.bf16 %v4067_v8, %v4067_v8  ;;  %v7785_v23 = vpack.c.bf16 %v4074_v14, %v4074_v14  ;;  %v3942_v30 = vmul.f32 0.01, %v9912_v17 }
 0x346   : > { %v4269_v2 = vunpack.c.l.b16 %v7790_v12  ;;  %v4281_v1 = vsel %vm2016_vm13, %v4267_v41, %v4266_v53  ;;  %vm3937_vm2 = vcmp.gt.f32.partialorder %v3929_v0, 0.0  ;;  %v3952_v6 = vsel %vm3936_vm10, %v9898_v43, %v9905_v20 }
 0x347   : > { %v4282_v50 = vsel %vm2018_vm14, %v4268_v31, %v4281_v1  ;;  %v7786_v9 = vpack.c.bf16 %v4081_v16, %v4081_v16  ;;  %v4263_v40 = vunpack.c.l.b16 %v7784_v11  ;;  %v4264_v63 = vunpack.c.l.b16 %v7785_v23 }
 0x348   : > { %v4283_v46 = vsel %vm2020_vm15, %v4269_v2, %v4282_v50  ;;  %v3945_v7 = vmul.f32 0.01, %v3929_v0  ;;  %v3927_v18 = vadd.f32 %v9884_v51, %v9907_v4  ;;  %v3950_v55 = vsel %vm3934_vm0, %v9912_v17, %v3942_v30  ;;  %v4301_v51 = vld [vmem:[#allocation3 + $0x4] sm:$0x7]  ;;  %vm4368_vm0 = vmor %vm4366_vm3, %vm4367_vm9 }
 0x349   : > { %v4291_v29 = vpack.c.b16 %v4283_v46, %v4283_v46  ;;  %v4265_v19 = vunpack.c.l.b16 %v7786_v9  ;;  %v4278_v22 = vsel %vm2016_vm13, %v4263_v40, %v4262_v52  ;;  %v3963_v4 = vsel %vm785_vm7, %v3952_v6, -inf }
 0x34a   : > { %v4279_v33 = vsel %vm2018_vm14, %v4264_v63, %v4278_v22  ;;  %v3953_v49 = vsel %vm3937_vm2, %v3929_v0, %v3945_v7  ;;  %vm3935_vm4 = vcmp.gt.f32.partialorder %v3927_v18, 0.0  ;;  %v3943_v5 = vmul.f32 0.01, %v3927_v18 }
 0x34b   : > { %v4305_v43 = vsel %vm9932_vm1, %v4291_v29, %v4304_v60  ;;  %v4280_v20 = vsel %vm2020_vm15, %v4265_v19, %v4279_v33  ;;  %v3964_v34 = vsel %vm785_vm7, %v3953_v49, -inf  ;;  %v3960_v59 = vsel %vm785_vm7, %v3950_v55, -inf }
 0x34c   : > { %4306 = vst [vmem:[#allocation3 + $0x8] sm:$0x7] %v4305_v43  ;;  %v4290_v32 = vpack.c.b16 %v4280_v20, %v4280_v20  ;;  %v3965_v10 = vmax.f32 %v3963_v4, %v3964_v34  ;;  %v3951_v17 = vsel %vm3935_vm4, %v3927_v18, %v3943_v5  ;;  %v9969_v20 = vld.sshfl [vmem:[#allocation3] sm:$0x13 pattern:$0x76325410] }
 0x34d   : > { %v3961_v35 = vsel %vm785_vm7, %v3951_v17, -inf  ;;  %vm4369_vm6 = vsmask.f32 5392  ;;  %vm4371_vm10 = vsmask.f32 7448 }
 0x34e   : > { %v4302_v13 = vsel %vm9932_vm1, %v4290_v32, %v4301_v51  ;;  %v4021_v38 = vcombine.high %v3965_v10, %v3965_v10  ;;  %v4028_v42 = vrot.slane %v3965_v10, %v8974_v58  ;;  %v3962_v45 = vmax.f32 %v3960_v59, %v3961_v35  ;;  %vm9978_vm2 = vmor %vm4368_vm0, %vm4369_vm6 }
 0x34f   : > { %4303 = vst [vmem:[#allocation3 + $0x4] sm:$0x7] %v4302_v13  ;;  %vm9993_vm4 = vmor %vm9978_vm2, %vm4371_vm10  ;;  %vm5761_vm9 = vsmask.f32 7942  ;;  %vm10591_vm0 = vcmask 519168  }
 0x350   : > { %v4035_v26 = vrot.slane %v4021_v38, %v8974_v58  ;;  %v4036_v24 = vcombine.high %v4028_v42, %v4028_v42  ;;  %v4138_v28 = vsel %vm1186_vm11, %v4028_v42, -inf  ;;  %v4004_v15 = vcombine.high %v3962_v45, %v3962_v45  ;;  %vm10592_vm2 = vmmov %vm10591_vm0 }
 0x351   : > { %v4139_v3 = vrot.slane %v4138_v28, 4  ;;  %v4011_v47 = vrot.slane %v3962_v45, %v8974_v58 }
 0x352   : > { %v4037_v37 = vcombine.high %v4035_v26, %v4035_v26  ;;  %v4145_v54 = vsel %vm1186_vm11, %v4036_v24, -inf  ;;  %v4152_v57 = vsel %vm1186_vm11, %v4035_v26, -inf  ;;  %v4018_v27 = vrot.slane %v4004_v15, %v8974_v58 }
 0x353   : > { %v4140_v44 = vmax.f32 %v4138_v28, %v4139_v3  ;;  %v4146_v61 = vrot.slane %v4145_v54, 4  ;;  %v4153_v39 = vrot.slane %v4152_v57, 4  ;;  %v4019_v56 = vcombine.high %v4011_v47, %v4011_v47 }
 0x354   : > { %v4159_v0 = vsel %vm1186_vm11, %v4037_v37, -inf  ;;  %v4020_v53 = vcombine.high %v4018_v27, %v4018_v27  ;;  %v4110_v8 = vsel %vm1186_vm11, %v4011_v47, -inf  ;;  %v4124_v14 = vsel %vm1186_vm11, %v4018_v27, -inf }
 0x355   : > { %v4141_v36 = vrot.slane %v4140_v44, 2  ;;  %v4147_v12 = vmax.f32 %v4145_v54, %v4146_v61  ;;  %v4154_v41 = vmax.f32 %v4152_v57, %v4153_v39  ;;  %v4160_v31 = vrot.slane %v4159_v0, 4 }
 0x356   : > { %v4111_v52 = vrot.slane %v4110_v8, 4  ;;  %v4117_v16 = vsel %vm1186_vm11, %v4019_v56, -inf  ;;  %v4125_v11 = vrot.slane %v4124_v14, 4  ;;  %v4131_v23 = vsel %vm1186_vm11, %v4020_v53, -inf }
 0x357   : > { %v4142_v2 = vmax.f32 %v4140_v44, %v4141_v36  ;;  %v4148_v1 = vrot.slane %v4147_v12, 2  ;;  %v4155_v30 = vrot.slane %v4154_v41, 2  ;;  %v4161_v50 = vmax.f32 %v4159_v0, %v4160_v31  ;;  %v7416_v57 = vld.sshfl [vmem:[#allocation3 + $0x4] sm:$0x13 pattern:$0x76325410] }
 0x358   : > { %v4112_v9 = vmax.f32 %v4110_v8, %v4111_v52  ;;  %v4118_v40 = vrot.slane %v4117_v16, 4  ;;  %v4126_v63 = vmax.f32 %v4124_v14, %v4125_v11  ;;  %v4132_v46 = vrot.slane %v4131_v23, 4  ;;  %v7417_v56 = vld.sshfl [vmem:[#allocation3 + $0x8] sm:$0x13 pattern:$0x76325410] }
 0x359   : > { %v4143_v60 = vrot.slane %v4142_v2, 1  ;;  %v4149_v6 = vmax.f32 %v4147_v12, %v4148_v1  ;;  %v4156_v7 = vmax.f32 %v4154_v41, %v4155_v30  ;;  %v4162_v18 = vrot.slane %v4161_v50, 2  ;;  %v4310_v1 = vld [vmem:[#allocation3 + $0x10] sm:$0x7] }
 0x35a   : > { %v4113_v29 = vrot.slane %v4112_v9, 2  ;;  %v4119_v19 = vmax.f32 %v4117_v16, %v4118_v40  ;;  %v4127_v22 = vrot.slane %v4126_v63, 2  ;;  %v4133_v55 = vmax.f32 %v4131_v23, %v4132_v46 }
 0x35b   : > { %v4144_v33 = vmax.f32 %v4142_v2, %v4143_v60  ;;  %v4150_v49 = vrot.slane %v4149_v6, 1  ;;  %v4157_v5 = vrot.slane %v4156_v7, 1  ;;  %v4163_v43 = vmax.f32 %v4161_v50, %v4162_v18 }
 0x35c   : > { %v4114_v51 = vmax.f32 %v4112_v9, %v4113_v29  ;;  %v4120_v4 = vrot.slane %v4119_v19, 2  ;;  %v4128_v34 = vmax.f32 %v4126_v63, %v4127_v22  ;;  %v4134_v32 = vrot.slane %v4133_v55, 2 }
 0x35d   : > { %v4151_v10 = vmax.f32 %v4149_v6, %v4150_v49  ;;  %v4158_v17 = vmax.f32 %v4156_v7, %v4157_v5  ;;  %v4164_v59 = vrot.slane %v4163_v43, 1  ;;  %v7795_v35 = vpack.c.bf16 %v4144_v33, %v4144_v33 }
 0x35e   : > { %v4115_v13 = vrot.slane %v4114_v51, 1  ;;  %v4121_v38 = vmax.f32 %v4119_v19, %v4120_v4  ;;  %v4129_v42 = vrot.slane %v4128_v34, 1  ;;  %v4135_v45 = vmax.f32 %v4133_v55, %v4134_v32  ;;  %v4307_v32 = vld [vmem:[#allocation3 + $0xc] sm:$0x7] }
 0x35f   : > { %v4165_v26 = vmax.f32 %v4163_v43, %v4164_v59  ;;  %v7796_v24 = vpack.c.bf16 %v4151_v10, %v4151_v10  ;;  %v7797_v28 = vpack.c.bf16 %v4158_v17, %v4158_v17  ;;  %v4374_v15 = vshrl.u32 %v9969_v20, 16 }
 0x360   : > { %v4116_v3 = vmax.f32 %v4114_v51, %v4115_v13  ;;  %v4122_v47 = vrot.slane %v4121_v38, 1  ;;  %v4130_v37 = vmax.f32 %v4128_v34, %v4129_v42  ;;  %v4136_v54 = vrot.slane %v4135_v45, 1 }
 0x361   : > { %v7798_v27 = vpack.c.bf16 %v4165_v26, %v4165_v26  ;;  %v4274_v44 = vunpack.c.l.b16 %v7795_v35  ;;  %v4275_v61 = vunpack.c.l.b16 %v7796_v24  ;;  %v4276_v39 = vunpack.c.l.b16 %v7797_v28 }
 0x362   : > { %v4123_v0 = vmax.f32 %v4121_v38, %v4122_v47  ;;  %v4137_v53 = vmax.f32 %v4135_v45, %v4136_v54  ;;  %v7791_v8 = vpack.c.bf16 %v4116_v3, %v4116_v3  ;;  %v7793_v14 = vpack.c.bf16 %v4130_v37, %v4130_v37 }
 0x363   : > { %v4277_v36 = vunpack.c.l.b16 %v7798_v27  ;;  %v4287_v12 = vsel %vm2016_vm13, %v4275_v61, %v4274_v44  ;;  %v4349_v41 = vcombine.high %v7416_v57, %v7416_v57  ;;  %v4388_v31 = vshrl.u32 %v7416_v57, 16 }
 0x364   : > { %v4288_v52 = vsel %vm2018_vm14, %v4276_v39, %v4287_v12  ;;  %v7792_v16 = vpack.c.bf16 %v4123_v0, %v4123_v0  ;;  %v7794_v11 = vpack.c.bf16 %v4137_v53, %v4137_v53  ;;  %v4357_v23 = vcombine.high %v7417_v56, %v7417_v56 }
 0x365   : > { %v4289_v2 = vsel %vm2020_vm15, %v4277_v36, %v4288_v52  ;;  %v4272_v30 = vunpack.c.l.b16 %v7793_v14  ;;  %v4390_v50 = vrot.slane %v4388_v31, 6  ;;  %v4391_v9 = vshll.u32 %v7416_v57, 16 }
 0x366   : > { %v4293_v40 = vpack.c.b16 %v4289_v2, %v4289_v2  ;;  %v4270_v63 = vunpack.c.l.b16 %v7791_v8  ;;  %v4271_v46 = vunpack.c.l.b16 %v7792_v16  ;;  %v4273_v60 = vunpack.c.l.b16 %v7794_v11 }
 0x367   : > { %v4393_v7 = vrot.slane %v4391_v9, 7  ;;  %v4397_v18 = vshll.u32 %v4349_v41, 16  ;;  %v4402_v29 = vshrl.u32 %v7417_v56, 16  ;;  %v4405_v19 = vshll.u32 %v7417_v56, 16 }
 0x368   : > { %v4311_v22 = vsel %vm9932_vm1, %v4293_v40, %v4310_v1  ;;  %v4284_v55 = vsel %vm2016_vm13, %v4271_v46, %v4270_v63  ;;  %v4377_v33 = vshll.u32 %v9969_v20, 16  ;;  %v4411_v49 = vshll.u32 %v4357_v23, 16 }
 0x369   : > { %4312 = vst [vmem:[#allocation3 + $0x10] sm:$0x7] %v4311_v22  ;;  %v4285_v5 = vsel %vm2018_vm14, %v4272_v30, %v4284_v55  ;;  %v4394_v43 = vor.u32 %v4393_v7, %v4390_v50  ;;  %v4404_v51 = vrot.slane %v4402_v29, 6  ;;  %v4407_v4 = vrot.slane %v4405_v19, 7  ;;  %v8634_v29 = vld [vmem:[%s10560_s2 + $0x120] sm:$0xff]   ;;  %v8635_v55 = vld [vmem:[%s10560_s2 + $0x128] sm:$0xff]  }
 0x36a   : > { %v4286_v34 = vsel %vm2020_vm15, %v4273_v60, %v4285_v5  ;;  %v4341_v10 = vcombine.high %v9969_v20, %v9969_v20  ;;  %v4399_v13 = vrot.slane %v4397_v18, 7  ;;  %v4376_v42 = vrot.slane %v4374_v15, 6  ;;  %v8717_v5 = vld.sshfl [vmem:[#allocation3] sm:$0xf pattern:$0x76325410] }
 0x36b   : > { %v4292_v59 = vpack.c.b16 %v4286_v34, %v4286_v34  ;;  %v4395_v35 = vrot.slane %v4394_v43, 2  ;;  %v4408_v38 = vor.u32 %v4407_v4, %v4404_v51  ;;  %v4379_v45 = vrot.slane %v4377_v33, 7  ;;  %v8636_v33 = vld [vmem:[%s10560_s2 + $0x130] sm:$0xff]   ;;  %v8637_v4 = vld [vmem:[%s10560_s2 + $0x138] sm:$0xff]  }
 0x36c   : > { %v4413_v28 = vrot.slane %v4411_v49, 7  ;;  %v4383_v3 = vshll.u32 %v4341_v10, 16  ;;  %v7437_v43 = vld.sshfl [vmem:[#allocation3] sm:$0x12 pattern:$0x76325410] }
 0x36d   : > { %v4308_v26 = vsel %vm9932_vm1, %v4292_v59, %v4307_v32  ;;  %v4400_v24 = vsel %vm9993_vm4, %v4395_v35, %v4399_v13  ;;  %v4409_v20 = vrot.slane %v4408_v38, 2  ;;  %v4380_v37 = vor.u32 %v4379_v45, %v4376_v42  ;;  %v7439_v34 = vld.sshfl [vmem:[#allocation3 + $0x8] sm:$0x12 pattern:$0x76325410]  ;;  %v8640_v59 = vld [vmem:[%s10560_s2 + $0x160] sm:$0xff]  }
 0x36e   : > { %4309 = vst [vmem:[#allocation3 + $0xc] sm:$0x7] %v4308_v26  ;;  %v4385_v56 = vrot.slane %v4383_v3, 7  ;;  %vm4652_vm14 = vcmask 1040384   ;;  %v4627_v35 = vcombine.high %v7437_v43, %v7437_v43  ;;  %v4643_v38 = vcombine.high %v7439_v34, %v7439_v34 }
 0x36f   : > { %v4414_v47 = vsel %vm9993_vm4, %v4409_v20, %v4413_v28  ;;  %v4381_v25 = vrot.slane %v4380_v37, 2  ;;  %v7438_v32 = vld.sshfl [vmem:[#allocation3 + $0x4] sm:$0x12 pattern:$0x76325410]  ;;  %vm4654_vm1 = vmor %vm4652_vm14, %vm2016_vm13  ;;  %v7441_v26 = vrot.slane %v7437_v43, 9 }
 0x370   : > { %v7474_v54 = vld.sshfl [vmem:[#allocation3 + $0x10] sm:$0x13 pattern:$0x76325410]  ;;  %v4980_v57 = vcombine.low %v4400_v24, %v4414_v47  ;;  %v4635_v13 = vcombine.high %v7438_v32, %v7438_v32  ;;  %vm4656_vm3 = vmor %vm4654_vm1, %vm2020_vm15  ;;  %v4661_v20 = vrot.slane %v4627_v35, 7  ;;  %v4669_v3 = vrot.slane %v4643_v38, 7 }
 0x371   : > { %v4958_v27 = vshrl.u32 %v7474_v54, 16  ;;  %v4961_v44 = vshll.u32 %v7474_v54, 16  ;;  %v4914_v15 = vcombine.high %v7474_v54, %v7474_v54  ;;  %v4386_v11 = vsel %vm9993_vm4, %v4381_v25, %v4385_v56  ;;  %vm10057_vm15 = vmor %vm4656_vm3, %vm2024_vm8  ;;  %v8721_v35 = vld.sshfl [vmem:[#allocation3 + $0x10] sm:$0xf pattern:$0x76325410] }
 0x372   : > { %v4438_v9 = vcombine.low %v4386_v11, %v4400_v24  ;;  %v10017_v7 = vrot.slane %v4980_v57, %v8974_v58  ;;  %v8641_v24 = vld [vmem:[%s10560_s2 + $0x168] sm:$0xff]   ;;  %v4665_v28 = vrot.slane %v4635_v13, 7  ;;  %v7442_v54 = vrot.slane %v7438_v32, 9  ;;  %v8650_v11 = vld [vmem:[%s10560_s2 + $0x1a0] sm:$0xff]   ;;  %vm10594_vm14 = vmmov %vm10591_vm0 }
 0x373   : > { %v4960_v61 = vrot.slane %v4958_v27, 6  ;;  %v4963_v39 = vrot.slane %v4961_v44, 7  ;;  %v4967_v12 = vshll.u32 %v4914_v15, 16  ;;  %v7443_v57 = vrot.slane %v7439_v34, 9  ;;  %v8642_v44 = vld [vmem:[%s10560_s2 + $0x170] sm:$0xff]  }
 0x374   : > { %v4446_v60 = vrot.slane %v4438_v9, %v8974_v58  ;;  %v4662_v15 = vsel %vm10057_vm15, %v7441_v26, %v4661_v20  ;;  %v8653_v9 = vld [vmem:[%s10560_s2 + $0x1b8] sm:$0xff]   ;;  %v8664_v20 = vld [vmem:[%s10560_s2 + $0x200] sm:$0xff]   ;;  %vm5760_vm8 = vcmask 517121   ;;  %vm5901_vm1 = vsmask.f32 1284 }
 0x375   : > { %v7418_v0 = vld.sshfl [vmem:[#allocation3 + $0xc] sm:$0x13 pattern:$0x76325410]  ;;  %v4964_v53 = vor.u32 %v4963_v39, %v4960_v61  ;;  %v4969_v2 = vrot.slane %v4967_v12, 7  ;;  %v10072_v61 = vsel %vm10057_vm15, %v7442_v54, %v4665_v28  ;;  %v10076_v39 = vsel %vm10057_vm15, %v7443_v57, %v4669_v3  ;;  %v8645_v12 = vld [vmem:[%s10560_s2 + $0x188] sm:$0xff]   ;;  %vm5762_vm6 = vmand %vm5760_vm8, %vm5761_vm9 }
 0x376   : > { %v4365_v8 = vcombine.high %v7418_v0, %v7418_v0  ;;  %v4416_v14 = vshrl.u32 %v7418_v0, 16  ;;  %v4419_v36 = vshll.u32 %v7418_v0, 16  ;;  %v8716_v49 = vld.sshfl [vmem:[#allocation3 + $0x8] sm:$0xf pattern:$0x76325410]  ;;  %v4684_v56 = vcombine.low %v4662_v15, %v10072_v61 }
 0x377   : > { %v4965_v16 = vrot.slane %v4964_v53, 2  ;;  %v7440_v51 = vld.sshfl [vmem:[#allocation3 + $0xc] sm:$0x12 pattern:$0x76325410]  ;;  %v4543_v42 = vcombine.low %v8717_v5, %v8716_v49  ;;  %v8658_v5 = vld [vmem:[%s10560_s2 + $0x1e0] sm:$0xff]  }
 0x378   : > { %v4418_v41 = vrot.slane %v4416_v14, 6  ;;  %v4421_v31 = vrot.slane %v4419_v36, 7  ;;  %v4425_v52 = vshll.u32 %v4365_v8, 16  ;;  %v4651_v10 = vcombine.high %v7440_v51, %v7440_v51  ;;  %v8643_v0 = vld [vmem:[%s10560_s2 + $0x178] sm:$0xff]   ;;  %v8644_v14 = vld [vmem:[%s10560_s2 + $0x180] sm:$0xff]   ;;  %v8665_v54 = vld [vmem:[%s10560_s2 + $0x208] sm:$0xff]  }
 0x379   : > { %v10007_v50 = vsel %vm9993_vm4, %v4965_v16, %v4969_v2  ;;  %v4692_v8 = vrot.slane %v4684_v56, %v8974_v58  ;;  %v8647_v16 = vld [vmem:[%s10560_s2 + $0x198] sm:$0xff]   ;;  %v8651_v2 = vld [vmem:[%s10560_s2 + $0x1a8] sm:$0xff]   ;;  %v7542_v15 = vld.sshfl [vmem:[#allocation3 + $0x14] sm:$0x12 pattern:$0x76325410] }
 0x37a   : > { %v4422_v23 = vor.u32 %v4421_v31, %v4418_v41  ;;  %v4427_v30 = vrot.slane %v4425_v52, 7  ;;  %v4673_v45 = vrot.slane %v4651_v10, 7  ;;  %v8646_v41 = vld [vmem:[%s10560_s2 + $0x190] sm:$0xff]   ;;  %vm10595_vm3 = vsmask.f32 256 }
 0x37b   : > { %v8718_v31 = vld.sshfl [vmem:[#allocation3 + $0xc] sm:$0xf pattern:$0x76325410]  ;;  %v8660_v10 = vld [vmem:[%s10560_s2 + $0x1f0] sm:$0xff]  }
 0x37c   : > { %v4423_v1 = vrot.slane %v4422_v23, 2  ;;  %v8719_v52 = vld.sshfl [vmem:[#allocation3 + $0x4] sm:$0xf pattern:$0x76325410] }
 0x37d   : > { %v4804_v23 = vcombine.low %v8719_v52, %v8718_v31  ;;  %v5754_v31 = vld [vmem:[#allocation4 + $0x2] sm:$0x1]  ;;  %vm5903_vm8 = vsmask.f32 2312 }
 0x37e   : > { %v4428_v40 = vsel %vm9993_vm4, %v4423_v1, %v4427_v30  ;;  %v8652_v1 = vld [vmem:[%s10560_s2 + $0x1b0] sm:$0xff]   ;;  %v7491_v30 = vld.sshfl [vmem:[#allocation3 + $0x10] sm:$0x12 pattern:$0x76325410]  ;;  %v5755_v52 = vsel %vm8935_vm5, 0, %v5754_v31 }
 0x37f   : > { %v4439_v63 = vcombine.low %v4414_v47, %v4428_v40  ;;  %v4981_v46 = vcombine.low %v4428_v40, %v10007_v50  ;;  %v7444_v47 = vrot.slane %v7440_v51, 9  ;;  %v5106_v40 = vcombine.high %v7491_v30, %v7491_v30  ;;  %v7525_v51 = vld.sshfl [vmem:[#allocation3 + $0x14] sm:$0x13 pattern:$0x76325410] }
 0x380   : > { %v5407_v34 = vshrl.u32 %v7525_v51, 16  ;;  %v5410_v32 = vshll.u32 %v7525_v51, 16  ;;  %v5363_v13 = vcombine.high %v7525_v51, %v7525_v51  ;;  %5756 = vst [vmem:[#allocation4 + $0x2] sm:$0x1] %v5755_v52 }
 0x381   : > { %v10014_v6 = vrot.slane %v4439_v63, %v8974_v58  ;;  %v10020_v18 = vrot.slane %v4981_v46, %v8974_v58  ;;  %v10063_v27 = vsel %vm10057_vm15, %v7444_v47, %v4673_v45  ;;  %v8654_v63 = vld [vmem:[%s10560_s2 + $0x1c0] sm:$0xff]   ;;  %v5121_v46 = vrot.slane %v5106_v40, 7  ;;  %v8661_v45 = vld [vmem:[%s10560_s2 + $0x1f8] sm:$0xff]  }
 0x382   : > { %v4685_v25 = vcombine.low %v10076_v39, %v10063_v27  ;;  %v5409_v38 = vrot.slane %v5407_v34, 6  ;;  %v8675_v40 = vld [vmem:[%s10560_s2 + $0x278] sm:$0xff]  }
 0x383   : > { %v4454_v19 = vcombine.low %v4446_v60, %v10014_v6  ;;  %v4996_v22 = vcombine.low %v10017_v7, %v10020_v18  ;;  %v8655_v60 = vld [vmem:[%s10560_s2 + $0x1c8] sm:$0xff]   ;;  %v8656_v7 = vld [vmem:[%s10560_s2 + $0x1d0] sm:$0xff]  }
 0x384   : > { %v10087_v53 = vrot.slane %v4685_v25, %v8974_v58  ;;  %v8668_v25 = vld [vmem:[%s10560_s2 + $0x220] sm:$0xff]  }
 0x385   : > { %8173 = vmatmul.mubr.msk.bf16.vlgmr.msra.gmra.mrb[40].mxu0 %vm785_vm7, %v4454_v19 }
 0x386   : > { %8177 = vmatpush3.bf16.msra.mxu0 %v8634_v29  ;;  %8184 = vmatprep.mubr.msk.bf16.mxu0 %vm8789_vm12, %v8788_v62  ;;  %v4700_v36 = vcombine.low %v4692_v8, %v10087_v53  ;;  %v7495_v29 = vrot.slane %v7491_v30, 9  ;;  %v8669_v8 = vld [vmem:[%s10560_s2 + $0x228] sm:$0xff]   ;;  %v8672_v30 = vld [vmem:[%s10560_s2 + $0x260] sm:$0xff]  }
 0x387   : > { %8178 = vmatprep.subr.bf16.mxu0 %v8788_v62  ;;  %8273 = vmatpush3.bf16.msra.mxu1 %v8672_v30 }
 0x388   : > { %v10145_v19 = vsel %vm10057_vm15, %v7495_v29, %v5121_v46  ;;  %8274 = vmatprep.subr.bf16.mxu1 %v8788_v62 }
 0x389   : > { %v5133_v18 = vcombine.low %v10063_v27, %v10145_v19  ;;  %v8666_v27 = vld [vmem:[%s10560_s2 + $0x210] sm:$0xff]  }
 0x38a   : > { %8179 = vmatpush3.bf16.msra.mxu0 %v8635_v55  ;;  %v8657_v55 = vld [vmem:[%s10560_s2 + $0x1d8] sm:$0xff]  }
 0x38b   : > { %8180 = vmatprep.subr.bf16.mxu0 %v8788_v62 }
 0x38e   : > { %8181 = vmatpush3.bf16.msra.mxu0 %v8636_v33  ;;  %v5147_v33 = vrot.slane %v5133_v18, %v8974_v58 }
 0x38f   : > { %8182 = vmatprep.subr.bf16.mxu0 %v8788_v62 }
 0x392   : > { %8183 = vmatpush3.bf16.msra.mxu0 %v8637_v4  ;;  %v8659_v4 = vld [vmem:[%s10560_s2 + $0x1e8] sm:$0xff]  }
 0x393   : > { %8188 = vmatprep.subr.bf16.mxu0 %v8788_v62 }
 0x395   : > { %8185 = vmatmul.mubr.msk.bf16.vlgmr.msra.gmra.mrb[40].mxu0 %vm785_vm7, %v4543_v42  ;;  %v5412_v42 = vrot.slane %v5410_v32, 7 }
 0x396   : > { %8189 = vmatpush3.bf16.msra.mxu0 %v8640_v59  ;;  %8196 = vmatprep.mubr.msk.bf16.mxu0 %vm8789_vm12, %v8788_v62  ;;  %v8720_v59 = vld.sshfl [vmem:[#allocation3 + $0x8] sm:$0xf pattern:$0x76325410] }
 0x397   : > { %8190 = vmatprep.subr.bf16.mxu0 %v8788_v62  ;;  %v5413_v26 = vor.u32 %v5412_v42, %v5409_v38  ;;  %v5253_v28 = vcombine.low %v8720_v59, %v8721_v35 }
 0x399   : > { %v5414_v3 = vrot.slane %v5413_v26, 2 }
 0x39a   : > { %8191 = vmatpush3.bf16.msra.mxu0 %v8641_v24  ;;  %v5416_v24 = vshll.u32 %v5363_v13, 16 }
 0x39b   : > { %8192 = vmatprep.subr.bf16.mxu0 %v8788_v62 }
 0x39c   : > { %v5418_v47 = vrot.slane %v5416_v24, 7 }
 0x39e   : > { %8193 = vmatpush3.bf16.msra.mxu0 %v8642_v44  ;;  %v5419_v57 = vsel %vm9993_vm4, %v5414_v3, %v5418_v47  ;;  %vm10593_vm4 = vmmov %vm10591_vm0 }
 0x39f   : > { %8194 = vmatprep.subr.bf16.mxu0 %v8788_v62  ;;  %v5430_v44 = vcombine.low %v10007_v50, %v5419_v57  ;;  %v7546_v50 = vrot.slane %v7542_v15, 9 }
 0x3a1   : > { %v5444_v17 = vrot.slane %v5430_v44, %v8974_v58 }
 0x3a2   : > { %8195 = vmatpush3.bf16.msra.mxu0 %v8643_v0 }
 0x3a3   : > { %8200 = vmatprep.subr.bf16.mxu0 %v8788_v62  ;;  %v5445_v56 = vcombine.low %v10014_v6, %v5444_v17  ;;  %v8670_v6 = vld [vmem:[%s10560_s2 + $0x230] sm:$0xff]  }
 0x3a5   : > { %8197 = vmatmul.mubr.msk.bf16.vlgmr.msra.gmra.mrb[40].mxu0 %vm785_vm7, %v4700_v36 }
 0x3a6   : > { %8201 = vmatpush3.bf16.msra.mxu0 %v8644_v14  ;;  %8208 = vmatprep.mubr.msk.bf16.mxu0 %vm8789_vm12, %v8788_v62 }
 0x3a7   : > { %8202 = vmatprep.subr.bf16.mxu0 %v8788_v62 }
 0x3aa   : > { %8203 = vmatpush3.bf16.msra.mxu0 %v8645_v12  ;;  %v8671_v12 = vld [vmem:[%s10560_s2 + $0x238] sm:$0xff]  }
 0x3ab   : > { %8204 = vmatprep.subr.bf16.mxu0 %v8788_v62 }
 0x3ae   : > { %8205 = vmatpush3.bf16.msra.mxu0 %v8646_v41 }
 0x3af   : > { %8206 = vmatprep.subr.bf16.mxu0 %v8788_v62 }
 0x3b2   : > { %8207 = vmatpush3.bf16.msra.mxu0 %v8647_v16  ;;  %v5763_v16 = vld [vmem:[#allocation4 + $0x2] sm:$0x2] }
 0x3b3   : > { %8212 = vmatprep.subr.bf16.mxu0 %v8788_v62 }
 0x3b5   : > { %8209 = vmatmul.mubr.msk.bf16.vlgmr.msra.gmra.mrb[40].mxu0 %vm785_vm7, %v4804_v23  ;;  %v5757_v23 = vld [vmem:[#allocation4 + $0x4] sm:$0x1] }
 0x3b6   : > { %8213 = vmatpush3.bf16.msra.mxu0 %v8650_v11  ;;  %8220 = vmatprep.mubr.msk.bf16.mxu0 %vm8789_vm12, %v8788_v62  ;;  %v5764_v11 = vsel %vm5762_vm6, 0, %v5763_v16 }
 0x3b7   : > { %8214 = vmatprep.subr.bf16.mxu0 %v8788_v62  ;;  %5765 = vst [vmem:[#allocation4 + $0x2] sm:$0x2] %v5764_v11 }
 0x3ba   : > { %8215 = vmatpush3.bf16.msra.mxu0 %v8651_v2  ;;  %v5758_v2 = vsel %vm8935_vm5, 0, %v5757_v23 }
 0x3bb   : > { %8216 = vmatprep.subr.bf16.mxu0 %v8788_v62  ;;  %5759 = vst [vmem:[#allocation4 + $0x4] sm:$0x1] %v5758_v2 }
 0x3be   : > { %8217 = vmatpush3.bf16.msra.mxu0 %v8652_v1 }
 0x3bf   : > { %8218 = vmatprep.subr.bf16.mxu0 %v8788_v62 }
 0x3c2   : > { %8219 = vmatpush3.bf16.msra.mxu0 %v8653_v9  ;;  %v8673_v9 = vld [vmem:[%s10560_s2 + $0x268] sm:$0xff]  }
 0x3c3   : > { %8224 = vmatprep.subr.bf16.mxu0 %v8788_v62  ;;  %8275 = vmatpush3.bf16.msra.mxu1 %v8673_v9 }
 0x3c4   : > { %8276 = vmatprep.subr.bf16.mxu1 %v8788_v62 }
 0x3c5   : > { %8221 = vmatmul.mubr.msk.bf16.vlgmr.msra.gmra.mrb[40].mxu0 %vm785_vm7, %v4996_v22  ;;  %v5132_v22 = vcombine.low %v10072_v61, %v10076_v39  ;;  %v8667_v61 = vld [vmem:[%s10560_s2 + $0x218] sm:$0xff]   ;;  %v5555_v39 = vcombine.high %v7542_v15, %v7542_v15 }
 0x3c6   : > { %8225 = vmatpush3.bf16.msra.mxu0 %v8654_v63  ;;  %8232 = vmatprep.mubr.msk.bf16.mxu0 %vm8789_vm12, %v8788_v62  ;;  %v7560_v63 = vld [vmem:[%s10561_s3 + $0x2] ss:$0 sm:$0xff] }
 0x3c7   : > { %8226 = vmatprep.subr.bf16.mxu0 %v8788_v62  ;;  %v5140_v49 = vrot.slane %v5132_v22, %v8974_v58  ;;  %v5570_v0 = vrot.slane %v5555_v39, 7  ;;  %8277 = vmatpush3.bf16.msra.mxu1 %v8674_v21 }
 0x3c8   : > { %8278 = vmatprep.subr.bf16.mxu1 %v8788_v62 }
 0x3c9   : > { %v5148_v43 = vcombine.low %v5140_v49, %v5147_v33  ;;  %v5571_v14 = vsel %vm10057_vm15, %v7546_v50, %v5570_v0  ;;  %vm5902_vm15 = vmor %vm10595_vm3, %vm5901_vm1  ;;  %vm5911_vm3 = vsmask.f32 6424 }
 0x3ca   : > { %8227 = vmatpush3.bf16.msra.mxu0 %v8655_v60  ;;  %v5582_v36 = vcombine.low %v10145_v19, %v5571_v14  ;;  %v7561_v60 = vld [vmem:[%s10562_s4 + $0x2] ss:$0 sm:$0xff]  ;;  %vm5904_vm9 = vmor %vm5902_vm15, %vm5903_vm8  ;;  %vm5913_vm8 = vsmask.f32 7452 }
 0x3cb   : > { %8228 = vmatprep.subr.bf16.mxu0 %v8788_v62  ;;  %8279 = vmatpush3.bf16.msra.mxu1 %v8675_v40 }
 0x3cc   : > { %v5596_v41 = vrot.slane %v5582_v36, %v8974_v58  ;;  %8284 = vmatprep.subr.bf16.mxu1 %v8788_v62 }
 0x3ce   : > { %8229 = vmatpush3.bf16.msra.mxu0 %v8656_v7  ;;  %v5597_v37 = vcombine.low %v10087_v53, %v5596_v41  ;;  %v5766_v53 = vld [vmem:[#allocation4 + $0x4] sm:$0x2] }
 0x3cf   : > { %8230 = vmatprep.subr.bf16.mxu0 %v8788_v62  ;;  %v5767_v1 = vsel %vm5762_vm6, 0, %v5766_v53  ;;  %vm5905_vm6 = vsmask.f32 3340 }
 0x3d0   : > { %5768 = vst [vmem:[#allocation4 + $0x4] sm:$0x2] %v5767_v1 }
 0x3d2   : > { %8231 = vmatpush3.bf16.msra.mxu0 %v8657_v55 }
 0x3d3   : > { %8236 = vmatprep.subr.bf16.mxu0 %v8788_v62 }
 0x3d5   : > { %8233 = vmatmul.mubr.msk.bf16.vlgmr.msra.gmra.mrb[40].mxu0 %vm785_vm7, %v5148_v43 }
 0x3d6   : > { %8237 = vmatpush3.bf16.msra.mxu0 %v8658_v5  ;;  %8244 = vmatprep.mubr.msk.bf16.mxu0 %vm8789_vm12, %v8788_v62 }
 0x3d7   : > { %8238 = vmatprep.subr.bf16.mxu0 %v8788_v62 }
 0x3da   : > { %8239 = vmatpush3.bf16.msra.mxu0 %v8659_v4 }
 0x3db   : > { %8240 = vmatprep.subr.bf16.mxu0 %v8788_v62 }
 0x3de   : > { %8241 = vmatpush3.bf16.msra.mxu0 %v8660_v10 }
 0x3df   : > { %8242 = vmatprep.subr.bf16.mxu0 %v8788_v62 }
 0x3e2   : > { %8243 = vmatpush3.bf16.msra.mxu0 %v8661_v45 }
 0x3e3   : > { %8248 = vmatprep.subr.bf16.mxu0 %v8788_v62 }
 0x3e5   : > { %8245 = vmatmul.mubr.msk.bf16.vlgmr.msra.gmra.mrb[40].mxu0 %vm785_vm7, %v5253_v28 }
 0x3e6   : > { %8249 = vmatpush3.bf16.msra.mxu0 %v8664_v20  ;;  %8256 = vmatprep.mubr.msk.bf16.mxu0 %vm8789_vm12, %v8788_v62 }
 0x3e7   : > { %8250 = vmatprep.subr.bf16.mxu0 %v8788_v62 }
 0x3ea   : > { %8251 = vmatpush3.bf16.msra.mxu0 %v8665_v54 }
 0x3eb   : > { %8252 = vmatprep.subr.bf16.mxu0 %v8788_v62 }
 0x3ee   : > { %8253 = vmatpush3.bf16.msra.mxu0 %v8666_v27 }
 0x3ef   : > { %8254 = vmatprep.subr.bf16.mxu0 %v8788_v62 }
 0x3f2   : > { %8255 = vmatpush3.bf16.msra.mxu0 %v8667_v61 }
 0x3f3   : > { %8260 = vmatprep.subr.bf16.mxu0 %v8788_v62 }
 0x3f5   : > { %8257 = vmatmul.mubr.msk.bf16.vlgmr.msra.gmra.mrb[40].mxu0 %vm785_vm7, %v5445_v56 }
 0x3f6   : > { %8261 = vmatpush3.bf16.msra.mxu0 %v8668_v25  ;;  %8268 = vmatprep.mubr.msk.bf16.mxu0 %vm8789_vm12, %v8788_v62 }
 0x3f7   : > { %8262 = vmatprep.subr.bf16.mxu0 %v8788_v62 }
 0x3fa   : > { %8263 = vmatpush3.bf16.msra.mxu0 %v8669_v8 }
 0x3fb   : > { %8264 = vmatprep.subr.bf16.mxu0 %v8788_v62 }
 0x3fe   : > { %8265 = vmatpush3.bf16.msra.mxu0 %v8670_v6 }
 0x3ff   : > { %8266 = vmatprep.subr.bf16.mxu0 %v8788_v62 }
 0x402   : > { %8267 = vmatpush3.bf16.msra.mxu0 %v8671_v12 }
 0x403   : > { %8380 = vmatprep.subr.bf16.mxu0 %v8788_v62 }
 0x405   : > { %8269 = vmatmul.mubr.msk.bf16.vlgmr.msra.gmra.mrb[40].mxu0 %vm785_vm7, %v5597_v37 }
 0x406   : > { %8388 = vmatprep.mubr.msk.bf16.mxu0 %vm8789_vm12, %v8788_v62 }
 0x4d8   : > { %v5659_v46 = vpop.f32.mrb[40].mxu0 }
 0x4d9   : > { %v5673_v29 = vmul.f32 %v7560_v63, %v5659_v46  ;;  %v8270_v19 = vpop.f32.mrb[41].mxu0 }
 0x4da   : > { %v5662_v7 = vpop.f32.mrb[42].mxu0 }
 0x4db   : > { %v5680_v18 = vadd.f32 %v7561_v60, %v5673_v29  ;;  %v5674_v22 = vmul.f32 %v7560_v63, %v5662_v7  ;;  %v8271_v55 = vpop.f32.mrb[43].mxu0 }
 0x4dd   : > { %vm5682_vm5 = vcmp.gt.f32.partialorder %v5680_v18, 0.0  ;;  %v5684_v33 = vmul.f32 0.01, %v5680_v18  ;;  %v5681_v49 = vadd.f32 %v7561_v60, %v5674_v22 }
 0x4df   : > { %v5686_v5 = vsel %vm5682_vm5, %v5680_v18, %v5684_v33  ;;  %vm5683_vm10 = vcmp.gt.f32.partialorder %v5681_v49, 0.0  ;;  %v5685_v43 = vmul.f32 0.01, %v5681_v49  ;;  %vm5862_vm5 = vsmask.f32 1282 }
 0x4e0   : > { %v5690_v51 = vcombine.high %v5686_v5, %v5686_v5  ;;  %v5694_v34 = vsel %vm10591_vm0, %v5686_v5, -inf  ;;  %vm5907_vm0 = vsmask.f32 4368 }
 0x4e1   : > { %v5687_v4 = vsel %vm5683_vm10, %v5681_v49, %v5685_v43  ;;  %vm5906_vm10 = vmor %vm5904_vm9, %vm5905_vm6 }
 0x4e2   : > { %v5695_v32 = vsel %vm10592_vm2, %v5690_v51, -inf  ;;  %v5691_v10 = vcombine.high %v5687_v4, %v5687_v4  ;;  %v5697_v35 = vsel %vm10593_vm4, %v5687_v4, -inf  ;;  %vm5863_vm2 = vmand %vm1186_vm11, %vm5862_vm5 }
 0x4e3   : > { %v5696_v59 = vmax.f32 %v5694_v34, %v5695_v32  ;;  %v5864_v34 = vld [vmem:[#allocation4 + $0x2] sm:$0x3]  ;;  %vm5908_vm4 = vmor %vm5906_vm10, %vm5907_vm0 }
 0x4e4   : > { %v5698_v13 = vsel %vm10594_vm14, %v5691_v10, -inf  ;;  %vm5909_vm14 = vsmask.f32 5396 }
 0x4e5   : > { %v5708_v38 = vrot.slane %v5696_v59, %v8974_v58  ;;  %v5699_v42 = vmax.f32 %v5697_v35, %v5698_v13  ;;  %v5867_v35 = vld [vmem:[#allocation4 + $0x4] sm:$0x3]  ;;  %vm5910_vm1 = vmor %vm5908_vm4, %vm5909_vm14 }
 0x4e6   : > { %vm5912_vm15 = vmor %vm5910_vm1, %vm5911_vm3 }
 0x4e7   : > { %v5709_v45 = vcombine.high %v5708_v38, %v5708_v38  ;;  %v5722_v26 = vsel %vm1186_vm11, %v5708_v38, -inf  ;;  %v5716_v24 = vrot.slane %v5699_v42, %v8974_v58  ;;  %v7570_v42 = vld.sshfl [vmem:[#allocation4] sm:$0x11 pattern:$0x75316420] }
 0x4e8   : > { %v5723_v20 = vrot.slane %v5722_v26, 4 }
 0x4e9   : > { %v5729_v28 = vsel %vm1186_vm11, %v5709_v45, -inf  ;;  %v5717_v3 = vcombine.high %v5716_v24, %v5716_v24  ;;  %v5736_v47 = vsel %vm1186_vm11, %v5716_v24, -inf  ;;  %v8790_v24 = vmov 1966171168  }
 0x4ea   : > { %v5724_v54 = vmax.f32 %v5722_v26, %v5723_v20  ;;  %v5730_v57 = vrot.slane %v5729_v28, 4  ;;  %v5737_v27 = vrot.slane %v5736_v47, 4  ;;  %v5892_v26 = vcombine.high %v7570_v42, %v7570_v42 }
 0x4eb   : > { %v5743_v44 = vsel %vm1186_vm11, %v5717_v3, -inf  ;;  %v5944_v20 = vunpack.c.l.s4 %v8790_v24  ;;  %v8696_v24 = vld [vmem:[%s10560_s2 + $0x300] sm:$0xff]  }
 0x4ec   : > { %v5725_v15 = vrot.slane %v5724_v54, 2  ;;  %v5731_v61 = vmax.f32 %v5729_v28, %v5730_v57  ;;  %v5738_v17 = vmax.f32 %v5736_v47, %v5737_v27  ;;  %v5744_v39 = vrot.slane %v5743_v44, 4 }
 0x4ed   : > { %v5916_v28 = vshrl.u32 %v7570_v42, 16  ;;  %v5921_v3 = vshll.u32 %v5892_v26, 16  ;;  %v5945_v27 = vunpack.c.0.s8 %v5944_v20 }
 0x4ee   : > { %v5726_v25 = vmax.f32 %v5724_v54, %v5725_v15  ;;  %v5732_v56 = vrot.slane %v5731_v61, 2  ;;  %v5739_v50 = vrot.slane %v5738_v17, 2  ;;  %v5745_v0 = vmax.f32 %v5743_v44, %v5744_v39  ;;  %v8704_v54 = vld [vmem:[%s10560_s2 + $0x340] sm:$0xff]  }
 0x4f0   : > { %v5727_v8 = vrot.slane %v5726_v25, 1  ;;  %v5733_v14 = vmax.f32 %v5731_v61, %v5732_v56  ;;  %v5740_v6 = vmax.f32 %v5738_v17, %v5739_v50  ;;  %v5746_v36 = vrot.slane %v5745_v0, 2 }
 0x4f1   : > { %v10291_v50 = vsub.s32 %v5945_v27, %v8966_v48  ;;  %v8677_v48 = vld [vmem:[%s10560_s2 + $0x248] sm:$0xff]  }
 0x4f2   : > { %v5728_v12 = vmax.f32 %v5726_v25, %v5727_v8  ;;  %v5734_v41 = vrot.slane %v5733_v14, 1  ;;  %v5741_v37 = vrot.slane %v5740_v6, 1  ;;  %v5747_v31 = vmax.f32 %v5745_v0, %v5746_v36  ;;  %v8676_v36 = vld [vmem:[%s10560_s2 + $0x240] sm:$0xff]  }
 0x4f4   : > { %v5735_v52 = vmax.f32 %v5733_v14, %v5734_v41  ;;  %v5769_v16 = vpack.c.bf16 %v5728_v12, %v5728_v12  ;;  %v5742_v11 = vmax.f32 %v5740_v6, %v5741_v37  ;;  %v5748_v23 = vrot.slane %v5747_v31, 1 }
 0x4f6   : > { %v5770_v53 = vpack.c.bf16 %v5735_v52, %v5735_v52  ;;  %v5783_v2 = vrot.slane %v5769_v16, %v8974_v58  ;;  %v5749_v1 = vmax.f32 %v5747_v31, %v5748_v23  ;;  %v5771_v30 = vpack.c.bf16 %v5742_v11, %v5742_v11  ;;  %v5870_v52 = vld [vmem:[#allocation4] sm:$0x1]  ;;  %v8678_v11 = vld [vmem:[%s10560_s2 + $0x250] sm:$0xff]  }
 0x4f8   : > { %v5790_v9 = vrot.slane %v5770_v53, %v8974_v58  ;;  %v5811_v21 = vrot.slane %v5783_v2, %v8974_v58  ;;  %v5772_v40 = vpack.c.bf16 %v5749_v1, %v5749_v1  ;;  %v5797_v63 = vrot.slane %v5771_v30, %v8974_v58  ;;  %v8679_v53 = vld [vmem:[%s10560_s2 + $0x258] sm:$0xff]   ;;  %v8680_v1 = vld [vmem:[%s10560_s2 + $0x280] sm:$0xff]  }
 0x4fa   : > { %v5818_v46 = vrot.slane %v5790_v9, %v8974_v58  ;;  %v5833_v60 = vunpack.c.l.b16 %v5811_v21  ;;  %v5804_v29 = vrot.slane %v5772_v40, %v8974_v58  ;;  %v5825_v19 = vrot.slane %v5797_v63, %v8974_v58  ;;  %v8681_v9 = vld [vmem:[%s10560_s2 + $0x288] sm:$0xff]   ;;  %v8682_v63 = vld [vmem:[%s10560_s2 + $0x290] sm:$0xff]  }
 0x4fb   : > { %v7592_v21 = vld.sshfl [vmem:[#allocation4] sm:$0x10 pattern:$0x75316420] }
 0x4fc   : > { %v5834_v7 = vunpack.c.l.b16 %v5818_v46  ;;  %v5832_v18 = vrot.slane %v5804_v29, %v8974_v58  ;;  %v5835_v22 = vunpack.c.l.b16 %v5825_v19  ;;  %v5837_v55 = vrot.slane %v5833_v60, 7  ;;  %v8683_v60 = vld [vmem:[%s10560_s2 + $0x298] sm:$0xff]   ;;  %v8684_v19 = vld [vmem:[%s10560_s2 + $0x2a0] sm:$0xff]  }
 0x4fe   : > { %v5838_v33 = vrot.slane %v5834_v7, 6  ;;  %v5836_v49 = vunpack.c.l.b16 %v5832_v18  ;;  %v5840_v43 = vrot.slane %v5835_v22, 7  ;;  %v8685_v18 = vld [vmem:[%s10560_s2 + $0x2a8] sm:$0xff]  }
 0x500   : > { %v5839_v5 = vsel %vm2016_vm13, %v5838_v33, %v5837_v55  ;;  %v5841_v51 = vrot.slane %v5836_v49, 6  ;;  %v8686_v55 = vld [vmem:[%s10560_s2 + $0x2b0] sm:$0xff]  }
 0x501   : > { %v5843_v4 = vpack.c.b16 %v5839_v5, %v5839_v5  ;;  %v8687_v5 = vld [vmem:[%s10560_s2 + $0x2b8] sm:$0xff]  }
 0x502   : > { %v5842_v32 = vsel %vm2016_vm13, %v5841_v51, %v5840_v43  ;;  %vm10282_vm13 = vmor %vm5912_vm15, %vm5913_vm8  ;;  %v8688_v51 = vld [vmem:[%s10560_s2 + $0x2c0] sm:$0xff]  }
 0x503   : > { %v5851_v10 = vrot.slane %v5843_v4, %v8974_v58  ;;  %v5844_v59 = vpack.c.b16 %v5842_v32, %v5842_v32  ;;  %v5923_v44 = vsel %vm10282_vm13, %v5916_v28, %v5921_v3  ;;  %v8690_v32 = vld [vmem:[%s10560_s2 + $0x2d0] sm:$0xff]   ;;  %v8697_v28 = vld [vmem:[%s10560_s2 + $0x308] sm:$0xff]  }
 0x505   : > { %v5865_v13 = vsel %vm5863_vm2, %v5851_v10, %v5864_v34  ;;  %v5858_v38 = vrot.slane %v5844_v59, %v8974_v58  ;;  %v8689_v34 = vld [vmem:[%s10560_s2 + $0x2c8] sm:$0xff]   ;;  %v8691_v10 = vld [vmem:[%s10560_s2 + $0x2d8] sm:$0xff]   ;;  %v8692_v59 = vld [vmem:[%s10560_s2 + $0x2e0] sm:$0xff]  }
 0x506   : > { %5866 = vst [vmem:[#allocation4 + $0x2] sm:$0x3] %v5865_v13 }
 0x507   : > { %v5868_v45 = vsel %vm5863_vm2, %v5858_v38, %v5867_v35  ;;  %v8693_v35 = vld [vmem:[%s10560_s2 + $0x2e8] sm:$0xff]   ;;  %v8694_v38 = vld [vmem:[%s10560_s2 + $0x2f0] sm:$0xff]  }
 0x508   : > { %5869 = vst [vmem:[#allocation4 + $0x4] sm:$0x3] %v5868_v45  ;;  %v8695_v45 = vld [vmem:[%s10560_s2 + $0x2f8] sm:$0xff]  }
 0x50d   : > { %v7571_v47 = vld.sshfl [vmem:[#allocation4 + $0x2] sm:$0x11 pattern:$0x75316420] }
 0x50e   : > { %v5900_v57 = vcombine.high %v7571_v47, %v7571_v47  ;;  %v5925_v15 = vshrl.u32 %v7571_v47, 16  ;;  %v5871_v16 = vld [vmem:[#allocation4 + $0x2] sm:$0x1]  ;;  %v6560_v47 = vld [vmem:[#allocation4 + $0x6] sm:$0x1] }
 0x50f   : > { %v7622_v17 = vld.sshfl [vmem:[#allocation4 + $0x4] sm:$0x11 pattern:$0x75316420]  ;;  %v6026_v23 = vcombine.low %v5870_v52, %v5871_v16  ;;  %v6220_v33 = vld [vmem:[#allocation4 + $0x2] sm:$0x1] }
 0x510   : > { %v5930_v61 = vshll.u32 %v5900_v57, 16  ;;  %v6335_v39 = vcombine.high %v7622_v17, %v7622_v17  ;;  %v6346_v0 = vshrl.u32 %v7622_v17, 16  ;;  %v7593_v40 = vld.sshfl [vmem:[#allocation4 + $0x2] sm:$0x10 pattern:$0x75316420] }
 0x511   : > { %v6033_v2 = vrot.slane %v6026_v23, %v10291_v50  ;;  %v7602_v46 = vcombine.high %v7592_v21, %v7593_v40  ;;  %v6221_v22 = vld [vmem:[#allocation4 + $0x4] sm:$0x1]  ;;  %v10400_v13 = vld.sshfl [vmem:[#allocation4 + $0x4] sm:$0x10 pattern:$0x75316420] }
 0x512   : > { %v5932_v25 = vsel %vm10282_vm13, %v5925_v15, %v5930_v61  ;;  %v6351_v8 = vshll.u32 %v6335_v39, 16  ;;  %v6233_v49 = vcombine.low %v6220_v33, %v6221_v22  ;;  %v7648_v42 = vcombine.high %v7593_v40, %v10400_v13  ;;  %v6559_v3 = vld [vmem:[#allocation4 + $0x4] sm:$0x1]  ;;  %v8698_v57 = vld [vmem:[%s10560_s2 + $0x310] sm:$0xff]   ;;  %v8699_v15 = vld [vmem:[%s10560_s2 + $0x318] sm:$0xff]  }
 0x513   : > { %v5942_v56 = vcombine.low %v5923_v44, %v5932_v25  ;;  %v6040_v30 = vrot.slane %v6033_v2, %v10291_v50  ;;  %v6144_v29 = vrot.slane %v7602_v46, %v10291_v50  ;;  %v6572_v27 = vcombine.low %v6559_v3, %v6560_v47  ;;  %v7668_v44 = vld.sshfl [vmem:[#allocation4 + $0x6] sm:$0x11 pattern:$0x75316420]  ;;  %v8700_v39 = vld [vmem:[%s10560_s2 + $0x320] sm:$0xff]   ;;  %v8706_v52 = vld [vmem:[%s10560_s2 + $0x350] sm:$0xff]  }
 0x514   : > { %v10296_v6 = vsel %vm10282_vm13, %v6346_v0, %v6351_v8  ;;  %v6240_v43 = vrot.slane %v6233_v49, %v10291_v50  ;;  %v6482_v26 = vrot.slane %v7648_v42, %v10291_v50  ;;  %v6674_v17 = vcombine.high %v7668_v44, %v7668_v44  ;;  %v8701_v8 = vld [vmem:[%s10560_s2 + $0x328] sm:$0xff]   ;;  %v8708_v2 = vld [vmem:[%s10563_s5] sm:$0xff]  }
 0x515   : > { %v5949_v14 = vrot.slane %v5942_v56, %v10291_v50  ;;  %v6363_v12 = vcombine.low %v5932_v25, %v10296_v6  ;;  %v6151_v7 = vrot.slane %v6144_v29, %v10291_v50  ;;  %v6579_v61 = vrot.slane %v6572_v27, %v10291_v50  ;;  %8381 = vmatpush3.bf16.msra.mxu0 %v8708_v2  ;;  %v7701_v40 = vld [vmem:[%s10562_s4 + $0x3] ss:$0 sm:$0xff] }
 0x516   : > { %v6247_v4 = vrot.slane %v6240_v43, %v10291_v50  ;;  %v6489_v20 = vrot.slane %v6482_v26, %v10291_v50  ;;  %v6685_v56 = vshrl.u32 %v7668_v44, 16  ;;  %v6690_v0 = vshll.u32 %v6674_v17, 16  ;;  %8382 = vmatprep.subr.bf16.mxu0 %v8788_v62 }
 0x517   : > { %v5956_v41 = vrot.slane %v5949_v14, %v10291_v50  ;;  %v10304_v37 = vrot.slane %v6363_v12, %v10291_v50  ;;  %v6586_v25 = vrot.slane %v6579_v61, %v10291_v50 }
 0x518   : > { %v6692_v14 = vsel %vm10282_vm13, %v6685_v56, %v6690_v0 }
 0x519   : > { %8281 = vmatmul.mubr.msk.bf16.vlgmr.msra.gmra.mrb[8].mxu1 %vm785_vm7, %v5956_v41  ;;  %v6377_v31 = vrot.slane %v10304_v37, %v10291_v50  ;;  %v6702_v12 = vcombine.low %v10296_v6, %v6692_v14  ;;  %v8703_v41 = vld [vmem:[%s10560_s2 + $0x338] sm:$0xff]   ;;  %v8705_v6 = vld [vmem:[%s10560_s2 + $0x348] sm:$0xff]  }
 0x51a   : > { %8285 = vmatpush3.bf16.msra.mxu1 %v8676_v36  ;;  %8292 = vmatprep.mubr.msk.bf16.mxu1 %vm8789_vm12, %v8788_v62  ;;  %v8702_v36 = vld [vmem:[%s10560_s2 + $0x330] sm:$0xff]  }
 0x51b   : > { %8286 = vmatprep.subr.bf16.mxu1 %v8788_v62  ;;  %v6709_v37 = vrot.slane %v6702_v12, %v10291_v50 }
 0x51e   : > { %8287 = vmatpush3.bf16.msra.mxu1 %v8677_v48  ;;  %v6716_v48 = vrot.slane %v6709_v37, %v10291_v50 }
 0x51f   : > { %8288 = vmatprep.subr.bf16.mxu1 %v8788_v62 }
 0x522   : > { %8289 = vmatpush3.bf16.msra.mxu1 %v8678_v11  ;;  %v8707_v11 = vld [vmem:[%s10560_s2 + $0x358] sm:$0xff]  }
 0x523   : > { %8290 = vmatprep.subr.bf16.mxu1 %v8788_v62 }
 0x526   : > { %8291 = vmatpush3.bf16.msra.mxu1 %v8679_v53 }
 0x527   : > { %8296 = vmatprep.subr.bf16.mxu1 %v8788_v62 }
 0x529   : > { %8293 = vmatmul.mubr.msk.bf16.vlgmr.msra.gmra.mrb[8].mxu1 %vm785_vm7, %v6040_v30  ;;  %v8710_v30 = vld [vmem:[%s10563_s5 + $0x10] sm:$0xff]  }
 0x52a   : > { %8297 = vmatpush3.bf16.msra.mxu1 %v8680_v1  ;;  %8304 = vmatprep.mubr.msk.bf16.mxu1 %vm8789_vm12, %v8788_v62  ;;  %v8709_v1 = vld [vmem:[%s10563_s5 + $0x8] sm:$0xff]  }
 0x52b   : > { %8298 = vmatprep.subr.bf16.mxu1 %v8788_v62  ;;  %8383 = vmatpush3.bf16.msra.mxu0 %v8709_v1 }
 0x52c   : > { %8384 = vmatprep.subr.bf16.mxu0 %v8788_v62 }
 0x52e   : > { %8299 = vmatpush3.bf16.msra.mxu1 %v8681_v9  ;;  %v7700_v9 = vld [vmem:[%s10561_s3 + $0x3] ss:$0 sm:$0xff] }
 0x52f   : > { %8300 = vmatprep.subr.bf16.mxu1 %v8788_v62  ;;  %8385 = vmatpush3.bf16.msra.mxu0 %v8710_v30 }
 0x530   : > { %8386 = vmatprep.subr.bf16.mxu0 %v8788_v62 }
 0x532   : > { %8301 = vmatpush3.bf16.msra.mxu1 %v8682_v63 }
 0x533   : > { %8302 = vmatprep.subr.bf16.mxu1 %v8788_v62 }
 0x536   : > { %8303 = vmatpush3.bf16.msra.mxu1 %v8683_v60 }
 0x537   : > { %8308 = vmatprep.subr.bf16.mxu1 %v8788_v62 }
 0x539   : > { %8305 = vmatmul.mubr.msk.bf16.vlgmr.msra.gmra.mrb[8].mxu1 %vm785_vm7, %v6151_v7 }
 0x53a   : > { %8309 = vmatpush3.bf16.msra.mxu1 %v8684_v19  ;;  %8316 = vmatprep.mubr.msk.bf16.mxu1 %vm8789_vm12, %v8788_v62 }
 0x53b   : > { %8310 = vmatprep.subr.bf16.mxu1 %v8788_v62 }
 0x53e   : > { %8311 = vmatpush3.bf16.msra.mxu1 %v8685_v18 }
 0x53f   : > { %8312 = vmatprep.subr.bf16.mxu1 %v8788_v62 }
 0x542   : > { %8313 = vmatpush3.bf16.msra.mxu1 %v8686_v55 }
 0x543   : > { %8314 = vmatprep.subr.bf16.mxu1 %v8788_v62 }
 0x546   : > { %8315 = vmatpush3.bf16.msra.mxu1 %v8687_v5 }
 0x547   : > { %8320 = vmatprep.subr.bf16.mxu1 %v8788_v62 }
 0x549   : > { %8317 = vmatmul.mubr.msk.bf16.vlgmr.msra.gmra.mrb[8].mxu1 %vm785_vm7, %v6247_v4 }
 0x54a   : > { %8321 = vmatpush3.bf16.msra.mxu1 %v8688_v51  ;;  %8328 = vmatprep.mubr.msk.bf16.mxu1 %vm8789_vm12, %v8788_v62 }
 0x54b   : > { %8322 = vmatprep.subr.bf16.mxu1 %v8788_v62 }
 0x54e   : > { %8323 = vmatpush3.bf16.msra.mxu1 %v8689_v34 }
 0x54f   : > { %8324 = vmatprep.subr.bf16.mxu1 %v8788_v62 }
 0x552   : > { %8325 = vmatpush3.bf16.msra.mxu1 %v8690_v32 }
 0x553   : > { %8326 = vmatprep.subr.bf16.mxu1 %v8788_v62 }
 0x556   : > { %8327 = vmatpush3.bf16.msra.mxu1 %v8691_v10 }
 0x557   : > { %8332 = vmatprep.subr.bf16.mxu1 %v8788_v62 }
 0x559   : > { %8329 = vmatmul.mubr.msk.bf16.vlgmr.msra.gmra.mrb[8].mxu1 %vm785_vm7, %v6377_v31  ;;  %v7685_v31 = vld.sshfl [vmem:[#allocation4 + $0x6] sm:$0x10 pattern:$0x75316420] }
 0x55a   : > { %8333 = vmatpush3.bf16.msra.mxu1 %v8692_v59  ;;  %8340 = vmatprep.mubr.msk.bf16.mxu1 %vm8789_vm12, %v8788_v62  ;;  %v7694_v16 = vcombine.high %v10400_v13, %v7685_v31 }
 0x55b   : > { %8334 = vmatprep.subr.bf16.mxu1 %v8788_v62 }
 0x55c   : > { %v6821_v23 = vrot.slane %v7694_v16, %v10291_v50 }
 0x55e   : > { %8335 = vmatpush3.bf16.msra.mxu1 %v8693_v35  ;;  %v6828_v53 = vrot.slane %v6821_v23, %v10291_v50  ;;  %v8711_v50 = vld [vmem:[%s10563_s5 + $0x18] sm:$0xff]  }
 0x55f   : > { %8336 = vmatprep.subr.bf16.mxu1 %v8788_v62  ;;  %8387 = vmatpush3.bf16.msra.mxu0 %v8711_v50 }
 0x562   : > { %8337 = vmatpush3.bf16.msra.mxu1 %v8694_v38 }
 0x563   : > { %8338 = vmatprep.subr.bf16.mxu1 %v8788_v62 }
 0x566   : > { %8339 = vmatpush3.bf16.msra.mxu1 %v8695_v45 }
 0x567   : > { %8344 = vmatprep.subr.bf16.mxu1 %v8788_v62 }
 0x569   : > { %8341 = vmatmul.mubr.msk.bf16.vlgmr.msra.gmra.mrb[8].mxu1 %vm785_vm7, %v6489_v20 }
 0x56a   : > { %8345 = vmatpush3.bf16.msra.mxu1 %v8696_v24  ;;  %8352 = vmatprep.mubr.msk.bf16.mxu1 %vm8789_vm12, %v8788_v62 }
 0x56b   : > { %8346 = vmatprep.subr.bf16.mxu1 %v8788_v62 }
 0x56e   : > { %8347 = vmatpush3.bf16.msra.mxu1 %v8697_v28 }
 0x56f   : > { %8348 = vmatprep.subr.bf16.mxu1 %v8788_v62 }
 0x572   : > { %8349 = vmatpush3.bf16.msra.mxu1 %v8698_v57 }
 0x573   : > { %8350 = vmatprep.subr.bf16.mxu1 %v8788_v62 }
 0x576   : > { %8351 = vmatpush3.bf16.msra.mxu1 %v8699_v15 }
 0x577   : > { %8356 = vmatprep.subr.bf16.mxu1 %v8788_v62 }
 0x579   : > { %8353 = vmatmul.mubr.msk.bf16.vlgmr.msra.gmra.mrb[8].mxu1 %vm785_vm7, %v6586_v25 }
 0x57a   : > { %8357 = vmatpush3.bf16.msra.mxu1 %v8700_v39  ;;  %8364 = vmatprep.mubr.msk.bf16.mxu1 %vm8789_vm12, %v8788_v62 }
 0x57b   : > { %8358 = vmatprep.subr.bf16.mxu1 %v8788_v62 }
 0x57e   : > { %8359 = vmatpush3.bf16.msra.mxu1 %v8701_v8 }
 0x57f   : > { %8360 = vmatprep.subr.bf16.mxu1 %v8788_v62 }
 0x582   : > { %8361 = vmatpush3.bf16.msra.mxu1 %v8702_v36 }
 0x583   : > { %8362 = vmatprep.subr.bf16.mxu1 %v8788_v62 }
 0x586   : > { %8363 = vmatpush3.bf16.msra.mxu1 %v8703_v41 }
 0x587   : > { %8368 = vmatprep.subr.bf16.mxu1 %v8788_v62 }
 0x589   : > { %8365 = vmatmul.mubr.msk.bf16.vlgmr.msra.gmra.mrb[8].mxu1 %vm785_vm7, %v6716_v48 }
 0x58a   : > { %8369 = vmatpush3.bf16.msra.mxu1 %v8704_v54  ;;  %8376 = vmatprep.mubr.msk.bf16.mxu1 %vm8789_vm12, %v8788_v62 }
 0x58b   : > { %8370 = vmatprep.subr.bf16.mxu1 %v8788_v62 }
 0x58e   : > { %8371 = vmatpush3.bf16.msra.mxu1 %v8705_v6 }
 0x58f   : > { %8372 = vmatprep.subr.bf16.mxu1 %v8788_v62 }
 0x592   : > { %8373 = vmatpush3.bf16.msra.mxu1 %v8706_v52 }
 0x593   : > { %8374 = vmatprep.subr.bf16.mxu1 %v8788_v62 }
 0x596   : > { %8375 = vmatpush3.bf16.msra.mxu1 %v8707_v11 }
 0x599   : > { %8377 = vmatmul.mubr.msk.bf16.vlgmr.msra.gmra.mrb[8].mxu1 %vm785_vm7, %v6828_v53 }
 0x66c   : > { %v6890_v21 = vpop.f32.mrb[8].mxu1 }
 0x66d   : > { %v6902_v63 = vmul.f32 %v7700_v9, %v6890_v21  ;;  %v8378_v46 = vpop.f32.mrb[9].mxu1 }
 0x66e   : > { %v6893_v60 = vpop.f32.mrb[10].mxu1 }
 0x66f   : > { %v6908_v29 = vadd.f32 %v7701_v40, %v6902_v63  ;;  %v8379_v19 = vpop.f32.mrb[11].mxu1 }
 0x671   : > { %vm6909_vm12 = vcmp.gt.f32.partialorder %v6908_v29, 0.0  ;;  %v6910_v7 = vmul.f32 0.01, %v6908_v29 }
 0x673   : > { %v6911_v18 = vsel %vm6909_vm12, %v6908_v29, %v6910_v7 }
 0x674   : > { %v6919_v62 = vrot.slane %v6911_v18, %v8974_v58  ;;  %v6942_v58 = vld [vmem:[%s10564_s6] sm:$0x1] }
 0x676   : > { %v6920_v22 = vcombine.high %v6919_v62, %v6919_v62  ;;  %v6923_v55 = vsel %vm1186_vm11, %v6919_v62, -inf }
 0x678   : > { %v6924_v33 = vsel %vm1186_vm11, %v6920_v22, -inf }
 0x679   : > { %v6925_v49 = vmax.f32 %v6923_v55, %v6924_v33 }
 0x67b   : > { %v6926_v5 = vsel %vm1186_vm11, %v6925_v49, -inf }
 0x67c   : > { %v6927_v43 = vrot.slane %v6926_v5, 4 }
 0x67e   : > { %v6928_v51 = vmax.f32 %v6926_v5, %v6927_v43 }
 0x680   : > { %v6929_v4 = vrot.slane %v6928_v51, 2 }
 0x682   : > { %v6930_v34 = vmax.f32 %v6928_v51, %v6929_v4 }
 0x684   : > { %v6931_v32 = vrot.slane %v6930_v34, 1 }
 0x686   : > { %v6932_v10 = vmax.f32 %v6930_v34, %v6931_v32 }
 0x688   : > { %v6933_v59 = vpack.c.bf16 %v6932_v10, %v6932_v10 }
 0x68a   : > { %8389 = vmatmul.mubr.msk.bf16.vlgmr.msra.gmra.mrb[44].mxu0 %vm785_vm7, %v6933_v59  ;;  %vm10598_vm7 = vcmask 516096  }
 0x75d   : > { %v7004_v35 = vpop.f32.mrb[44].mxu0 }
 0x75e   : > { %v7005_v13 = vadd.f32 %v7004_v35, %v6942_v58  ;;  %v8390_v38 = vpop.f32.mrb[45].mxu0 }
 0x75f   : > { %v7007_v42 = vpop.f32.mrb[46].mxu0 }
 0x760   : > { %v8391_v45 = vpop.f32.mrb[47].mxu0  ;;  %7010 = vst.msk [vmem:[%s270_s22] sm:$0x1] %vm10598_vm7, %v7005_v13 }
 0x761   : > { %8735 = shalt.err (!%p8732_p3)
}
 0x762   : > { %s8736_s17 = scalar_lea.hbm %s10515_s9, 16  ;;  %s8740_s20 = scalar_lea.hbm %s10565_s7, 32 }
 0x763   : > { %p8737_p4 = scmp.ne.s32.totalorder %s10515_s9, %s8736_s17  ;;  %p8741_p9 = scmp.lt.u32.totalorder %s10515_s9, %s10565_s7 }
 0x764   : > { %p8742_p10 = scmp.lt.u32.totalorder %s8740_s20, %s8736_s17  ;;  %p8744_p12 = scmp.lt.u32.totalorder %s8736_s17, %s10515_s9 }
 0x765   : > { %p8738_p7 = pnand %p8737_p4, %p8870_p5 }
 0x766   : > { %p8743_p11 = por %p8742_p10, %p8741_p9 }
 0x767   : > { %p8739_p8 = pneg %p8738_p7 }
 0x768   : > { %p8745_p13 = por %p8744_p12, %p8743_p11 }
 0x76a   : > { %p8746_p0 = pnand %p8745_p13, %p8739_p8 }
 0x76c   : > { %8749 = shalt.err (!%p8746_p0)
}
 0x76d   : > { %8520 = dma.vmem_to_hbm [thread:$0]  (%p8870_p5), %s10517_s23, 16, %s10515_s9, %s7012_s28  }
 0x76e PF: > { %p8526_p1 = scmp.ge.s32.totalorder %s8784_s27, 2  ;;  %s7036_s29 = sand.u32 1, %s8772_s24  }
 0x76f   : > { %s7037_s8 = scalar_lea.sflag [#allocation6], %s7036_s29 }
 0x770   : > { %p8523_p2 = pnand %p8526_p1, %p8874_p6 }
 0x772   : > { %8767 = dma.done.wait (!%p8523_p2), %s7037_s8, 16  }
 0x773   : > { %8769 = vsyncadd (!%p8523_p2), %s7037_s8, 4294967280  ;;  %p17_p3 = scmp.ge.s32.totalorder %s8857_s30, 4   ;;  %s10599_s24 = smov %s8776_s25 }
 0x774   : > { %s10600_s25 = smov %s8780_s26  ;;  %s10601_s26 = smov %s8868_s10 }
 0x775   : > { %s10602_s27 = smov %s8857_s30  ;;  %19 = sbr.rel (!%p17_p3) target bundleno = 3 (0x3), region = 118 }
 0x77c   :  { %7041 = vsyncpa [#allocation6], 1 }
 0x77d   :  { %7043 = vsyncpa [#allocation6 + $0x1], 1 }

</bundles_post_ra>
